<compile_context>
chip_gen: v6e
topology: v6e:2x2x1
jax: 0.10.0
libtpu: 0.0.40
codegen_flags: <defaults>
</compile_context>

<pallas_src>
import functools

import jax
import jax.numpy as jnp
from jax import lax
from jax.experimental import pallas as pl
from jax.experimental.pallas import tpu as pltpu

# ---------------- scaled-down DistilBERT config ----------------
VOCAB = 64
MAX_POS = 16
DIM = 32            # hidden size   (768 in real DistilBERT)
N_HEADS = 4         # (12)
HEAD_DIM = DIM // N_HEADS   # 8
HIDDEN = 64         # FFN inner     (3072)
N_LAYERS = 2        # (6)
LN_EPS = 1e-12      # DistilBERT LayerNorm eps

# lane-dense padded sizes (multiples of 128 lanes)
DIM_P = 128                     # padded model width
HIDDEN_P = 128                  # padded FFN width
HDP = 128                       # padded per-head width (each head owns a full lane tile)
QKV_W = 3 * N_HEADS * HDP       # 1536: [q h0..h3 | k h0..h3 | v h0..h3]
OUT_W = N_HEADS * HDP           # 512


# ---------------- elementwise helpers used inside the kernel ----------------
def _erf(x):
    # Abramowitz & Stegun 7.1.26 (|err| < 1.5e-7); divide goes to the EUP.
    a1, a2, a3, a4, a5 = 0.254829592, -0.284496736, 1.421413741, -1.453152027, 1.061405429
    c = 0.3275911
    ax = jnp.abs(x)
    t = pl.reciprocal(1.0 + c * ax, approx=False)
    poly = ((((a5 * t + a4) * t + a3) * t + a2) * t + a1) * t
    y = 1.0 - poly * jnp.exp(-ax * ax)
    return jnp.where(x >= 0, y, -y)


def _gelu_exact(x):
    # matches torch.nn.functional.gelu (erf formulation) used by DistilBERT
    return 0.5 * x * (1.0 + _erf(x * 0.7071067811865476))


def _layernorm(h, g, b, dmask, inv_d, eps):
    # h: (S, DIM_P) f32 with padded columns == 0; stats over the real columns only.
    mu = jnp.sum(h, axis=-1, keepdims=True) * inv_d
    hc = (h - mu) * dmask
    var = jnp.sum(hc * hc, axis=-1, keepdims=True) * inv_d
    return (h - mu) * lax.rsqrt(var + eps) * g + b


# ---------------- the fused encoder kernel ----------------
def _encoder_kernel(x_ref, bias_ref, embg_ref, embb_ref,
                    wqkv_ref, bqkv_ref, wo_ref, bo_ref, ln1g_ref, ln1b_ref,
                    w1_ref, b1_ref, w2_ref, b2_ref, ln2g_ref, ln2b_ref,
                    o_ref, *, n_layers, n_heads, head_dim, hd_pad, d_real, eps):
    f32, bf16 = jnp.float32, jnp.bfloat16
    x = x_ref[0].astype(f32)                            # (S, DIM_P) lane-dense tile
    S, Dp = x.shape
    scale = 1.0 / (head_dim ** 0.5)                     # real head_dim
    inv_d = 1.0 / d_real
    # mask of the real (un-padded) feature columns, hoisted once for all LayerNorms
    dmask = (lax.broadcasted_iota(jnp.int32, (1, Dp), 1) < d_real).astype(f32)
    # additive key mask (0 keep / -1e9 pad), broadcast once per score tensor
    bias = bias_ref[0].astype(f32)[None]                # (1, 1, S)

    # ---- embedding LayerNorm prologue (fused: no separate kernel / HBM round trip) ----
    h = _layernorm(x, embg_ref[...], embb_ref[...], dmask, inv_d, eps)

    for l in range(n_layers):                           # static unroll; weights stay in VMEM
        # ---- fused QKV projection: ONE bf16 MXU matmul, f32 accumulate ----
        qkv = jnp.dot(h.astype(bf16), wqkv_ref[l],
                      preferred_element_type=f32) + bqkv_ref[l]        # (S, 3*H*HDP)
        qkvb = qkv.astype(bf16)                         # single cast covering q, k and v

        # head-major (H, S, HDP) stacks; every slice sits on a 128-lane tile boundary
        def heads(t):
            return jnp.stack(
                [qkvb[:, (t * n_heads + n) * hd_pad:(t * n_heads + n + 1) * hd_pad]
                 for n in range(n_heads)], axis=0)
        q, k, v = heads(0), heads(1), heads(2)

        # ---- all heads in one batched contraction; k consumed untransposed ----
        s = jnp.einsum('hqd,hkd->hqk', q, k, preferred_element_type=f32) * scale + bias
        s = s - jnp.max(s, axis=-1, keepdims=True)
        e = jnp.exp(s)
        p = (e * pl.reciprocal(jnp.sum(e, axis=-1, keepdims=True), approx=True)
             ).astype(bf16)
        ctx = jnp.einsum('hqk,hkd->hqd', p, v, preferred_element_type=f32)   # (H, S, HDP)

        # ---- merge heads (128-aligned concat) + SINGLE merged out-projection ----
        ctx = jnp.concatenate([ctx[n] for n in range(n_heads)], axis=-1)     # (S, H*HDP)
        attn = jnp.dot(ctx.astype(bf16), wo_ref[l],
                       preferred_element_type=f32) + bo_ref[l]               # (S, Dp)
        h1 = _layernorm(attn + h, ln1g_ref[l], ln1b_ref[l], dmask, inv_d, eps)

        # ---- FFN: matmul -> erf GELU -> matmul; intermediate never leaves VMEM ----
        ff = jnp.dot(h1.astype(bf16), w1_ref[l], preferred_element_type=f32) + b1_ref[l]
        ff = _gelu_exact(ff)
        ff = jnp.dot(ff.astype(bf16), w2_ref[l], preferred_element_type=f32) + b2_ref[l]
        h = _layernorm(ff + h1, ln2g_ref[l], ln2b_ref[l], dmask, inv_d, eps)

    o_ref[0] = h.astype(o_ref.dtype)


def encoder_forward(x, mask_bias, params):
    B, S, Dp = x.shape
    L = N_LAYERS

    def const(shape):
        n = len(shape)
        return pl.BlockSpec(shape, lambda b, n=n: (0,) * n)

    kernel = functools.partial(
        _encoder_kernel, n_layers=L, n_heads=N_HEADS, head_dim=HEAD_DIM,
        hd_pad=HDP, d_real=DIM, eps=LN_EPS)

    return pl.pallas_call(
        kernel,
        out_shape=jax.ShapeDtypeStruct((B, S, Dp), jnp.float32),
        grid=(B,),
        in_specs=[
            pl.BlockSpec((1, S, Dp), lambda b: (b, 0, 0)),        # activations (lane-dense)
            pl.BlockSpec((1, 1, S), lambda b: (b, 0, 0)),         # additive key-mask bias
            const((1, Dp)), const((1, Dp)),                       # embedding LN gamma/beta
            const((L, Dp, QKV_W)),                                # wqkv (bf16)
            const((L, 1, QKV_W)),                                 # bqkv
            const((L, OUT_W, Dp)),                                # wo   (bf16)
            const((L, 1, Dp)),                                    # bo
            const((L, 1, Dp)), const((L, 1, Dp)),                 # ln1 gamma/beta
            const((L, Dp, HIDDEN_P)), const((L, 1, HIDDEN_P)),    # w1 (bf16), b1
            const((L, HIDDEN_P, Dp)), const((L, 1, Dp)),          # w2 (bf16), b2
            const((L, 1, Dp)), const((L, 1, Dp)),                 # ln2 gamma/beta
        ],
        out_specs=pl.BlockSpec((1, S, Dp), lambda b: (b, 0, 0)),
        compiler_params=pltpu.CompilerParams(dimension_semantics=("parallel",)),
        # NOTE: at real DistilBERT size the constant weight specs should get
        # pipeline_mode=pl.Buffered(1) and (on v7x) per-layer weight streaming +
        # an explicit vmem_limit_bytes; weights here are ~2 MiB so it is moot.
    )(x, mask_bias,
      params["emb_ln_g"], params["emb_ln_b"],
      params["wqkv"], params["bqkv"], params["wo"], params["bo"],
      params["ln1_g"], params["ln1_b"], params["w1"], params["b1"],
      params["w2"], params["b2"], params["ln2_g"], params["ln2_b"])


# ---------------- parameters (deterministic init, zero-padded to lane tiles) ----------------
def _pad2(a, rows, cols):
    return jnp.zeros((rows, cols), a.dtype).at[:a.shape[0], :a.shape[1]].set(a)


def init_params(key):
    keys = jax.random.split(key, 2 + N_LAYERS)

    def w(k, shape):
        return (0.02 * jax.random.normal(k, shape)).astype(jnp.float32)

    # gamma = 1 on real columns, 0 on padding -> padded lanes stay identically zero
    gamma = _pad2(jnp.ones((1, DIM), jnp.float32), 1, DIM_P)
    beta = jnp.zeros((1, DIM_P), jnp.float32)

    params = {
        "word_emb": _pad2(w(keys[0], (VOCAB, DIM)), VOCAB, DIM_P),
        "pos_emb": _pad2(w(keys[1], (MAX_POS, DIM)), MAX_POS, DIM_P),
        "emb_ln_g": gamma,
        "emb_ln_b": beta,
    }

    stacks = {k: [] for k in ("wqkv", "bqkv", "wo", "bo", "ln1_g", "ln1_b",
                              "w1", "b1", "w2", "b2", "ln2_g", "ln2_b")}
    for l in range(N_LAYERS):
        lk = jax.random.split(keys[2 + l], 6)
        wq_, wk_, wv_, wo_ = (w(lk[i], (DIM, DIM)) for i in range(4))
        # per-head column blocks, each padded to a full 128-lane tile:
        # [q h0..h3 | k h0..h3 | v h0..h3]
        qkv_blocks = [_pad2(wm[:, n * HEAD_DIM:(n + 1) * HEAD_DIM], DIM_P, HDP)
                      for wm in (wq_, wk_, wv_) for n in range(N_HEADS)]
        wo_blocks = [_pad2(wo_[n * HEAD_DIM:(n + 1) * HEAD_DIM, :], HDP, DIM_P)
                     for n in range(N_HEADS)]
        stacks["wqkv"].append(jnp.concatenate(qkv_blocks, axis=1))   # (DIM_P, QKV_W)
        stacks["bqkv"].append(jnp.zeros((1, QKV_W), jnp.float32))
        stacks["wo"].append(jnp.concatenate(wo_blocks, axis=0))      # (OUT_W, DIM_P)
        stacks["bo"].append(jnp.zeros((1, DIM_P), jnp.float32))
        stacks["ln1_g"].append(gamma)
        stacks["ln1_b"].append(beta)
        stacks["w1"].append(_pad2(w(lk[4], (DIM, HIDDEN)), DIM_P, HIDDEN_P))
        stacks["b1"].append(jnp.zeros((1, HIDDEN_P), jnp.float32))
        stacks["w2"].append(_pad2(w(lk[5], (HIDDEN, DIM)), HIDDEN_P, DIM_P))
        stacks["b2"].append(jnp.zeros((1, DIM_P), jnp.float32))
        stacks["ln2_g"].append(gamma)
        stacks["ln2_b"].append(beta)

    bf16_keys = {"wqkv", "wo", "w1", "w2"}
    for k, v in stacks.items():
        arr = jnp.stack(v)
        params[k] = arr.astype(jnp.bfloat16) if k in bf16_keys else arr
    return params


# ---------------- forward: TextEncoder.forward(input_ids, attention_mask) ----------------
def text_encoder_forward(params, input_ids, attention_mask):
    B, S = input_ids.shape
    # token/position embedding gather is XLA glue; everything downstream is ONE kernel
    x = params["word_emb"][input_ids] + params["pos_emb"][:S][None, :, :]
    # additive key-side mask bias (0 keep / -1e9 pad), computed once for all layers/heads
    mask_bias = ((1.0 - attention_mask.astype(jnp.float32)) * -1e9).reshape(B, 1, S)
    h = encoder_forward(x, mask_bias, params)            # (B, S, DIM_P)
    return h[:, 0, :DIM]                                 # target_token_idx = 0 (CLS)


if __name__ == "__main__":
    key = jax.random.PRNGKey(0)
    pkey, ikey = jax.random.split(key)
    params = init_params(pkey)

    B, S = 2, 8
    input_ids = jax.random.randint(ikey, (B, S), 0, VOCAB, dtype=jnp.int32)
    lengths = jnp.array([S, 5], dtype=jnp.int32)
    attention_mask = (jnp.arange(S)[None, :] < lengths[:, None]).astype(jnp.int32)

    out = text_encoder_forward(params, input_ids, attention_mask)
    out = jax.block_until_ready(out)
    assert out.shape == (B, DIM), out.shape
    assert bool(jnp.all(jnp.isfinite(out)))
    print("KERNEL_OK")
</pallas_src>

<mosaic_0001>
module attributes {stable_mosaic.version = 11 : i64} {
  func.func @_encoder_kernel(%arg0: i32, %arg1: memref<1x8x128xf32, #tpu.memory_space<vmem>>, %arg2: memref<1x1x8xf32, #tpu.memory_space<vmem>>, %arg3: memref<1x128xf32, #tpu.memory_space<vmem>>, %arg4: memref<1x128xf32, #tpu.memory_space<vmem>>, %arg5: memref<2x128x1536xbf16, #tpu.memory_space<vmem>>, %arg6: memref<2x1x1536xf32, #tpu.memory_space<vmem>>, %arg7: memref<2x512x128xbf16, #tpu.memory_space<vmem>>, %arg8: memref<2x1x128xf32, #tpu.memory_space<vmem>>, %arg9: memref<2x1x128xf32, #tpu.memory_space<vmem>>, %arg10: memref<2x1x128xf32, #tpu.memory_space<vmem>>, %arg11: memref<2x128x128xbf16, #tpu.memory_space<vmem>>, %arg12: memref<2x1x128xf32, #tpu.memory_space<vmem>>, %arg13: memref<2x128x128xbf16, #tpu.memory_space<vmem>>, %arg14: memref<2x1x128xf32, #tpu.memory_space<vmem>>, %arg15: memref<2x1x128xf32, #tpu.memory_space<vmem>>, %arg16: memref<2x1x128xf32, #tpu.memory_space<vmem>>, %arg17: memref<1x8x128xf32, #tpu.memory_space<vmem>>) attributes {dimension_semantics = [#tpu.dimension_semantics<parallel>], iteration_bounds = array<i64: 2>, scalar_prefetch = 0 : i64, scratch_operands = 0 : i64, tpu.core_type = #tpu.core_type<tc>, window_params = [{transform_indices = @transform_0, window_bounds = array<i64: 1, 8, 128>}, {transform_indices = @transform_1, window_bounds = array<i64: 1, 1, 8>}, {pipeline_mode = #tpu.pipeline_mode<synchronous>, transform_indices = @transform_2, window_bounds = array<i64: 1, 128>}, {pipeline_mode = #tpu.pipeline_mode<synchronous>, transform_indices = @transform_3, window_bounds = array<i64: 1, 128>}, {pipeline_mode = #tpu.pipeline_mode<synchronous>, transform_indices = @transform_4, window_bounds = array<i64: 2, 128, 1536>}, {pipeline_mode = #tpu.pipeline_mode<synchronous>, transform_indices = @transform_5, window_bounds = array<i64: 2, 1, 1536>}, {pipeline_mode = #tpu.pipeline_mode<synchronous>, transform_indices = @transform_6, window_bounds = array<i64: 2, 512, 128>}, {pipeline_mode = #tpu.pipeline_mode<synchronous>, transform_indices = @transform_7, window_bounds = array<i64: 2, 1, 128>}, {pipeline_mode = #tpu.pipeline_mode<synchronous>, transform_indices = @transform_8, window_bounds = array<i64: 2, 1, 128>}, {pipeline_mode = #tpu.pipeline_mode<synchronous>, transform_indices = @transform_9, window_bounds = array<i64: 2, 1, 128>}, {pipeline_mode = #tpu.pipeline_mode<synchronous>, transform_indices = @transform_10, window_bounds = array<i64: 2, 128, 128>}, {pipeline_mode = #tpu.pipeline_mode<synchronous>, transform_indices = @transform_11, window_bounds = array<i64: 2, 1, 128>}, {pipeline_mode = #tpu.pipeline_mode<synchronous>, transform_indices = @transform_12, window_bounds = array<i64: 2, 128, 128>}, {pipeline_mode = #tpu.pipeline_mode<synchronous>, transform_indices = @transform_13, window_bounds = array<i64: 2, 1, 128>}, {pipeline_mode = #tpu.pipeline_mode<synchronous>, transform_indices = @transform_14, window_bounds = array<i64: 2, 1, 128>}, {pipeline_mode = #tpu.pipeline_mode<synchronous>, transform_indices = @transform_15, window_bounds = array<i64: 2, 1, 128>}, {transform_indices = @transform_16, window_bounds = array<i64: 1, 8, 128>}]} {
    %c0 = arith.constant 0 : index
    %c0_0 = arith.constant 0 : index
    %c0_1 = arith.constant 0 : index
    %0 = vector.load %arg1[%c0, %c0_0, %c0_1] : memref<1x8x128xf32, #tpu.memory_space<vmem>>, vector<1x8x128xf32>
    %1 = vector.shape_cast %0 : vector<1x8x128xf32> to vector<8x128xf32>
    %2 = tpu.iota {dimensions = array<i32: 1>} : vector<1x128xi32>
    %c32_i32 = arith.constant 32 : i32
    %3 = vector.broadcast %c32_i32 : i32 to vector<1x128xi32>
    %4 = arith.cmpi slt, %2, %3 : vector<1x128xi32>
    %5 = arith.extui %4 : vector<1x128xi1> to vector<1x128xi32>
    %6 = arith.sitofp %5 : vector<1x128xi32> to vector<1x128xf32>
    %c0_2 = arith.constant 0 : index
    %c0_3 = arith.constant 0 : index
    %c0_4 = arith.constant 0 : index
    %7 = vector.load %arg2[%c0_2, %c0_3, %c0_4] : memref<1x1x8xf32, #tpu.memory_space<vmem>>, vector<1x1x8xf32>
    %8 = vector.shape_cast %7 : vector<1x1x8xf32> to vector<1x8xf32>
    %9 = vector.shape_cast %8 : vector<1x8xf32> to vector<1x1x8xf32>
    %c0_5 = arith.constant 0 : index
    %c0_6 = arith.constant 0 : index
    %10 = vector.load %arg3[%c0_5, %c0_6] : memref<1x128xf32, #tpu.memory_space<vmem>>, vector<1x128xf32>
    %c0_7 = arith.constant 0 : index
    %c0_8 = arith.constant 0 : index
    %11 = vector.load %arg4[%c0_7, %c0_8] : memref<1x128xf32, #tpu.memory_space<vmem>>, vector<1x128xf32>
    %cst = arith.constant dense<0.000000e+00> : vector<8xf32>
    %12 = vector.multi_reduction <add>, %1, %cst [1] : vector<8x128xf32> to vector<8xf32>
    %13 = vector.shape_cast %12 : vector<8xf32> to vector<8x1xf32>
    %cst_9 = arith.constant 3.125000e-02 : f32
    %14 = vector.broadcast %cst_9 : f32 to vector<8x1xf32>
    %15 = arith.mulf %13, %14 : vector<8x1xf32>
    %16 = vector.broadcast %15 : vector<8x1xf32> to vector<8x128xf32>
    %17 = arith.subf %1, %16 : vector<8x128xf32>
    %18 = vector.broadcast %6 : vector<1x128xf32> to vector<8x128xf32>
    %19 = arith.mulf %17, %18 : vector<8x128xf32>
    %20 = arith.mulf %19, %19 : vector<8x128xf32>
    %cst_10 = arith.constant dense<0.000000e+00> : vector<8xf32>
    %21 = vector.multi_reduction <add>, %20, %cst_10 [1] : vector<8x128xf32> to vector<8xf32>
    %22 = vector.shape_cast %21 : vector<8xf32> to vector<8x1xf32>
    %cst_11 = arith.constant 3.125000e-02 : f32
    %23 = vector.broadcast %cst_11 : f32 to vector<8x1xf32>
    %24 = arith.mulf %22, %23 : vector<8x1xf32>
    %25 = vector.broadcast %15 : vector<8x1xf32> to vector<8x128xf32>
    %26 = arith.subf %1, %25 : vector<8x128xf32>
    %cst_12 = arith.constant 9.99999996E-13 : f32
    %27 = vector.broadcast %cst_12 : f32 to vector<8x1xf32>
    %28 = arith.addf %24, %27 : vector<8x1xf32>
    %29 = math.rsqrt %28 : vector<8x1xf32>
    %30 = vector.broadcast %29 : vector<8x1xf32> to vector<8x128xf32>
    %31 = arith.mulf %26, %30 : vector<8x128xf32>
    %32 = vector.broadcast %10 : vector<1x128xf32> to vector<8x128xf32>
    %33 = arith.mulf %31, %32 : vector<8x128xf32>
    %34 = vector.broadcast %11 : vector<1x128xf32> to vector<8x128xf32>
    %35 = arith.addf %33, %34 : vector<8x128xf32>
    %36 = arith.truncf %35 : vector<8x128xf32> to vector<8x128xbf16>
    %c0_13 = arith.constant 0 : index
    %c0_14 = arith.constant 0 : index
    %c0_15 = arith.constant 0 : index
    %37 = vector.load %arg5[%c0_13, %c0_14, %c0_15] : memref<2x128x1536xbf16, #tpu.memory_space<vmem>>, vector<1x128x1536xbf16>
    %38 = vector.shape_cast %37 : vector<1x128x1536xbf16> to vector<128x1536xbf16>
    %cst_16 = arith.constant dense<0.000000e+00> : vector<8x1536xf32>
    %39 = tpu.matmul %36, %38, %cst_16 {dimension_numbers = #tpu.dot_dimension_numbers<[1], [0], [0], [1], [0, 0, 1, 1], [], []>} : vector<8x128xbf16>, vector<128x1536xbf16>, vector<8x1536xf32> -> vector<8x1536xf32>
    %c0_17 = arith.constant 0 : index
    %c0_18 = arith.constant 0 : index
    %c0_19 = arith.constant 0 : index
    %40 = vector.load %arg6[%c0_17, %c0_18, %c0_19] : memref<2x1x1536xf32, #tpu.memory_space<vmem>>, vector<1x1x1536xf32>
    %41 = vector.shape_cast %40 : vector<1x1x1536xf32> to vector<1x1536xf32>
    %42 = vector.broadcast %41 : vector<1x1536xf32> to vector<8x1536xf32>
    %43 = arith.addf %39, %42 : vector<8x1536xf32>
    %44 = arith.truncf %43 : vector<8x1536xf32> to vector<8x1536xbf16>
    %45 = vector.extract_strided_slice %44 {offsets = [0, 0], sizes = [8, 128], strides = [1, 1]} : vector<8x1536xbf16> to vector<8x128xbf16>
    %46 = vector.extract_strided_slice %44 {offsets = [0, 128], sizes = [8, 128], strides = [1, 1]} : vector<8x1536xbf16> to vector<8x128xbf16>
    %47 = vector.extract_strided_slice %44 {offsets = [0, 256], sizes = [8, 128], strides = [1, 1]} : vector<8x1536xbf16> to vector<8x128xbf16>
    %48 = vector.extract_strided_slice %44 {offsets = [0, 384], sizes = [8, 128], strides = [1, 1]} : vector<8x1536xbf16> to vector<8x128xbf16>
    %49 = vector.shape_cast %45 : vector<8x128xbf16> to vector<1x8x128xbf16>
    %50 = vector.shape_cast %46 : vector<8x128xbf16> to vector<1x8x128xbf16>
    %51 = vector.shape_cast %47 : vector<8x128xbf16> to vector<1x8x128xbf16>
    %52 = vector.shape_cast %48 : vector<8x128xbf16> to vector<1x8x128xbf16>
    %53 = tpu.concatenate %49, %50, %51, %52 in 0 : vector<1x8x128xbf16>, vector<1x8x128xbf16>, vector<1x8x128xbf16>, vector<1x8x128xbf16> -> vector<4x8x128xbf16>
    %54 = vector.extract_strided_slice %44 {offsets = [0, 512], sizes = [8, 128], strides = [1, 1]} : vector<8x1536xbf16> to vector<8x128xbf16>
    %55 = vector.extract_strided_slice %44 {offsets = [0, 640], sizes = [8, 128], strides = [1, 1]} : vector<8x1536xbf16> to vector<8x128xbf16>
    %56 = vector.extract_strided_slice %44 {offsets = [0, 768], sizes = [8, 128], strides = [1, 1]} : vector<8x1536xbf16> to vector<8x128xbf16>
    %57 = vector.extract_strided_slice %44 {offsets = [0, 896], sizes = [8, 128], strides = [1, 1]} : vector<8x1536xbf16> to vector<8x128xbf16>
    %58 = vector.shape_cast %54 : vector<8x128xbf16> to vector<1x8x128xbf16>
    %59 = vector.shape_cast %55 : vector<8x128xbf16> to vector<1x8x128xbf16>
    %60 = vector.shape_cast %56 : vector<8x128xbf16> to vector<1x8x128xbf16>
    %61 = vector.shape_cast %57 : vector<8x128xbf16> to vector<1x8x128xbf16>
    %62 = tpu.concatenate %58, %59, %60, %61 in 0 : vector<1x8x128xbf16>, vector<1x8x128xbf16>, vector<1x8x128xbf16>, vector<1x8x128xbf16> -> vector<4x8x128xbf16>
    %63 = vector.extract_strided_slice %44 {offsets = [0, 1024], sizes = [8, 128], strides = [1, 1]} : vector<8x1536xbf16> to vector<8x128xbf16>
    %64 = vector.extract_strided_slice %44 {offsets = [0, 1152], sizes = [8, 128], strides = [1, 1]} : vector<8x1536xbf16> to vector<8x128xbf16>
    %65 = vector.extract_strided_slice %44 {offsets = [0, 1280], sizes = [8, 128], strides = [1, 1]} : vector<8x1536xbf16> to vector<8x128xbf16>
    %66 = vector.extract_strided_slice %44 {offsets = [0, 1408], sizes = [8, 128], strides = [1, 1]} : vector<8x1536xbf16> to vector<8x128xbf16>
    %67 = vector.shape_cast %63 : vector<8x128xbf16> to vector<1x8x128xbf16>
    %68 = vector.shape_cast %64 : vector<8x128xbf16> to vector<1x8x128xbf16>
    %69 = vector.shape_cast %65 : vector<8x128xbf16> to vector<1x8x128xbf16>
    %70 = vector.shape_cast %66 : vector<8x128xbf16> to vector<1x8x128xbf16>
    %71 = tpu.concatenate %67, %68, %69, %70 in 0 : vector<1x8x128xbf16>, vector<1x8x128xbf16>, vector<1x8x128xbf16>, vector<1x8x128xbf16> -> vector<4x8x128xbf16>
    "tpu.trace_start"() <{level = 10 : i32, message = "hqd,hkd->hqk"}> : () -> ()
    %cst_20 = arith.constant dense<0.000000e+00> : vector<4x8x8xf32>
    %72 = tpu.matmul %53, %62, %cst_20 {dimension_numbers = #tpu.dot_dimension_numbers<[2], [2], [1], [1], [0, 0, 0, 1, 1, 1], [0], [0]>} : vector<4x8x128xbf16>, vector<4x8x128xbf16>, vector<4x8x8xf32> -> vector<4x8x8xf32>
    "tpu.trace_stop"() : () -> ()
    %cst_21 = arith.constant 0.353553385 : f32
    %73 = vector.broadcast %cst_21 : f32 to vector<4x8x8xf32>
    %74 = arith.mulf %72, %73 : vector<4x8x8xf32>
    %75 = vector.broadcast %9 : vector<1x1x8xf32> to vector<4x8x8xf32>
    %76 = arith.addf %74, %75 : vector<4x8x8xf32>
    %cst_22 = arith.constant dense<0xFF800000> : vector<4x8xf32>
    %77 = vector.multi_reduction <maximumf>, %76, %cst_22 [2] : vector<4x8x8xf32> to vector<4x8xf32>
    %78 = vector.shape_cast %77 : vector<4x8xf32> to vector<4x8x1xf32>
    %79 = vector.broadcast %78 : vector<4x8x1xf32> to vector<4x8x8xf32>
    %80 = arith.subf %76, %79 : vector<4x8x8xf32>
    %81 = math.exp %80 : vector<4x8x8xf32>
    %cst_23 = arith.constant dense<0.000000e+00> : vector<4x8xf32>
    %82 = vector.multi_reduction <add>, %81, %cst_23 [2] : vector<4x8x8xf32> to vector<4x8xf32>
    %83 = vector.shape_cast %82 : vector<4x8xf32> to vector<4x8x1xf32>
    %84 = tpu.reciprocal %83 {approx = true} : vector<4x8x1xf32> -> vector<4x8x1xf32>
    %85 = vector.broadcast %84 : vector<4x8x1xf32> to vector<4x8x8xf32>
    %86 = arith.mulf %81, %85 : vector<4x8x8xf32>
    %87 = arith.truncf %86 : vector<4x8x8xf32> to vector<4x8x8xbf16>
    "tpu.trace_start"() <{level = 10 : i32, message = "hqk,hkd->hqd"}> : () -> ()
    %cst_24 = arith.constant dense<0.000000e+00> : vector<4x8x128xf32>
    %88 = tpu.matmul %87, %71, %cst_24 {dimension_numbers = #tpu.dot_dimension_numbers<[2], [1], [1], [2], [0, 0, 0, 1, 1, 2], [0], [0]>} : vector<4x8x8xbf16>, vector<4x8x128xbf16>, vector<4x8x128xf32> -> vector<4x8x128xf32>
    "tpu.trace_stop"() : () -> ()
    %89 = vector.extract_strided_slice %88 {offsets = [0, 0, 0], sizes = [1, 8, 128], strides = [1, 1, 1]} : vector<4x8x128xf32> to vector<1x8x128xf32>
    %90 = vector.shape_cast %89 : vector<1x8x128xf32> to vector<8x128xf32>
    %91 = vector.extract_strided_slice %88 {offsets = [1, 0, 0], sizes = [1, 8, 128], strides = [1, 1, 1]} : vector<4x8x128xf32> to vector<1x8x128xf32>
    %92 = vector.shape_cast %91 : vector<1x8x128xf32> to vector<8x128xf32>
    %93 = vector.extract_strided_slice %88 {offsets = [2, 0, 0], sizes = [1, 8, 128], strides = [1, 1, 1]} : vector<4x8x128xf32> to vector<1x8x128xf32>
    %94 = vector.shape_cast %93 : vector<1x8x128xf32> to vector<8x128xf32>
    %95 = vector.extract_strided_slice %88 {offsets = [3, 0, 0], sizes = [1, 8, 128], strides = [1, 1, 1]} : vector<4x8x128xf32> to vector<1x8x128xf32>
    %96 = vector.shape_cast %95 : vector<1x8x128xf32> to vector<8x128xf32>
    %97 = tpu.concatenate %90, %92, %94, %96 in 1 : vector<8x128xf32>, vector<8x128xf32>, vector<8x128xf32>, vector<8x128xf32> -> vector<8x512xf32>
    %98 = arith.truncf %97 : vector<8x512xf32> to vector<8x512xbf16>
    %c0_25 = arith.constant 0 : index
    %c0_26 = arith.constant 0 : index
    %c0_27 = arith.constant 0 : index
    %99 = vector.load %arg7[%c0_25, %c0_26, %c0_27] : memref<2x512x128xbf16, #tpu.memory_space<vmem>>, vector<1x512x128xbf16>
    %100 = vector.shape_cast %99 : vector<1x512x128xbf16> to vector<512x128xbf16>
    %cst_28 = arith.constant dense<0.000000e+00> : vector<8x128xf32>
    %101 = tpu.matmul %98, %100, %cst_28 {dimension_numbers = #tpu.dot_dimension_numbers<[1], [0], [0], [1], [0, 0, 1, 1], [], []>} : vector<8x512xbf16>, vector<512x128xbf16>, vector<8x128xf32> -> vector<8x128xf32>
    %c0_29 = arith.constant 0 : index
    %c0_30 = arith.constant 0 : index
    %c0_31 = arith.constant 0 : index
    %102 = vector.load %arg8[%c0_29, %c0_30, %c0_31] : memref<2x1x128xf32, #tpu.memory_space<vmem>>, vector<1x1x128xf32>
    %103 = vector.shape_cast %102 : vector<1x1x128xf32> to vector<1x128xf32>
    %104 = vector.broadcast %103 : vector<1x128xf32> to vector<8x128xf32>
    %105 = arith.addf %101, %104 : vector<8x128xf32>
    %106 = arith.addf %105, %35 : vector<8x128xf32>
    %c0_32 = arith.constant 0 : index
    %c0_33 = arith.constant 0 : index
    %c0_34 = arith.constant 0 : index
    %107 = vector.load %arg9[%c0_32, %c0_33, %c0_34] : memref<2x1x128xf32, #tpu.memory_space<vmem>>, vector<1x1x128xf32>
    %108 = vector.shape_cast %107 : vector<1x1x128xf32> to vector<1x128xf32>
    %c0_35 = arith.constant 0 : index
    %c0_36 = arith.constant 0 : index
    %c0_37 = arith.constant 0 : index
    %109 = vector.load %arg10[%c0_35, %c0_36, %c0_37] : memref<2x1x128xf32, #tpu.memory_space<vmem>>, vector<1x1x128xf32>
    %110 = vector.shape_cast %109 : vector<1x1x128xf32> to vector<1x128xf32>
    %cst_38 = arith.constant dense<0.000000e+00> : vector<8xf32>
    %111 = vector.multi_reduction <add>, %106, %cst_38 [1] : vector<8x128xf32> to vector<8xf32>
    %112 = vector.shape_cast %111 : vector<8xf32> to vector<8x1xf32>
    %cst_39 = arith.constant 3.125000e-02 : f32
    %113 = vector.broadcast %cst_39 : f32 to vector<8x1xf32>
    %114 = arith.mulf %112, %113 : vector<8x1xf32>
    %115 = vector.broadcast %114 : vector<8x1xf32> to vector<8x128xf32>
    %116 = arith.subf %106, %115 : vector<8x128xf32>
    %117 = vector.broadcast %6 : vector<1x128xf32> to vector<8x128xf32>
    %118 = arith.mulf %116, %117 : vector<8x128xf32>
    %119 = arith.mulf %118, %118 : vector<8x128xf32>
    %cst_40 = arith.constant dense<0.000000e+00> : vector<8xf32>
    %120 = vector.multi_reduction <add>, %119, %cst_40 [1] : vector<8x128xf32> to vector<8xf32>
    %121 = vector.shape_cast %120 : vector<8xf32> to vector<8x1xf32>
    %cst_41 = arith.constant 3.125000e-02 : f32
    %122 = vector.broadcast %cst_41 : f32 to vector<8x1xf32>
    %123 = arith.mulf %121, %122 : vector<8x1xf32>
    %124 = vector.broadcast %114 : vector<8x1xf32> to vector<8x128xf32>
    %125 = arith.subf %106, %124 : vector<8x128xf32>
    %cst_42 = arith.constant 9.99999996E-13 : f32
    %126 = vector.broadcast %cst_42 : f32 to vector<8x1xf32>
    %127 = arith.addf %123, %126 : vector<8x1xf32>
    %128 = math.rsqrt %127 : vector<8x1xf32>
    %129 = vector.broadcast %128 : vector<8x1xf32> to vector<8x128xf32>
    %130 = arith.mulf %125, %129 : vector<8x128xf32>
    %131 = vector.broadcast %108 : vector<1x128xf32> to vector<8x128xf32>
    %132 = arith.mulf %130, %131 : vector<8x128xf32>
    %133 = vector.broadcast %110 : vector<1x128xf32> to vector<8x128xf32>
    %134 = arith.addf %132, %133 : vector<8x128xf32>
    %135 = arith.truncf %134 : vector<8x128xf32> to vector<8x128xbf16>
    %c0_43 = arith.constant 0 : index
    %c0_44 = arith.constant 0 : index
    %c0_45 = arith.constant 0 : index
    %136 = vector.load %arg11[%c0_43, %c0_44, %c0_45] : memref<2x128x128xbf16, #tpu.memory_space<vmem>>, vector<1x128x128xbf16>
    %137 = vector.shape_cast %136 : vector<1x128x128xbf16> to vector<128x128xbf16>
    %cst_46 = arith.constant dense<0.000000e+00> : vector<8x128xf32>
    %138 = tpu.matmul %135, %137, %cst_46 {dimension_numbers = #tpu.dot_dimension_numbers<[1], [0], [0], [1], [0, 0, 1, 1], [], []>} : vector<8x128xbf16>, vector<128x128xbf16>, vector<8x128xf32> -> vector<8x128xf32>
    %c0_47 = arith.constant 0 : index
    %c0_48 = arith.constant 0 : index
    %c0_49 = arith.constant 0 : index
    %139 = vector.load %arg12[%c0_47, %c0_48, %c0_49] : memref<2x1x128xf32, #tpu.memory_space<vmem>>, vector<1x1x128xf32>
    %140 = vector.shape_cast %139 : vector<1x1x128xf32> to vector<1x128xf32>
    %141 = vector.broadcast %140 : vector<1x128xf32> to vector<8x128xf32>
    %142 = arith.addf %138, %141 : vector<8x128xf32>
    %cst_50 = arith.constant 5.000000e-01 : f32
    %143 = vector.broadcast %cst_50 : f32 to vector<8x128xf32>
    %144 = arith.mulf %143, %142 : vector<8x128xf32>
    %cst_51 = arith.constant 0.707106769 : f32
    %145 = vector.broadcast %cst_51 : f32 to vector<8x128xf32>
    %146 = arith.mulf %142, %145 : vector<8x128xf32>
    %147 = math.absf %146 : vector<8x128xf32>
    %cst_52 = arith.constant 0.327591091 : f32
    %148 = vector.broadcast %cst_52 : f32 to vector<8x128xf32>
    %149 = arith.mulf %148, %147 : vector<8x128xf32>
    %cst_53 = arith.constant 1.000000e+00 : f32
    %150 = vector.broadcast %cst_53 : f32 to vector<8x128xf32>
    %151 = arith.addf %150, %149 : vector<8x128xf32>
    %152 = tpu.reciprocal %151 : vector<8x128xf32> -> vector<8x128xf32>
    %cst_54 = arith.constant 1.06140542 : f32
    %153 = vector.broadcast %cst_54 : f32 to vector<8x128xf32>
    %154 = arith.mulf %153, %152 : vector<8x128xf32>
    %cst_55 = arith.constant -1.45315206 : f32
    %155 = vector.broadcast %cst_55 : f32 to vector<8x128xf32>
    %156 = arith.addf %154, %155 : vector<8x128xf32>
    %157 = arith.mulf %156, %152 : vector<8x128xf32>
    %cst_56 = arith.constant 1.42141378 : f32
    %158 = vector.broadcast %cst_56 : f32 to vector<8x128xf32>
    %159 = arith.addf %157, %158 : vector<8x128xf32>
    %160 = arith.mulf %159, %152 : vector<8x128xf32>
    %cst_57 = arith.constant -0.284496725 : f32
    %161 = vector.broadcast %cst_57 : f32 to vector<8x128xf32>
    %162 = arith.addf %160, %161 : vector<8x128xf32>
    %163 = arith.mulf %162, %152 : vector<8x128xf32>
    %cst_58 = arith.constant 0.254829586 : f32
    %164 = vector.broadcast %cst_58 : f32 to vector<8x128xf32>
    %165 = arith.addf %163, %164 : vector<8x128xf32>
    %166 = arith.mulf %165, %152 : vector<8x128xf32>
    %cst_59 = arith.constant 0.000000e+00 : f32
    %167 = vector.broadcast %cst_59 : f32 to vector<8x128xf32>
    %168 = arith.subf %167, %147 : vector<8x128xf32>
    %169 = arith.mulf %168, %147 : vector<8x128xf32>
    %170 = math.exp %169 : vector<8x128xf32>
    %171 = arith.mulf %166, %170 : vector<8x128xf32>
    %cst_60 = arith.constant 1.000000e+00 : f32
    %172 = vector.broadcast %cst_60 : f32 to vector<8x128xf32>
    %173 = arith.subf %172, %171 : vector<8x128xf32>
    %cst_61 = arith.constant 0.000000e+00 : f32
    %174 = vector.broadcast %cst_61 : f32 to vector<8x128xf32>
    %175 = arith.cmpf oge, %146, %174 : vector<8x128xf32>
    %cst_62 = arith.constant 0.000000e+00 : f32
    %176 = vector.broadcast %cst_62 : f32 to vector<8x128xf32>
    %177 = arith.subf %176, %173 : vector<8x128xf32>
    %178 = arith.select %175, %173, %177 : vector<8x128xi1>, vector<8x128xf32>
    %cst_63 = arith.constant 1.000000e+00 : f32
    %179 = vector.broadcast %cst_63 : f32 to vector<8x128xf32>
    %180 = arith.addf %179, %178 : vector<8x128xf32>
    %181 = arith.mulf %144, %180 : vector<8x128xf32>
    %182 = arith.truncf %181 : vector<8x128xf32> to vector<8x128xbf16>
    %c0_64 = arith.constant 0 : index
    %c0_65 = arith.constant 0 : index
    %c0_66 = arith.constant 0 : index
    %183 = vector.load %arg13[%c0_64, %c0_65, %c0_66] : memref<2x128x128xbf16, #tpu.memory_space<vmem>>, vector<1x128x128xbf16>
    %184 = vector.shape_cast %183 : vector<1x128x128xbf16> to vector<128x128xbf16>
    %cst_67 = arith.constant dense<0.000000e+00> : vector<8x128xf32>
    %185 = tpu.matmul %182, %184, %cst_67 {dimension_numbers = #tpu.dot_dimension_numbers<[1], [0], [0], [1], [0, 0, 1, 1], [], []>} : vector<8x128xbf16>, vector<128x128xbf16>, vector<8x128xf32> -> vector<8x128xf32>
    %c0_68 = arith.constant 0 : index
    %c0_69 = arith.constant 0 : index
    %c0_70 = arith.constant 0 : index
    %186 = vector.load %arg14[%c0_68, %c0_69, %c0_70] : memref<2x1x128xf32, #tpu.memory_space<vmem>>, vector<1x1x128xf32>
    %187 = vector.shape_cast %186 : vector<1x1x128xf32> to vector<1x128xf32>
    %188 = vector.broadcast %187 : vector<1x128xf32> to vector<8x128xf32>
    %189 = arith.addf %185, %188 : vector<8x128xf32>
    %190 = arith.addf %189, %134 : vector<8x128xf32>
    %c0_71 = arith.constant 0 : index
    %c0_72 = arith.constant 0 : index
    %c0_73 = arith.constant 0 : index
    %191 = vector.load %arg15[%c0_71, %c0_72, %c0_73] : memref<2x1x128xf32, #tpu.memory_space<vmem>>, vector<1x1x128xf32>
    %192 = vector.shape_cast %191 : vector<1x1x128xf32> to vector<1x128xf32>
    %c0_74 = arith.constant 0 : index
    %c0_75 = arith.constant 0 : index
    %c0_76 = arith.constant 0 : index
    %193 = vector.load %arg16[%c0_74, %c0_75, %c0_76] : memref<2x1x128xf32, #tpu.memory_space<vmem>>, vector<1x1x128xf32>
    %194 = vector.shape_cast %193 : vector<1x1x128xf32> to vector<1x128xf32>
    %cst_77 = arith.constant dense<0.000000e+00> : vector<8xf32>
    %195 = vector.multi_reduction <add>, %190, %cst_77 [1] : vector<8x128xf32> to vector<8xf32>
    %196 = vector.shape_cast %195 : vector<8xf32> to vector<8x1xf32>
    %cst_78 = arith.constant 3.125000e-02 : f32
    %197 = vector.broadcast %cst_78 : f32 to vector<8x1xf32>
    %198 = arith.mulf %196, %197 : vector<8x1xf32>
    %199 = vector.broadcast %198 : vector<8x1xf32> to vector<8x128xf32>
    %200 = arith.subf %190, %199 : vector<8x128xf32>
    %201 = vector.broadcast %6 : vector<1x128xf32> to vector<8x128xf32>
    %202 = arith.mulf %200, %201 : vector<8x128xf32>
    %203 = arith.mulf %202, %202 : vector<8x128xf32>
    %cst_79 = arith.constant dense<0.000000e+00> : vector<8xf32>
    %204 = vector.multi_reduction <add>, %203, %cst_79 [1] : vector<8x128xf32> to vector<8xf32>
    %205 = vector.shape_cast %204 : vector<8xf32> to vector<8x1xf32>
    %cst_80 = arith.constant 3.125000e-02 : f32
    %206 = vector.broadcast %cst_80 : f32 to vector<8x1xf32>
    %207 = arith.mulf %205, %206 : vector<8x1xf32>
    %208 = vector.broadcast %198 : vector<8x1xf32> to vector<8x128xf32>
    %209 = arith.subf %190, %208 : vector<8x128xf32>
    %cst_81 = arith.constant 9.99999996E-13 : f32
    %210 = vector.broadcast %cst_81 : f32 to vector<8x1xf32>
    %211 = arith.addf %207, %210 : vector<8x1xf32>
    %212 = math.rsqrt %211 : vector<8x1xf32>
    %213 = vector.broadcast %212 : vector<8x1xf32> to vector<8x128xf32>
    %214 = arith.mulf %209, %213 : vector<8x128xf32>
    %215 = vector.broadcast %192 : vector<1x128xf32> to vector<8x128xf32>
    %216 = arith.mulf %214, %215 : vector<8x128xf32>
    %217 = vector.broadcast %194 : vector<1x128xf32> to vector<8x128xf32>
    %218 = arith.addf %216, %217 : vector<8x128xf32>
    %219 = arith.truncf %218 : vector<8x128xf32> to vector<8x128xbf16>
    %c1 = arith.constant 1 : index
    %c0_82 = arith.constant 0 : index
    %c0_83 = arith.constant 0 : index
    %220 = vector.load %arg5[%c1, %c0_82, %c0_83] : memref<2x128x1536xbf16, #tpu.memory_space<vmem>>, vector<1x128x1536xbf16>
    %221 = vector.shape_cast %220 : vector<1x128x1536xbf16> to vector<128x1536xbf16>
    %cst_84 = arith.constant dense<0.000000e+00> : vector<8x1536xf32>
    %222 = tpu.matmul %219, %221, %cst_84 {dimension_numbers = #tpu.dot_dimension_numbers<[1], [0], [0], [1], [0, 0, 1, 1], [], []>} : vector<8x128xbf16>, vector<128x1536xbf16>, vector<8x1536xf32> -> vector<8x1536xf32>
    %c1_85 = arith.constant 1 : index
    %c0_86 = arith.constant 0 : index
    %c0_87 = arith.constant 0 : index
    %223 = vector.load %arg6[%c1_85, %c0_86, %c0_87] : memref<2x1x1536xf32, #tpu.memory_space<vmem>>, vector<1x1x1536xf32>
    %224 = vector.shape_cast %223 : vector<1x1x1536xf32> to vector<1x1536xf32>
    %225 = vector.broadcast %224 : vector<1x1536xf32> to vector<8x1536xf32>
    %226 = arith.addf %222, %225 : vector<8x1536xf32>
    %227 = arith.truncf %226 : vector<8x1536xf32> to vector<8x1536xbf16>
    %228 = vector.extract_strided_slice %227 {offsets = [0, 0], sizes = [8, 128], strides = [1, 1]} : vector<8x1536xbf16> to vector<8x128xbf16>
    %229 = vector.extract_strided_slice %227 {offsets = [0, 128], sizes = [8, 128], strides = [1, 1]} : vector<8x1536xbf16> to vector<8x128xbf16>
    %230 = vector.extract_strided_slice %227 {offsets = [0, 256], sizes = [8, 128], strides = [1, 1]} : vector<8x1536xbf16> to vector<8x128xbf16>
    %231 = vector.extract_strided_slice %227 {offsets = [0, 384], sizes = [8, 128], strides = [1, 1]} : vector<8x1536xbf16> to vector<8x128xbf16>
    %232 = vector.shape_cast %228 : vector<8x128xbf16> to vector<1x8x128xbf16>
    %233 = vector.shape_cast %229 : vector<8x128xbf16> to vector<1x8x128xbf16>
    %234 = vector.shape_cast %230 : vector<8x128xbf16> to vector<1x8x128xbf16>
    %235 = vector.shape_cast %231 : vector<8x128xbf16> to vector<1x8x128xbf16>
    %236 = tpu.concatenate %232, %233, %234, %235 in 0 : vector<1x8x128xbf16>, vector<1x8x128xbf16>, vector<1x8x128xbf16>, vector<1x8x128xbf16> -> vector<4x8x128xbf16>
    %237 = vector.extract_strided_slice %227 {offsets = [0, 512], sizes = [8, 128], strides = [1, 1]} : vector<8x1536xbf16> to vector<8x128xbf16>
    %238 = vector.extract_strided_slice %227 {offsets = [0, 640], sizes = [8, 128], strides = [1, 1]} : vector<8x1536xbf16> to vector<8x128xbf16>
    %239 = vector.extract_strided_slice %227 {offsets = [0, 768], sizes = [8, 128], strides = [1, 1]} : vector<8x1536xbf16> to vector<8x128xbf16>
    %240 = vector.extract_strided_slice %227 {offsets = [0, 896], sizes = [8, 128], strides = [1, 1]} : vector<8x1536xbf16> to vector<8x128xbf16>
    %241 = vector.shape_cast %237 : vector<8x128xbf16> to vector<1x8x128xbf16>
    %242 = vector.shape_cast %238 : vector<8x128xbf16> to vector<1x8x128xbf16>
    %243 = vector.shape_cast %239 : vector<8x128xbf16> to vector<1x8x128xbf16>
    %244 = vector.shape_cast %240 : vector<8x128xbf16> to vector<1x8x128xbf16>
    %245 = tpu.concatenate %241, %242, %243, %244 in 0 : vector<1x8x128xbf16>, vector<1x8x128xbf16>, vector<1x8x128xbf16>, vector<1x8x128xbf16> -> vector<4x8x128xbf16>
    %246 = vector.extract_strided_slice %227 {offsets = [0, 1024], sizes = [8, 128], strides = [1, 1]} : vector<8x1536xbf16> to vector<8x128xbf16>
    %247 = vector.extract_strided_slice %227 {offsets = [0, 1152], sizes = [8, 128], strides = [1, 1]} : vector<8x1536xbf16> to vector<8x128xbf16>
    %248 = vector.extract_strided_slice %227 {offsets = [0, 1280], sizes = [8, 128], strides = [1, 1]} : vector<8x1536xbf16> to vector<8x128xbf16>
    %249 = vector.extract_strided_slice %227 {offsets = [0, 1408], sizes = [8, 128], strides = [1, 1]} : vector<8x1536xbf16> to vector<8x128xbf16>
    %250 = vector.shape_cast %246 : vector<8x128xbf16> to vector<1x8x128xbf16>
    %251 = vector.shape_cast %247 : vector<8x128xbf16> to vector<1x8x128xbf16>
    %252 = vector.shape_cast %248 : vector<8x128xbf16> to vector<1x8x128xbf16>
    %253 = vector.shape_cast %249 : vector<8x128xbf16> to vector<1x8x128xbf16>
    %254 = tpu.concatenate %250, %251, %252, %253 in 0 : vector<1x8x128xbf16>, vector<1x8x128xbf16>, vector<1x8x128xbf16>, vector<1x8x128xbf16> -> vector<4x8x128xbf16>
    "tpu.trace_start"() <{level = 10 : i32, message = "hqd,hkd->hqk"}> : () -> ()
    %cst_88 = arith.constant dense<0.000000e+00> : vector<4x8x8xf32>
    %255 = tpu.matmul %236, %245, %cst_88 {dimension_numbers = #tpu.dot_dimension_numbers<[2], [2], [1], [1], [0, 0, 0, 1, 1, 1], [0], [0]>} : vector<4x8x128xbf16>, vector<4x8x128xbf16>, vector<4x8x8xf32> -> vector<4x8x8xf32>
    "tpu.trace_stop"() : () -> ()
    %cst_89 = arith.constant 0.353553385 : f32
    %256 = vector.broadcast %cst_89 : f32 to vector<4x8x8xf32>
    %257 = arith.mulf %255, %256 : vector<4x8x8xf32>
    %258 = vector.broadcast %9 : vector<1x1x8xf32> to vector<4x8x8xf32>
    %259 = arith.addf %257, %258 : vector<4x8x8xf32>
    %cst_90 = arith.constant dense<0xFF800000> : vector<4x8xf32>
    %260 = vector.multi_reduction <maximumf>, %259, %cst_90 [2] : vector<4x8x8xf32> to vector<4x8xf32>
    %261 = vector.shape_cast %260 : vector<4x8xf32> to vector<4x8x1xf32>
    %262 = vector.broadcast %261 : vector<4x8x1xf32> to vector<4x8x8xf32>
    %263 = arith.subf %259, %262 : vector<4x8x8xf32>
    %264 = math.exp %263 : vector<4x8x8xf32>
    %cst_91 = arith.constant dense<0.000000e+00> : vector<4x8xf32>
    %265 = vector.multi_reduction <add>, %264, %cst_91 [2] : vector<4x8x8xf32> to vector<4x8xf32>
    %266 = vector.shape_cast %265 : vector<4x8xf32> to vector<4x8x1xf32>
    %267 = tpu.reciprocal %266 {approx = true} : vector<4x8x1xf32> -> vector<4x8x1xf32>
    %268 = vector.broadcast %267 : vector<4x8x1xf32> to vector<4x8x8xf32>
    %269 = arith.mulf %264, %268 : vector<4x8x8xf32>
    %270 = arith.truncf %269 : vector<4x8x8xf32> to vector<4x8x8xbf16>
    "tpu.trace_start"() <{level = 10 : i32, message = "hqk,hkd->hqd"}> : () -> ()
    %cst_92 = arith.constant dense<0.000000e+00> : vector<4x8x128xf32>
    %271 = tpu.matmul %270, %254, %cst_92 {dimension_numbers = #tpu.dot_dimension_numbers<[2], [1], [1], [2], [0, 0, 0, 1, 1, 2], [0], [0]>} : vector<4x8x8xbf16>, vector<4x8x128xbf16>, vector<4x8x128xf32> -> vector<4x8x128xf32>
    "tpu.trace_stop"() : () -> ()
    %272 = vector.extract_strided_slice %271 {offsets = [0, 0, 0], sizes = [1, 8, 128], strides = [1, 1, 1]} : vector<4x8x128xf32> to vector<1x8x128xf32>
    %273 = vector.shape_cast %272 : vector<1x8x128xf32> to vector<8x128xf32>
    %274 = vector.extract_strided_slice %271 {offsets = [1, 0, 0], sizes = [1, 8, 128], strides = [1, 1, 1]} : vector<4x8x128xf32> to vector<1x8x128xf32>
    %275 = vector.shape_cast %274 : vector<1x8x128xf32> to vector<8x128xf32>
    %276 = vector.extract_strided_slice %271 {offsets = [2, 0, 0], sizes = [1, 8, 128], strides = [1, 1, 1]} : vector<4x8x128xf32> to vector<1x8x128xf32>
    %277 = vector.shape_cast %276 : vector<1x8x128xf32> to vector<8x128xf32>
    %278 = vector.extract_strided_slice %271 {offsets = [3, 0, 0], sizes = [1, 8, 128], strides = [1, 1, 1]} : vector<4x8x128xf32> to vector<1x8x128xf32>
    %279 = vector.shape_cast %278 : vector<1x8x128xf32> to vector<8x128xf32>
    %280 = tpu.concatenate %273, %275, %277, %279 in 1 : vector<8x128xf32>, vector<8x128xf32>, vector<8x128xf32>, vector<8x128xf32> -> vector<8x512xf32>
    %281 = arith.truncf %280 : vector<8x512xf32> to vector<8x512xbf16>
    %c1_93 = arith.constant 1 : index
    %c0_94 = arith.constant 0 : index
    %c0_95 = arith.constant 0 : index
    %282 = vector.load %arg7[%c1_93, %c0_94, %c0_95] : memref<2x512x128xbf16, #tpu.memory_space<vmem>>, vector<1x512x128xbf16>
    %283 = vector.shape_cast %282 : vector<1x512x128xbf16> to vector<512x128xbf16>
    %cst_96 = arith.constant dense<0.000000e+00> : vector<8x128xf32>
    %284 = tpu.matmul %281, %283, %cst_96 {dimension_numbers = #tpu.dot_dimension_numbers<[1], [0], [0], [1], [0, 0, 1, 1], [], []>} : vector<8x512xbf16>, vector<512x128xbf16>, vector<8x128xf32> -> vector<8x128xf32>
    %c1_97 = arith.constant 1 : index
    %c0_98 = arith.constant 0 : index
    %c0_99 = arith.constant 0 : index
    %285 = vector.load %arg8[%c1_97, %c0_98, %c0_99] : memref<2x1x128xf32, #tpu.memory_space<vmem>>, vector<1x1x128xf32>
    %286 = vector.shape_cast %285 : vector<1x1x128xf32> to vector<1x128xf32>
    %287 = vector.broadcast %286 : vector<1x128xf32> to vector<8x128xf32>
    %288 = arith.addf %284, %287 : vector<8x128xf32>
    %289 = arith.addf %288, %218 : vector<8x128xf32>
    %c1_100 = arith.constant 1 : index
    %c0_101 = arith.constant 0 : index
    %c0_102 = arith.constant 0 : index
    %290 = vector.load %arg9[%c1_100, %c0_101, %c0_102] : memref<2x1x128xf32, #tpu.memory_space<vmem>>, vector<1x1x128xf32>
    %291 = vector.shape_cast %290 : vector<1x1x128xf32> to vector<1x128xf32>
    %c1_103 = arith.constant 1 : index
    %c0_104 = arith.constant 0 : index
    %c0_105 = arith.constant 0 : index
    %292 = vector.load %arg10[%c1_103, %c0_104, %c0_105] : memref<2x1x128xf32, #tpu.memory_space<vmem>>, vector<1x1x128xf32>
    %293 = vector.shape_cast %292 : vector<1x1x128xf32> to vector<1x128xf32>
    %cst_106 = arith.constant dense<0.000000e+00> : vector<8xf32>
    %294 = vector.multi_reduction <add>, %289, %cst_106 [1] : vector<8x128xf32> to vector<8xf32>
    %295 = vector.shape_cast %294 : vector<8xf32> to vector<8x1xf32>
    %cst_107 = arith.constant 3.125000e-02 : f32
    %296 = vector.broadcast %cst_107 : f32 to vector<8x1xf32>
    %297 = arith.mulf %295, %296 : vector<8x1xf32>
    %298 = vector.broadcast %297 : vector<8x1xf32> to vector<8x128xf32>
    %299 = arith.subf %289, %298 : vector<8x128xf32>
    %300 = vector.broadcast %6 : vector<1x128xf32> to vector<8x128xf32>
    %301 = arith.mulf %299, %300 : vector<8x128xf32>
    %302 = arith.mulf %301, %301 : vector<8x128xf32>
    %cst_108 = arith.constant dense<0.000000e+00> : vector<8xf32>
    %303 = vector.multi_reduction <add>, %302, %cst_108 [1] : vector<8x128xf32> to vector<8xf32>
    %304 = vector.shape_cast %303 : vector<8xf32> to vector<8x1xf32>
    %cst_109 = arith.constant 3.125000e-02 : f32
    %305 = vector.broadcast %cst_109 : f32 to vector<8x1xf32>
    %306 = arith.mulf %304, %305 : vector<8x1xf32>
    %307 = vector.broadcast %297 : vector<8x1xf32> to vector<8x128xf32>
    %308 = arith.subf %289, %307 : vector<8x128xf32>
    %cst_110 = arith.constant 9.99999996E-13 : f32
    %309 = vector.broadcast %cst_110 : f32 to vector<8x1xf32>
    %310 = arith.addf %306, %309 : vector<8x1xf32>
    %311 = math.rsqrt %310 : vector<8x1xf32>
    %312 = vector.broadcast %311 : vector<8x1xf32> to vector<8x128xf32>
    %313 = arith.mulf %308, %312 : vector<8x128xf32>
    %314 = vector.broadcast %291 : vector<1x128xf32> to vector<8x128xf32>
    %315 = arith.mulf %313, %314 : vector<8x128xf32>
    %316 = vector.broadcast %293 : vector<1x128xf32> to vector<8x128xf32>
    %317 = arith.addf %315, %316 : vector<8x128xf32>
    %318 = arith.truncf %317 : vector<8x128xf32> to vector<8x128xbf16>
    %c1_111 = arith.constant 1 : index
    %c0_112 = arith.constant 0 : index
    %c0_113 = arith.constant 0 : index
    %319 = vector.load %arg11[%c1_111, %c0_112, %c0_113] : memref<2x128x128xbf16, #tpu.memory_space<vmem>>, vector<1x128x128xbf16>
    %320 = vector.shape_cast %319 : vector<1x128x128xbf16> to vector<128x128xbf16>
    %cst_114 = arith.constant dense<0.000000e+00> : vector<8x128xf32>
    %321 = tpu.matmul %318, %320, %cst_114 {dimension_numbers = #tpu.dot_dimension_numbers<[1], [0], [0], [1], [0, 0, 1, 1], [], []>} : vector<8x128xbf16>, vector<128x128xbf16>, vector<8x128xf32> -> vector<8x128xf32>
    %c1_115 = arith.constant 1 : index
    %c0_116 = arith.constant 0 : index
    %c0_117 = arith.constant 0 : index
    %322 = vector.load %arg12[%c1_115, %c0_116, %c0_117] : memref<2x1x128xf32, #tpu.memory_space<vmem>>, vector<1x1x128xf32>
    %323 = vector.shape_cast %322 : vector<1x1x128xf32> to vector<1x128xf32>
    %324 = vector.broadcast %323 : vector<1x128xf32> to vector<8x128xf32>
    %325 = arith.addf %321, %324 : vector<8x128xf32>
    %cst_118 = arith.constant 5.000000e-01 : f32
    %326 = vector.broadcast %cst_118 : f32 to vector<8x128xf32>
    %327 = arith.mulf %326, %325 : vector<8x128xf32>
    %cst_119 = arith.constant 0.707106769 : f32
    %328 = vector.broadcast %cst_119 : f32 to vector<8x128xf32>
    %329 = arith.mulf %325, %328 : vector<8x128xf32>
    %330 = math.absf %329 : vector<8x128xf32>
    %cst_120 = arith.constant 0.327591091 : f32
    %331 = vector.broadcast %cst_120 : f32 to vector<8x128xf32>
    %332 = arith.mulf %331, %330 : vector<8x128xf32>
    %cst_121 = arith.constant 1.000000e+00 : f32
    %333 = vector.broadcast %cst_121 : f32 to vector<8x128xf32>
    %334 = arith.addf %333, %332 : vector<8x128xf32>
    %335 = tpu.reciprocal %334 : vector<8x128xf32> -> vector<8x128xf32>
    %cst_122 = arith.constant 1.06140542 : f32
    %336 = vector.broadcast %cst_122 : f32 to vector<8x128xf32>
    %337 = arith.mulf %336, %335 : vector<8x128xf32>
    %cst_123 = arith.constant -1.45315206 : f32
    %338 = vector.broadcast %cst_123 : f32 to vector<8x128xf32>
    %339 = arith.addf %337, %338 : vector<8x128xf32>
    %340 = arith.mulf %339, %335 : vector<8x128xf32>
    %cst_124 = arith.constant 1.42141378 : f32
    %341 = vector.broadcast %cst_124 : f32 to vector<8x128xf32>
    %342 = arith.addf %340, %341 : vector<8x128xf32>
    %343 = arith.mulf %342, %335 : vector<8x128xf32>
    %cst_125 = arith.constant -0.284496725 : f32
    %344 = vector.broadcast %cst_125 : f32 to vector<8x128xf32>
    %345 = arith.addf %343, %344 : vector<8x128xf32>
    %346 = arith.mulf %345, %335 : vector<8x128xf32>
    %cst_126 = arith.constant 0.254829586 : f32
    %347 = vector.broadcast %cst_126 : f32 to vector<8x128xf32>
    %348 = arith.addf %346, %347 : vector<8x128xf32>
    %349 = arith.mulf %348, %335 : vector<8x128xf32>
    %cst_127 = arith.constant 0.000000e+00 : f32
    %350 = vector.broadcast %cst_127 : f32 to vector<8x128xf32>
    %351 = arith.subf %350, %330 : vector<8x128xf32>
    %352 = arith.mulf %351, %330 : vector<8x128xf32>
    %353 = math.exp %352 : vector<8x128xf32>
    %354 = arith.mulf %349, %353 : vector<8x128xf32>
    %cst_128 = arith.constant 1.000000e+00 : f32
    %355 = vector.broadcast %cst_128 : f32 to vector<8x128xf32>
    %356 = arith.subf %355, %354 : vector<8x128xf32>
    %cst_129 = arith.constant 0.000000e+00 : f32
    %357 = vector.broadcast %cst_129 : f32 to vector<8x128xf32>
    %358 = arith.cmpf oge, %329, %357 : vector<8x128xf32>
    %cst_130 = arith.constant 0.000000e+00 : f32
    %359 = vector.broadcast %cst_130 : f32 to vector<8x128xf32>
    %360 = arith.subf %359, %356 : vector<8x128xf32>
    %361 = arith.select %358, %356, %360 : vector<8x128xi1>, vector<8x128xf32>
    %cst_131 = arith.constant 1.000000e+00 : f32
    %362 = vector.broadcast %cst_131 : f32 to vector<8x128xf32>
    %363 = arith.addf %362, %361 : vector<8x128xf32>
    %364 = arith.mulf %327, %363 : vector<8x128xf32>
    %365 = arith.truncf %364 : vector<8x128xf32> to vector<8x128xbf16>
    %c1_132 = arith.constant 1 : index
    %c0_133 = arith.constant 0 : index
    %c0_134 = arith.constant 0 : index
    %366 = vector.load %arg13[%c1_132, %c0_133, %c0_134] : memref<2x128x128xbf16, #tpu.memory_space<vmem>>, vector<1x128x128xbf16>
    %367 = vector.shape_cast %366 : vector<1x128x128xbf16> to vector<128x128xbf16>
    %cst_135 = arith.constant dense<0.000000e+00> : vector<8x128xf32>
    %368 = tpu.matmul %365, %367, %cst_135 {dimension_numbers = #tpu.dot_dimension_numbers<[1], [0], [0], [1], [0, 0, 1, 1], [], []>} : vector<8x128xbf16>, vector<128x128xbf16>, vector<8x128xf32> -> vector<8x128xf32>
    %c1_136 = arith.constant 1 : index
    %c0_137 = arith.constant 0 : index
    %c0_138 = arith.constant 0 : index
    %369 = vector.load %arg14[%c1_136, %c0_137, %c0_138] : memref<2x1x128xf32, #tpu.memory_space<vmem>>, vector<1x1x128xf32>
    %370 = vector.shape_cast %369 : vector<1x1x128xf32> to vector<1x128xf32>
    %371 = vector.broadcast %370 : vector<1x128xf32> to vector<8x128xf32>
    %372 = arith.addf %368, %371 : vector<8x128xf32>
    %373 = arith.addf %372, %317 : vector<8x128xf32>
    %c1_139 = arith.constant 1 : index
    %c0_140 = arith.constant 0 : index
    %c0_141 = arith.constant 0 : index
    %374 = vector.load %arg15[%c1_139, %c0_140, %c0_141] : memref<2x1x128xf32, #tpu.memory_space<vmem>>, vector<1x1x128xf32>
    %375 = vector.shape_cast %374 : vector<1x1x128xf32> to vector<1x128xf32>
    %c1_142 = arith.constant 1 : index
    %c0_143 = arith.constant 0 : index
    %c0_144 = arith.constant 0 : index
    %376 = vector.load %arg16[%c1_142, %c0_143, %c0_144] : memref<2x1x128xf32, #tpu.memory_space<vmem>>, vector<1x1x128xf32>
    %377 = vector.shape_cast %376 : vector<1x1x128xf32> to vector<1x128xf32>
    %cst_145 = arith.constant dense<0.000000e+00> : vector<8xf32>
    %378 = vector.multi_reduction <add>, %373, %cst_145 [1] : vector<8x128xf32> to vector<8xf32>
    %379 = vector.shape_cast %378 : vector<8xf32> to vector<8x1xf32>
    %cst_146 = arith.constant 3.125000e-02 : f32
    %380 = vector.broadcast %cst_146 : f32 to vector<8x1xf32>
    %381 = arith.mulf %379, %380 : vector<8x1xf32>
    %382 = vector.broadcast %381 : vector<8x1xf32> to vector<8x128xf32>
    %383 = arith.subf %373, %382 : vector<8x128xf32>
    %384 = vector.broadcast %6 : vector<1x128xf32> to vector<8x128xf32>
    %385 = arith.mulf %383, %384 : vector<8x128xf32>
    %386 = arith.mulf %385, %385 : vector<8x128xf32>
    %cst_147 = arith.constant dense<0.000000e+00> : vector<8xf32>
    %387 = vector.multi_reduction <add>, %386, %cst_147 [1] : vector<8x128xf32> to vector<8xf32>
    %388 = vector.shape_cast %387 : vector<8xf32> to vector<8x1xf32>
    %cst_148 = arith.constant 3.125000e-02 : f32
    %389 = vector.broadcast %cst_148 : f32 to vector<8x1xf32>
    %390 = arith.mulf %388, %389 : vector<8x1xf32>
    %391 = vector.broadcast %381 : vector<8x1xf32> to vector<8x128xf32>
    %392 = arith.subf %373, %391 : vector<8x128xf32>
    %cst_149 = arith.constant 9.99999996E-13 : f32
    %393 = vector.broadcast %cst_149 : f32 to vector<8x1xf32>
    %394 = arith.addf %390, %393 : vector<8x1xf32>
    %395 = math.rsqrt %394 : vector<8x1xf32>
    %396 = vector.broadcast %395 : vector<8x1xf32> to vector<8x128xf32>
    %397 = arith.mulf %392, %396 : vector<8x128xf32>
    %398 = vector.broadcast %375 : vector<1x128xf32> to vector<8x128xf32>
    %399 = arith.mulf %397, %398 : vector<8x128xf32>
    %400 = vector.broadcast %377 : vector<1x128xf32> to vector<8x128xf32>
    %401 = arith.addf %399, %400 : vector<8x128xf32>
    %c0_150 = arith.constant 0 : index
    %c0_151 = arith.constant 0 : index
    %c0_152 = arith.constant 0 : index
    %402 = vector.load %arg17[%c0_150, %c0_151, %c0_152] : memref<1x8x128xf32, #tpu.memory_space<vmem>>, vector<1x8x128xf32>
    %403 = vector.shape_cast %402 : vector<1x8x128xf32> to vector<8x128xf32>
    %404 = vector.shape_cast %401 : vector<8x128xf32> to vector<1x8x128xf32>
    tpu.vector_store %arg17[%c0_150, %c0_151, %c0_152], %404 {strides = array<i32>} : memref<1x8x128xf32, #tpu.memory_space<vmem>>, vector<1x8x128xf32>,
    return
  }
  func.func @transform_0(%arg0: i32) -> (i32, i32, i32) {
    %c0_i32 = arith.constant 0 : i32
    %c0_i32_0 = arith.constant 0 : i32
    %c0_i32_1 = arith.constant 0 : i32
    return %arg0, %c0_i32, %c0_i32_0 : i32, i32, i32
  }
  func.func @transform_1(%arg0: i32) -> (i32, i32, i32) {
    %c0_i32 = arith.constant 0 : i32
    %c0_i32_0 = arith.constant 0 : i32
    %c0_i32_1 = arith.constant 0 : i32
    return %arg0, %c0_i32, %c0_i32_0 : i32, i32, i32
  }
  func.func @transform_2(%arg0: i32) -> (i32, i32) {
    %c0_i32 = arith.constant 0 : i32
    %c0_i32_0 = arith.constant 0 : i32
    %c0_i32_1 = arith.constant 0 : i32
    return %c0_i32, %c0_i32_0 : i32, i32
  }
  func.func @transform_3(%arg0: i32) -> (i32, i32) {
    %c0_i32 = arith.constant 0 : i32
    %c0_i32_0 = arith.constant 0 : i32
    %c0_i32_1 = arith.constant 0 : i32
    return %c0_i32, %c0_i32_0 : i32, i32
  }
  func.func @transform_4(%arg0: i32) -> (i32, i32, i32) {
    %c0_i32 = arith.constant 0 : i32
    %c0_i32_0 = arith.constant 0 : i32
    %c0_i32_1 = arith.constant 0 : i32
    %c0_i32_2 = arith.constant 0 : i32
    return %c0_i32, %c0_i32_0, %c0_i32_1 : i32, i32, i32
  }
  func.func @transform_5(%arg0: i32) -> (i32, i32, i32) {
    %c0_i32 = arith.constant 0 : i32
    %c0_i32_0 = arith.constant 0 : i32
    %c0_i32_1 = arith.constant 0 : i32
    %c0_i32_2 = arith.constant 0 : i32
    return %c0_i32, %c0_i32_0, %c0_i32_1 : i32, i32, i32
  }
  func.func @transform_6(%arg0: i32) -> (i32, i32, i32) {
    %c0_i32 = arith.constant 0 : i32
    %c0_i32_0 = arith.constant 0 : i32
    %c0_i32_1 = arith.constant 0 : i32
    %c0_i32_2 = arith.constant 0 : i32
    return %c0_i32, %c0_i32_0, %c0_i32_1 : i32, i32, i32
  }
  func.func @transform_7(%arg0: i32) -> (i32, i32, i32) {
    %c0_i32 = arith.constant 0 : i32
    %c0_i32_0 = arith.constant 0 : i32
    %c0_i32_1 = arith.constant 0 : i32
    %c0_i32_2 = arith.constant 0 : i32
    return %c0_i32, %c0_i32_0, %c0_i32_1 : i32, i32, i32
  }
  func.func @transform_8(%arg0: i32) -> (i32, i32, i32) {
    %c0_i32 = arith.constant 0 : i32
    %c0_i32_0 = arith.constant 0 : i32
    %c0_i32_1 = arith.constant 0 : i32
    %c0_i32_2 = arith.constant 0 : i32
    return %c0_i32, %c0_i32_0, %c0_i32_1 : i32, i32, i32
  }
  func.func @transform_9(%arg0: i32) -> (i32, i32, i32) {
    %c0_i32 = arith.constant 0 : i32
    %c0_i32_0 = arith.constant 0 : i32
    %c0_i32_1 = arith.constant 0 : i32
    %c0_i32_2 = arith.constant 0 : i32
    return %c0_i32, %c0_i32_0, %c0_i32_1 : i32, i32, i32
  }
  func.func @transform_10(%arg0: i32) -> (i32, i32, i32) {
    %c0_i32 = arith.constant 0 : i32
    %c0_i32_0 = arith.constant 0 : i32
    %c0_i32_1 = arith.constant 0 : i32
    %c0_i32_2 = arith.constant 0 : i32
    return %c0_i32, %c0_i32_0, %c0_i32_1 : i32, i32, i32
  }
  func.func @transform_11(%arg0: i32) -> (i32, i32, i32) {
    %c0_i32 = arith.constant 0 : i32
    %c0_i32_0 = arith.constant 0 : i32
    %c0_i32_1 = arith.constant 0 : i32
    %c0_i32_2 = arith.constant 0 : i32
    return %c0_i32, %c0_i32_0, %c0_i32_1 : i32, i32, i32
  }
  func.func @transform_12(%arg0: i32) -> (i32, i32, i32) {
    %c0_i32 = arith.constant 0 : i32
    %c0_i32_0 = arith.constant 0 : i32
    %c0_i32_1 = arith.constant 0 : i32
    %c0_i32_2 = arith.constant 0 : i32
    return %c0_i32, %c0_i32_0, %c0_i32_1 : i32, i32, i32
  }
  func.func @transform_13(%arg0: i32) -> (i32, i32, i32) {
    %c0_i32 = arith.constant 0 : i32
    %c0_i32_0 = arith.constant 0 : i32
    %c0_i32_1 = arith.constant 0 : i32
    %c0_i32_2 = arith.constant 0 : i32
    return %c0_i32, %c0_i32_0, %c0_i32_1 : i32, i32, i32
  }
  func.func @transform_14(%arg0: i32) -> (i32, i32, i32) {
    %c0_i32 = arith.constant 0 : i32
    %c0_i32_0 = arith.constant 0 : i32
    %c0_i32_1 = arith.constant 0 : i32
    %c0_i32_2 = arith.constant 0 : i32
    return %c0_i32, %c0_i32_0, %c0_i32_1 : i32, i32, i32
  }
  func.func @transform_15(%arg0: i32) -> (i32, i32, i32) {
    %c0_i32 = arith.constant 0 : i32
    %c0_i32_0 = arith.constant 0 : i32
    %c0_i32_1 = arith.constant 0 : i32
    %c0_i32_2 = arith.constant 0 : i32
    return %c0_i32, %c0_i32_0, %c0_i32_1 : i32, i32, i32
  }
  func.func @transform_16(%arg0: i32) -> (i32, i32, i32) {
    %c0_i32 = arith.constant 0 : i32
    %c0_i32_0 = arith.constant 0 : i32
    %c0_i32_1 = arith.constant 0 : i32
    return %arg0, %c0_i32, %c0_i32_0 : i32, i32, i32
  }
}

</mosaic_0001>

<bundles_post_ra>
// kernel: tpu_custom_call.1
= control target key start
LH: loop header
LB: loop body
LE: loop exit
PB: predicated region body
PF: predicated region fallthrough
CT: control target
= control target key end

     0   :  { %s7047_s0 = inlined_call_operand.hbm [shape: f32[2,8,128], index: 0, kind: input, shape index: {}]   ;;  %s7048_s1 = inlined_call_operand.hbm [shape: f32[2,1,8], index: 1, kind: input, shape index: {}]   ;;  %s7049_s2 = inlined_call_operand.hbm [shape: f32[1,128], index: 2, kind: input, shape index: {}]   ;;  %s7050_s3 = inlined_call_operand.hbm [shape: f32[1,128], index: 3, kind: input, shape index: {}]   ;;  %s7051_s4 = inlined_call_operand.hbm [shape: bf16[2,128,1536], index: 4, kind: input, shape index: {}]   ;;  %s7052_s5 = inlined_call_operand.hbm [shape: f32[2,1,1536], index: 5, kind: input, shape index: {}]   ;;  %s7053_s6 = inlined_call_operand.hbm [shape: bf16[2,512,128], index: 6, kind: input, shape index: {}]   ;;  %s7054_s7 = inlined_call_operand.vmem [shape: f32[2,1,128], index: 7, kind: input, shape index: {}]   ;;  %s7055_s8 = inlined_call_operand.vmem [shape: f32[2,1,128], index: 8, kind: input, shape index: {}]   ;;  %s7056_s9 = inlined_call_operand.vmem [shape: f32[2,1,128], index: 9, kind: input, shape index: {}]   ;;  %s7057_s10 = inlined_call_operand.hbm [shape: bf16[2,128,128], index: 10, kind: input, shape index: {}]   ;;  %s7058_s11 = inlined_call_operand.vmem [shape: f32[2,1,128], index: 11, kind: input, shape index: {}]   ;;  %s7059_s12 = inlined_call_operand.hbm [shape: bf16[2,128,128], index: 12, kind: input, shape index: {}]   ;;  %s7060_s13 = inlined_call_operand.vmem [shape: f32[2,1,128], index: 13, kind: input, shape index: {}]   ;;  %s7061_s14 = inlined_call_operand.vmem [shape: f32[2,1,128], index: 14, kind: input, shape index: {}]   ;;  %s7062_s15 = inlined_call_operand.vmem [shape: f32[2,1,128], index: 15, kind: input, shape index: {}]   ;;  %s7063_s16 = inlined_call_operand.hbm [shape: f32[2,8,128], index: 16, kind: output, shape index: {}]  }
   0x1   :  { %7076 = sst [smem:[#allocation27_spill]] %s7047_s0 }
   0x2   :  { %7077 = sst [smem:[#allocation28_spill]] %s7049_s2 }
   0x3   :  { %7078 = sst [smem:[#allocation29_spill]] %s7050_s3 }
   0x4   :  { %7079 = sst [smem:[#allocation30_spill]] %s7051_s4 }
   0x5   :  { %7080 = sst [smem:[#allocation31_spill]] %s7052_s5 }
   0x6   :  { %7081 = sst [smem:[#allocation32_spill]] %s7053_s6 }
   0x7   :  { %7082 = sst [smem:[#allocation33_spill]] %s7057_s10 }
   0x8   :  { %7083 = sst [smem:[#allocation34_spill]] %s7059_s12 }
   0x9   :  { %7084 = sst [smem:[#allocation35_spill]] %s7062_s15 }
   0xa   :  { %7085 = sst [smem:[#allocation36_spill]] %s7063_s16 }
   0xb   :  { %21 = vsyncpa [#allocation3], 0 }
   0xc   :  { %23 = vsyncpa [#allocation3 + $0x1], 0 }
   0xd   :  { %24 = vsyncpa [#allocation6], 0 }
   0xe   :  { %26 = vsyncpa [#allocation6 + $0x1], 0 }
   0xf   :  { %27 = vsyncpa [#allocation9], 0 }
  0x10   :  { %28 = vsyncpa [#allocation12], 0 }
  0x11   :  { %29 = vsyncpa [#allocation15], 0 }
  0x12   :  { %30 = vsyncpa [#allocation4], 0 }
  0x13   :  { %32 = vsyncpa [#allocation4 + $0x1], 0  ;;  %s6477_s21 = smov 0   ;;  %s6479_s22 = smov 0  }
  0x14   :  { %s6481_s23 = smov 0   ;;  %s6483_s24 = smov 0  }
  0x15 LB: > { %7086 = sst [smem:[#allocation25_spill]] %s6367_s23  ;;  %s6373_s25 = smov [#allocation7]   ;;  %s6371_s24 = sphi %s6483_s24, %s7127_s24   ;;  %s6367_s23 = sphi %s6481_s23, %s7124_s23   ;;  %s6363_s22 = sphi %s6479_s22, %s7126_s22   ;;  %s6359_s21 = sphi %s6477_s21, %s7125_s21  }
  0x16   : > { %s428_s26 = sshll.u32 %s6373_s25, 4  ;;  %s6498_s27 = sadd.s32 4294967295, %s6371_s24   ;;  %s429_s26 = int_to_ptr.vmem [resolvable:$true] %s428_s26 }
  0x17   : > { %p4804_p0 = scmp.ge.s32.totalorder %s6371_s24, 1  ;;  %p7067_p1 = scmp.eq.s32.totalorder %s6498_s27, 0 }
  0x18   : > { %p415_p2 = scmp.lt.s32.totalorder %s6371_s24, 3  ;;  %s6374_s29 = smov [#allocation8]  }
  0x19   : > { %s439_s30 = sshll.u32 %s6374_s29, 4  ;;  %s6375_s0 = smov [#allocation11]   ;;  %s440_s30 = int_to_ptr.vmem [resolvable:$true] %s439_s30 }
  0x1a   : > { %p6503_p3 = pnand %p4804_p0, %p415_p2  ;;  %s462_s17 = sshll.u32 %s6375_s0, 4  ;;  %s6516_s17 = int_to_ptr.vmem [resolvable:$true] %s462_s17 }
  0x1b   : > { %s6060_s20 = scalar_lea.vmem %s429_s26, 16  ;;  %s6067_s25 = scalar_lea.vmem %s429_s26, 32 }
  0x1c   : > { %s7087_s28 = scalar_select %p6503_p3, 1, 0 }
  0x1d   : > { %p5517_p5 = pneg %p6503_p3  ;;  %p6061_p8 = scmp.ne.s32.totalorder %s429_s26, %s6060_s20 }
  0x1e   : > { %p6068_p11 = scmp.lt.s32.totalorder %s429_s26, %s429_s26  ;;  %p6069_p12 = scmp.lt.s32.totalorder %s6067_s25, %s6060_s20 }
  0x1f   : > { %p6512_p6 = pnand %p5517_p5, %p7067_p1 }
  0x20   : > { %p6070_p13 = por %p6069_p12, %p6068_p11 }
  0x21   : > { %p6520_p7 = pneg %p6512_p6 }
  0x23   : > { %p6063_p9 = pnand %p6061_p8, %p6520_p7 }
  0x25   : > { %p6064_p10 = pneg %p6063_p9 }
  0x27   : > { %p6071_p0 = pnand %p6070_p13, %p6064_p10 }
  0x29   : > { %6074 = shalt.err (!%p6071_p0)
}
  0x2a   : > { %s7090_s2 = sld [smem:[#allocation28_spill]]  ;;  %s6086_s16 = scalar_lea.vmem %s440_s30, 16 }
  0x2b   : > { %p6087_p2 = scmp.ne.s32.totalorder %s440_s30, %s6086_s16  ;;  %s6093_s15 = scalar_lea.vmem %s440_s30, 32 }
  0x2c   : > { %p6094_p8 = scmp.lt.s32.totalorder %s440_s30, %s440_s30  ;;  %p6095_p9 = scmp.lt.s32.totalorder %s6093_s15, %s6086_s16 }
  0x2d   : > { %p6089_p5 = pnand %p6087_p2, %p6520_p7 }
  0x2e   : > { %p6096_p1 = por %p6095_p9, %p6094_p8 }
  0x2f   : > { %p6090_p4 = pneg %p6089_p5 }
  0x30   : > { %5520 = dma.hbm_to_vmem [thread:$0]  (!%p6512_p6), %s7090_s2, 16, %s429_s26, [#allocation6]  }
  0x31   : > { %p6097_p3 = pnand %p6096_p1, %p6090_p4 }
  0x33   : > { %6100 = shalt.err (!%p6097_p3)
}
  0x34   : > { %s7091_s3 = sld [smem:[#allocation29_spill]]  ;;  %s6112_s26 = scalar_lea.vmem %s6516_s17, 384 }
  0x35   : > { %p6113_p10 = scmp.ne.s32.totalorder %s6516_s17, %s6112_s26  ;;  %p6120_p13 = scmp.lt.s32.totalorder %s6516_s17, %s6516_s17 }
  0x36   : > { %p6121_p0 = scmp.lt.s32.totalorder %s6112_s26, %s6112_s26 }
  0x37   : > { %p6115_p11 = pnand %p6113_p10, %p6520_p7 }
  0x38   : > { %p6122_p1 = por %p6121_p0, %p6120_p13 }
  0x39   : > { %p6116_p12 = pneg %p6115_p11 }
  0x3a   : > { %5523 = dma.hbm_to_vmem [thread:$0]  (!%p6512_p6), %s7091_s3, 16, %s440_s30, [#allocation9]  }
  0x3b   : > { %p6123_p3 = pnand %p6122_p1, %p6116_p12 }
  0x3d   : > { %6126 = shalt.err (!%p6123_p3)
}
  0x3e   : > { %s6376_s15 = smov 192   ;;  %s6377_s16 = smov 12  }
  0x3f   : > { %s7092_s5 = sld [smem:[#allocation31_spill]]  ;;  %s6378_s30 = smov [#allocation14]  }
  0x40   : > { %s497_s20 = sshll.u32 %s6378_s30, 4  ;;  %s6379_s25 = smov [#allocation10]   ;;  %s498_s20 = int_to_ptr.vmem [resolvable:$true] %s497_s20 }
  0x41   : > { %s449_s2 = sshll.u32 %s6379_s25, 4  ;;  %s6138_s3 = scalar_lea.vmem %s498_s20, 2048  ;;  %s450_s2 = int_to_ptr.vmem [resolvable:$true] %s449_s2 }
  0x42   : > { %p6139_p4 = scmp.ne.s32.totalorder %s498_s20, %s6138_s3  ;;  %p6146_p8 = scmp.lt.s32.totalorder %s498_s20, %s498_s20 }
  0x43   : > { %p6147_p9 = scmp.lt.s32.totalorder %s6138_s3, %s6138_s3 }
  0x44   : > { %p6141_p2 = pnand %p6139_p4, %p6520_p7 }
  0x45   : > { %5529 = dma.hbm_to_vmem [thread:$0]  (!%p6512_p6), %s7092_s5, 384, %s6516_s17, [#allocation12], %s6376_s15, %s6376_s15, %s6377_s16  }
  0x46   : > { %p6142_p5 = pneg %p6141_p2  ;;  %p6148_p10 = por %p6147_p9, %p6146_p8 }
  0x48   : > { %p6149_p11 = pnand %p6148_p10, %p6142_p5 }
  0x4a   : > { %6152 = shalt.err (!%p6149_p11)
}
  0x4b   : > { %s7069_s26 = smov 64   ;;  %s7071_s29 = smov 4  }
  0x4c   : > { %s7093_s10 = sld [smem:[#allocation33_spill]]  ;;  %s6164_s16 = scalar_lea.vmem %s450_s2, 24576 }
  0x4d   : > { %p6165_p12 = scmp.ne.s32.totalorder %s450_s2, %s6164_s16  ;;  %p6172_p1 = scmp.lt.s32.totalorder %s450_s2, %s450_s2 }
  0x4e   : > { %p6173_p3 = scmp.lt.s32.totalorder %s6164_s16, %s6164_s16 }
  0x4f   : > { %p6167_p13 = pnand %p6165_p12, %p6520_p7 }
  0x50   : > { %p6174_p4 = por %p6173_p3, %p6172_p1 }
  0x51   : > { %p6168_p0 = pneg %p6167_p13 }
  0x52   : > { %5535 = dma.hbm_to_vmem [thread:$0]  (!%p6512_p6), %s7093_s10, 2048, %s498_s20, [#allocation15], %s7069_s26, %s7069_s26, %s7071_s29  }
  0x53   : > { %p6175_p2 = pnand %p6174_p4, %p6168_p0 }
  0x55   : > { %6178 = shalt.err (!%p6175_p2)
}
  0x56   : > { %s6382_s3 = smov 768   ;;  %s6383_s0 = smov 48  }
  0x57   : > { %s7094_s4 = sld [smem:[#allocation30_spill]]  ;;  %s6384_s20 = smov [#allocation13]  }
  0x58   : > { %s475_s17 = sshll.u32 %s6384_s20, 4  ;;  %s6385_s15 = smov [#allocation16]   ;;  %s476_s17 = int_to_ptr.vmem [resolvable:$true] %s475_s17 }
  0x59   : > { %s513_s26 = sshll.u32 %s6385_s15, 4  ;;  %s6190_s29 = scalar_lea.vmem %s476_s17, 8192  ;;  %s514_s26 = int_to_ptr.vmem [resolvable:$true] %s513_s26 }
  0x5a   : > { %p6191_p5 = scmp.ne.s32.totalorder %s476_s17, %s6190_s29  ;;  %p6198_p10 = scmp.lt.s32.totalorder %s476_s17, %s476_s17 }
  0x5b   : > { %p6199_p11 = scmp.lt.s32.totalorder %s6190_s29, %s6190_s29 }
  0x5c   : > { %p6193_p8 = pnand %p6191_p5, %p6520_p7 }
  0x5d   : > { %5526 = dma.hbm_to_vmem [thread:$0]  (!%p6512_p6), %s7094_s4, 24576, %s450_s2, [#allocation9], %s6382_s3, %s6382_s3, %s6383_s0  }
  0x5e   : > { %p6194_p9 = pneg %p6193_p8  ;;  %p6200_p12 = por %p6199_p11, %p6198_p10 }
  0x60   : > { %p6201_p13 = pnand %p6200_p12, %p6194_p9 }
  0x62   : > { %6204 = shalt.err (!%p6201_p13)
}
  0x63   : > { %s7095_s16 = smov 4   ;;  %s7096_s30 = smov 64  }
  0x64   : > { %s7097_s6 = sld [smem:[#allocation32_spill]]  ;;  %s6216_s0 = scalar_lea.vmem %s514_s26, 2048 }
  0x65   : > { %p6217_p0 = scmp.ne.s32.totalorder %s514_s26, %s6216_s0  ;;  %p6224_p4 = scmp.lt.s32.totalorder %s514_s26, %s514_s26 }
  0x66   : > { %p6225_p2 = scmp.lt.s32.totalorder %s6216_s0, %s6216_s0 }
  0x67   : > { %p6219_p1 = pnand %p6217_p0, %p6520_p7 }
  0x68   : > { %p6226_p5 = por %p6225_p2, %p6224_p4 }
  0x69   : > { %p6220_p3 = pneg %p6219_p1 }
  0x6a   : > { %5532 = dma.hbm_to_vmem [thread:$0]  (!%p6512_p6), %s7097_s6, 8192, %s476_s17, [#allocation12], %s7096_s30, %s7096_s30, %s7095_s16  }
  0x6b   : > { %p6227_p8 = pnand %p6226_p5, %p6220_p3 }
  0x6d   : > { %6230 = shalt.err (!%p6227_p8)
}
  0x6e   : > { %s7098_s12 = sld [smem:[#allocation34_spill]]  ;;  %s4803_s18 = sadd.s32 4294967294, %s6371_s24  }
  0x6f   : > { %s6589_s19 = sadd.s32 1, %s6371_s24   ;;  %s45_s20 = sadd.s32 1, %s6367_s23 }
  0x70   : > { %s42_s17 = ssub.s32 %s6371_s24, %s6589_s19  ;;  %p52_p7 = scmp.ne.s32.totalorder %s6367_s23, %s6363_s22 }
  0x71   : > { %p43_p9 = scmp.eq.s32.totalorder %s42_s17, 0  ;;  %p53_p10 = scmp.eq.s32.totalorder %s6371_s24, 0 }
  0x72   : > { %p58_p11 = scmp.ne.s32.totalorder %s6363_s22, %s6359_s21  ;;  %p402_p12 = scmp.eq.s32.totalorder %s6498_s27, 1 }
  0x73   : > { %s6601_s15 = scalar_select %p43_p9, %s6367_s23, %s45_s20  }
  0x74   : > { %5538 = dma.hbm_to_vmem [thread:$0]  (!%p6512_p6), %s7098_s12, 2048, %s514_s26, [#allocation15], %s7096_s30, %s7096_s30, %s7095_s16  }
  0x75   : > { %7099 = sst [smem:[#allocation26_spill]] %s6601_s15  ;;  %p54_p13 = por %p53_p10, %p52_p7 }
  0x76   : > { %p7100_p0 = scmp.eq.s32.totalorder %s6498_s27, 0  ;;  %p6609_p6 = por %p402_p12, %p52_p7 }
  0x77   : > { %p408_p3 = scmp.eq.s32.totalorder %s4803_s18, 1  ;;  %p5557_p4 = scmp.lt.s32.totalorder %s6371_s24, 2 }
  0x78   : > { %p6605_p1 = por %p7100_p0, %p58_p11  ;;  %s6615_s30 = sand.u32 1, %s6367_s23  }
  0x79   : > { %s7102_s16 = scalar_select %p6609_p6, 1, 0 }
  0x7a   : > { %s7101_s26 = scalar_select %p6605_p1, 1, 0 }
  0x7b   : > { %p6617_p2 = por %p408_p3, %p58_p11  ;;  %s4813_s3 = sshll.u32 %s6615_s30, 3 }
  0x7c   : > { %s4814_s0 = sshll.u32 %s6371_s24, 7  ;;  %s7104_s20 = sld [smem:[#allocation27_spill]] }
  0x7d   : > { %s7103_s2 = scalar_select %p6617_p2, 1, 0 }
  0x7e   : > { %s540_s18 = scalar_lea.vmem [#allocation2], %s4813_s3  ;;  %p6628_p5 = pnand %p5557_p4, %p54_p13 }
  0x7f   : > { %s547_s4 = sshll.u32 %s540_s18, 4  ;;  %s537_s10 = scalar_lea.sflag [#allocation3], %s6615_s30  ;;  %s548_s4 = int_to_ptr.vmem [resolvable:$true] %s547_s4 }
  0x80   : > { %p6233_p7 = pneg %p6628_p5 }
  0x82   : > { %s6626_s17 = scalar_lea.hbm %s7104_s20, %s4814_s0  ;;  %s6236_s29 = scalar_lea.hbm %s7104_s20, 256 }
  0x83   : > { %s6231_s12 = scalar_lea.hbm %s6626_s17, 128  ;;  %p6237_p11 = scmp.lt.s32.totalorder %s6626_s17, %s7104_s20 }
  0x84   : > { %p6232_p8 = scmp.ne.s32.totalorder %s6626_s17, %s6231_s12  ;;  %p6238_p12 = scmp.lt.s32.totalorder %s6236_s29, %s6231_s12 }
  0x86   : > { %p6234_p9 = pnand %p6233_p7, %p6232_p8  ;;  %p6239_p13 = por %p6238_p12, %p6237_p11 }
  0x88   : > { %p6235_p10 = pneg %p6234_p9 }
  0x8a   : > { %p6240_p0 = pnand %p6239_p13, %p6235_p10 }
  0x8c   : > { %6243 = shalt.err (!%p6240_p0)
}
  0x8d   : > { %s6244_s6 = scalar_lea.vmem %s548_s4, 128  ;;  %s6386_s15 = smov [#allocation2]  }
  0x8e   : > { %p6245_p3 = scmp.ne.s32.totalorder %s548_s4, %s6244_s6  ;;  %s6249_s23 = sshll.u32 %s6386_s15, 4  ;;  %s6250_s23 = int_to_ptr.vmem [resolvable:$false] %s6249_s23 }
  0x8f   : > { %s6251_s0 = scalar_lea.vmem %s6250_s23, 256  ;;  %p6252_p9 = scmp.lt.s32.totalorder %s548_s4, %s6250_s23 }
  0x90   : > { %p6247_p4 = pnand %p6245_p3, %p6233_p7  ;;  %p6253_p2 = scmp.lt.s32.totalorder %s6251_s0, %s6244_s6 }
  0x92   : > { %p6248_p8 = pneg %p6247_p4  ;;  %p6254_p6 = por %p6253_p2, %p6252_p9 }
  0x94   : > { %p6255_p1 = pnand %p6254_p6, %p6248_p8 }
  0x96   : > { %6258 = shalt.err (!%p6255_p1)
}
  0x97   : > { %5542 = dma.hbm_to_vmem [thread:$0]  (!%p6628_p5), %s6626_s17, 128, %s548_s4, %s537_s10  }
  0x98   : > { %s4815_s12 = sshll.u32 %s6371_s24, 4  ;;  %s557_s6 = scalar_lea.vmem [#allocation5], %s6615_s30 }
  0x99   : > { %s6658_s15 = scalar_lea.hbm %s7048_s1, %s4815_s12  ;;  %s564_s23 = sshll.u32 %s557_s6, 4  ;;  %s565_s23 = int_to_ptr.vmem [resolvable:$true] %s564_s23 }
  0x9a   : > { %s7106_s25 = sand.u32 1, %s6371_s24   ;;  %s6259_s0 = scalar_lea.hbm %s6658_s15, 16 }
  0x9b   : > { %s555_s18 = scalar_lea.sflag [#allocation6], %s7106_s25  ;;  %p6260_p1 = scmp.ne.s32.totalorder %s6658_s15, %s6259_s0 }
  0x9c   : > { %s6264_s17 = scalar_lea.hbm %s7048_s1, 32  ;;  %p6265_p10 = scmp.lt.s32.totalorder %s6658_s15, %s7048_s1 }
  0x9d   : > { %p6262_p6 = pnand %p6260_p1, %p6233_p7  ;;  %p6266_p11 = scmp.lt.s32.totalorder %s6264_s17, %s6259_s0 }
  0x9f   : > { %p6263_p2 = pneg %p6262_p6  ;;  %p6267_p12 = por %p6266_p11, %p6265_p10 }
  0xa1   : > { %p6268_p13 = pnand %p6267_p12, %p6263_p2 }
  0xa3   : > { %6271 = shalt.err (!%p6268_p13)
}
  0xa4   : > { %s6272_s30 = scalar_lea.vmem %s565_s23, 16  ;;  %s6387_s29 = smov [#allocation5]  }
  0xa5   : > { %p6273_p0 = scmp.ne.s32.totalorder %s565_s23, %s6272_s30  ;;  %s6277_s6 = sshll.u32 %s6387_s29, 4  ;;  %s6278_s6 = int_to_ptr.vmem [resolvable:$false] %s6277_s6 }
  0xa6   : > { %s6279_s25 = scalar_lea.vmem %s6278_s6, 32  ;;  %p6280_p8 = scmp.lt.s32.totalorder %s565_s23, %s6278_s6 }
  0xa7   : > { %p6275_p3 = pnand %p6273_p0, %p6233_p7  ;;  %p6281_p9 = scmp.lt.s32.totalorder %s6279_s25, %s6272_s30 }
  0xa9   : > { %p6276_p4 = pneg %p6275_p3  ;;  %p6282_p1 = por %p6281_p9, %p6280_p8 }
  0xab   : > { %p6283_p6 = pnand %p6282_p1, %p6276_p4 }
  0xad   : > { %6286 = shalt.err (!%p6283_p6)
}
  0xae   : > { %5545 = dma.hbm_to_vmem [thread:$0]  (!%p6628_p5), %s6658_s15, 16, %s565_s23, %s555_s18  }
  0xaf   : > { %p7107_p2 = scmp.ne.s32.totalorder %s7087_s28, 0 }
  0xb0   : > { %s6684_s0 = sand.u32 (!%p7107_p2), 1, %s6363_s22   ;;  %p7108_p7 = scmp.ne.s32.totalorder (!%p7107_p2), %s7101_s26, 0 }
  0xb1   : > { %573 = sbr.rel (%p7107_p2) target bundleno = 4962 (0x1362), region = 84  ;;  %s4817_s4 = sshll.u32 (!%p7107_p2), %s6684_s0, 3 }
  0xb2   : > { %s576_s10 = scalar_lea.sflag (!%p7107_p2), [#allocation3], %s6684_s0  ;;  %s579_s17 = scalar_lea.vmem (!%p7107_p2), [#allocation2], %s4817_s4 }
  0xb6   : > { %6330 = dma.done.wait (%p7108_p7), %s576_s10, 128  }
  0xb7   : > { %6332 = vsyncadd (%p7108_p7), %s576_s10, 4294967168  ;;  %s584_s5 = sand.u32 1, %s6498_s27   ;;  %s587_s15 = scalar_lea.vmem [#allocation5], %s6684_s0 }
  0xb8   : > { %s585_s28 = scalar_lea.sflag [#allocation6], %s584_s5 }
  0xb9   : > { %6334 = dma.done.wait (%p7108_p7), %s585_s28, 16  }
  0xba   : > { %6336 = vsyncadd (%p7108_p7), %s585_s28, 4294967280  ;;  %p7109_p5 = scmp.eq.s32.totalorder %s6498_s27, 0 }
  0xbc   : > { %6338 = dma.done.wait (%p7109_p5), [#allocation6], 16   ;;  %p7110_p10 = pmov %p7109_p5 }
  0xbd   : > { %p7111_p11 = pmov %p7109_p5 }
  0xbe   : > { %6340 = vsyncadd (%p7110_p10), [#allocation6], 4294967280 }
  0xbf   : > { %6342 = dma.done.wait (%p7111_p11), [#allocation9], 24592   ;;  %p7112_p12 = pmov %p7109_p5 }
  0xc0   : > { %p7113_p13 = pmov %p7109_p5 }
  0xc1   : > { %6344 = vsyncadd (%p7112_p12), [#allocation9], 4294942704 }
  0xc2   : > { %6346 = dma.done.wait (%p7113_p13), [#allocation12], 8576   ;;  %p7114_p0 = pmov %p7109_p5 }
  0xc4   : > { %6348 = vsyncadd (%p7114_p0), [#allocation12], 4294958720  ;;  %p7115_p3 = pmov %p7114_p0 }
  0xc5   : > { %p7116_p4 = pmov %p7114_p0 }
  0xc6   : > { %6350 = dma.done.wait (%p7115_p3), [#allocation15], 4096  }
  0xc7   : > { %6352 = vsyncadd (%p7116_p4), [#allocation15], 4294963200  ;;  %v669_v0 = vld [vmem:[%s579_s17] sm:$0xff]  ;;  %v670_v9 = vlaneseq  ;;  %v6388_v13 = vmov 0.0   ;;  %v6389_v44 = vmov 0   ;;  %vm6390_vm1 = vmmov 0  }
  0xc8   : > { %678 = vadd.xlane.f32.xlu0 %v669_v0  ;;  %v5614_v1 = vld [vmem:[#allocation10 + $0x2a4] ss:$48 sps:$4 sm:$0xff]   ;;  %v5616_v2 = vld [vmem:[#allocation10 + $0x2ac] ss:$48 sps:$4 sm:$0xff]   ;;  %v5618_v3 = vld [vmem:[#allocation10 + $0x2a0] ss:$48 sps:$4 sm:$0xff]   ;;  %1377 = vmatprep.mubr.bf16.mxu0 %v6389_v44 }
  0xc9   : > { %v5619_v4 = vld [vmem:[#allocation10 + $0x2a8] ss:$48 sps:$4 sm:$0xff]   ;;  %v5620_v5 = vld [vmem:[#allocation10 + $0x244] ss:$48 sps:$4 sm:$0xff]   ;;  %v5622_v6 = vld [vmem:[#allocation10 + $0x24c] ss:$48 sps:$4 sm:$0xff]   ;;  %1345 = vmatprep.subr.bf16.mxu0 %v5614_v1  ;;  %1386 = vmatprep.subr.bf16.mxu1 %v5616_v2 }
  0xca   : > { %v5624_v7 = vld [vmem:[#allocation10 + $0x240] ss:$48 sps:$4 sm:$0xff]   ;;  %v5625_v8 = vld [vmem:[#allocation10 + $0x248] ss:$48 sps:$4 sm:$0xff]   ;;  %1346 = vmatpush1.bf16.msra.mxu0 %v5618_v3  ;;  %1387 = vmatpush1.bf16.msra.mxu1 %v5619_v4  ;;  %v671_v10 = vand.u32 127, %v670_v9  ;;  %vm1829_vm2 = vcmask 1043456  }
  0xcb   : > { %1347 = vmatprep.subr.bf16.mxu0 %v5620_v5  ;;  %1388 = vmatprep.subr.bf16.mxu1 %v5622_v6  ;;  %v5626_v18 = vld [vmem:[#allocation10 + $0x1e4] ss:$48 sps:$4 sm:$0xff]   ;;  %v5628_v19 = vld [vmem:[#allocation10 + $0x1ec] ss:$48 sps:$4 sm:$0xff]   ;;  %v5630_v20 = vld [vmem:[#allocation10 + $0x1e0] ss:$48 sps:$4 sm:$0xff]  }
  0xcc   : > { %vm672_vm0 = vcmp.lt.s32.totalorder %v671_v10, 32  ;;  %v5631_v21 = vld [vmem:[#allocation10 + $0x1e8] ss:$48 sps:$4 sm:$0xff]   ;;  %v5632_v22 = vld [vmem:[#allocation10 + $0x184] ss:$48 sps:$4 sm:$0xff]   ;;  %1418 = vmatprep.mubr.bf16.mxu1 %v6389_v44  ;;  %vm1777_vm3 = vcmask 64512  }
  0xcd   : > { %v6718_v14 = vsel %vm672_vm0, 1.0, %v6388_v13  ;;  %v5634_v23 = vld [vmem:[#allocation10 + $0x18c] ss:$48 sps:$4 sm:$0xff]   ;;  %v5636_v24 = vld [vmem:[#allocation10 + $0x180] ss:$48 sps:$4 sm:$0xff]   ;;  %s7117_s23 = sld [smem:[#allocation35_spill]] }
  0xce   : > { %1348 = vmatpush1.bf16.msra.mxu0 %v5624_v7  ;;  %1389 = vmatpush1.bf16.msra.mxu1 %v5625_v8  ;;  %v5637_v25 = vld [vmem:[#allocation10 + $0x188] ss:$48 sps:$4 sm:$0xff]   ;;  %v5638_v26 = vld [vmem:[#allocation10 + $0x124] ss:$48 sps:$4 sm:$0xff]   ;;  %v5640_v27 = vld [vmem:[#allocation10 + $0x12c] ss:$48 sps:$4 sm:$0xff]  }
  0xcf   : > { %1349 = vmatprep.subr.bf16.mxu0 %v5626_v18  ;;  %1390 = vmatprep.subr.bf16.mxu1 %v5628_v19  ;;  %v5642_v28 = vld [vmem:[#allocation10 + $0x120] ss:$48 sps:$4 sm:$0xff]   ;;  %v5643_v29 = vld [vmem:[#allocation10 + $0x128] ss:$48 sps:$4 sm:$0xff]   ;;  %v5644_v30 = vld [vmem:[#allocation10 + $0xc4] ss:$48 sps:$4 sm:$0xff]  }
  0xd0   : > { %v5646_v31 = vld [vmem:[#allocation10 + $0xcc] ss:$48 sps:$4 sm:$0xff]   ;;  %v5648_v32 = vld [vmem:[#allocation10 + $0xc0] ss:$48 sps:$4 sm:$0xff]   ;;  %v5649_v33 = vld [vmem:[#allocation10 + $0xc8] ss:$48 sps:$4 sm:$0xff]  }
  0xd1   : > { %v5650_v34 = vld [vmem:[#allocation10 + $0x64] ss:$48 sps:$4 sm:$0xff]   ;;  %v5652_v35 = vld [vmem:[#allocation10 + $0x6c] ss:$48 sps:$4 sm:$0xff]   ;;  %v5654_v36 = vld [vmem:[#allocation10 + $0x60] ss:$48 sps:$4 sm:$0xff]  }
  0xd2   : > { %1350 = vmatpush1.bf16.msra.mxu0 %v5630_v20  ;;  %1391 = vmatpush1.bf16.msra.mxu1 %v5631_v21  ;;  %v5655_v37 = vld [vmem:[#allocation10 + $0x68] ss:$48 sps:$4 sm:$0xff]   ;;  %v5656_v38 = vld [vmem:[#allocation10 + $0x4] ss:$48 sps:$4 sm:$0xff]   ;;  %v5658_v39 = vld [vmem:[#allocation10 + $0xc] ss:$48 sps:$4 sm:$0xff]  }
  0xd3   : > { %1351 = vmatprep.subr.bf16.mxu0 %v5632_v22  ;;  %1392 = vmatprep.subr.bf16.mxu1 %v5634_v23  ;;  %v5660_v40 = vld [vmem:[#allocation10] ss:$48 sps:$4 sm:$0xff]   ;;  %v5661_v41 = vld [vmem:[#allocation10 + $0x8] ss:$48 sps:$4 sm:$0xff]   ;;  %v5664_v42 = vld [vmem:[#allocation10 + $0x2b4] ss:$48 sps:$4 sm:$0xff]   ;;  %s7118_s18 = smov %s7117_s23 }
  0xd4   : > { %v5667_v43 = vld [vmem:[#allocation10 + $0x2bc] ss:$48 sps:$4 sm:$0xff]   ;;  %v5662_v54 = vld [vmem:[#allocation10 + $0x2b0] ss:$48 sps:$4 sm:$0xff]   ;;  %v5665_v55 = vld [vmem:[#allocation10 + $0x2b8] ss:$48 sps:$4 sm:$0xff]  }
  0xd5   : > { %v4827_v49 = vld [vmem:[#allocation7] ss:$0 sm:$0xff]  ;;  %v4828_v51 = vld [vmem:[#allocation8] ss:$0 sm:$0xff]  ;;  %v5670_v57 = vld [vmem:[#allocation10 + $0x254] ss:$48 sps:$4 sm:$0xff]  }
  0xd6   : > { %1352 = vmatpush1.bf16.msra.mxu0 %v5636_v24  ;;  %1393 = vmatpush1.bf16.msra.mxu1 %v5637_v25  ;;  %v5673_v58 = vld [vmem:[#allocation10 + $0x25c] ss:$48 sps:$4 sm:$0xff]   ;;  %v5668_v59 = vld [vmem:[#allocation10 + $0x250] ss:$48 sps:$4 sm:$0xff]   ;;  %v5671_v60 = vld [vmem:[#allocation10 + $0x258] ss:$48 sps:$4 sm:$0xff]  }
  0xd7   : > { %1353 = vmatprep.subr.bf16.mxu0 %v5638_v26  ;;  %1394 = vmatprep.subr.bf16.mxu1 %v5640_v27  ;;  %v5676_v61 = vld [vmem:[#allocation10 + $0x1f4] ss:$48 sps:$4 sm:$0xff]   ;;  %v5679_v62 = vld [vmem:[#allocation10 + $0x1fc] ss:$48 sps:$4 sm:$0xff]   ;;  %v5674_v63 = vld [vmem:[#allocation10 + $0x1f0] ss:$48 sps:$4 sm:$0xff]  }
  0xd8   : > { %v5682_v1 = vld [vmem:[#allocation10 + $0x194] ss:$48 sps:$4 sm:$0xff]   ;;  %v5685_v2 = vld [vmem:[#allocation10 + $0x19c] ss:$48 sps:$4 sm:$0xff]   ;;  %v5680_v3 = vld [vmem:[#allocation10 + $0x190] ss:$48 sps:$4 sm:$0xff]  }
  0xd9   : > { %v5683_v4 = vld [vmem:[#allocation10 + $0x198] ss:$48 sps:$4 sm:$0xff]   ;;  %v5688_v5 = vld [vmem:[#allocation10 + $0x134] ss:$48 sps:$4 sm:$0xff]   ;;  %v5691_v6 = vld [vmem:[#allocation10 + $0x13c] ss:$48 sps:$4 sm:$0xff]  }
  0xda   : > { %1354 = vmatpush1.bf16.msra.mxu0 %v5642_v28  ;;  %1395 = vmatpush1.bf16.msra.mxu1 %v5643_v29  ;;  %v5686_v7 = vld [vmem:[#allocation10 + $0x130] ss:$48 sps:$4 sm:$0xff]   ;;  %v5689_v8 = vld [vmem:[#allocation10 + $0x138] ss:$48 sps:$4 sm:$0xff]   ;;  %v5694_v10 = vld [vmem:[#allocation10 + $0xd4] ss:$48 sps:$4 sm:$0xff]  }
  0xdb   : > { %1355 = vmatprep.subr.bf16.mxu0 %v5644_v30  ;;  %1396 = vmatprep.subr.bf16.mxu1 %v5646_v31  ;;  %v5698_v18 = vld [vmem:[#allocation10 + $0x70] ss:$48 sps:$4 sm:$0xff]   ;;  %v5701_v19 = vld [vmem:[#allocation10 + $0x78] ss:$48 sps:$4 sm:$0xff]   ;;  %v5706_v20 = vld [vmem:[#allocation10 + $0x14] ss:$48 sps:$4 sm:$0xff]  }
  0xdc   : > { %v5709_v21 = vld [vmem:[#allocation10 + $0x1c] ss:$48 sps:$4 sm:$0xff]   ;;  %v5704_v22 = vld [vmem:[#allocation10 + $0x10] ss:$48 sps:$4 sm:$0xff]   ;;  %v5707_v23 = vld [vmem:[#allocation10 + $0x18] ss:$48 sps:$4 sm:$0xff]  }
  0xdd   : > { %v5712_v24 = vld [vmem:[#allocation10 + $0x2c4] ss:$48 sps:$4 sm:$0xff]   ;;  %v5715_v25 = vld [vmem:[#allocation10 + $0x2cc] ss:$48 sps:$4 sm:$0xff]   ;;  %v5710_v26 = vld [vmem:[#allocation10 + $0x2c0] ss:$48 sps:$4 sm:$0xff]  }
  0xde   : > { %1356 = vmatpush1.bf16.msra.mxu0 %v5648_v32  ;;  %1397 = vmatpush1.bf16.msra.mxu1 %v5649_v33  ;;  %v5713_v27 = vld [vmem:[#allocation10 + $0x2c8] ss:$48 sps:$4 sm:$0xff]   ;;  %v5718_v28 = vld [vmem:[#allocation10 + $0x264] ss:$48 sps:$4 sm:$0xff]   ;;  %v5721_v29 = vld [vmem:[#allocation10 + $0x26c] ss:$48 sps:$4 sm:$0xff]  }
  0xdf   : > { %1357 = vmatprep.subr.bf16.mxu0 %v5650_v34  ;;  %1398 = vmatprep.subr.bf16.mxu1 %v5652_v35  ;;  %v5716_v30 = vld [vmem:[#allocation10 + $0x260] ss:$48 sps:$4 sm:$0xff]   ;;  %v5719_v31 = vld [vmem:[#allocation10 + $0x268] ss:$48 sps:$4 sm:$0xff]   ;;  %v5724_v32 = vld [vmem:[#allocation10 + $0x204] ss:$48 sps:$4 sm:$0xff]  }
  0xe0   : > { %v5727_v33 = vld [vmem:[#allocation10 + $0x20c] ss:$48 sps:$4 sm:$0xff]   ;;  %v5722_v34 = vld [vmem:[#allocation10 + $0x200] ss:$48 sps:$4 sm:$0xff]   ;;  %v5725_v35 = vld [vmem:[#allocation10 + $0x208] ss:$48 sps:$4 sm:$0xff]  }
  0xe1   : > { %s5148_s12 = sshll.u32 %s6498_s27, 7  ;;  %s667_s3 = scalar_lea.vmem [#allocation17], %s4817_s4 }
  0xe2   : > { %1358 = vmatpush1.bf16.msra.mxu0 %v5654_v36  ;;  %1399 = vmatpush1.bf16.msra.mxu1 %v5655_v37  ;;  %v5730_v36 = vld [vmem:[#allocation10 + $0x1a4] ss:$48 sps:$4 sm:$0xff]   ;;  %v5733_v37 = vld [vmem:[#allocation10 + $0x1ac] ss:$48 sps:$4 sm:$0xff]   ;;  %s4647_s30 = sshll.u32 %s667_s3, 4  ;;  %s7119_s25 = sld [smem:[#allocation36_spill]]  ;;  %s4648_s30 = int_to_ptr.vmem [resolvable:$true] %s4647_s30 }
  0xe3   : > { %1359 = vmatprep.subr.bf16.mxu0 %v5656_v38  ;;  %1400 = vmatprep.subr.bf16.mxu1 %v5658_v39  ;;  %v5728_v38 = vld [vmem:[#allocation10 + $0x1a0] ss:$48 sps:$4 sm:$0xff]   ;;  %v5731_v39 = vld [vmem:[#allocation10 + $0x1a8] ss:$48 sps:$4 sm:$0xff]   ;;  %s4634_s17 = scalar_lea.sflag [#allocation4], %s6684_s0  ;;  %s6287_s5 = scalar_lea.vmem %s4648_s30, 128 }
  0xe4   : > { %p6288_p8 = scmp.ne.s32.totalorder %s4648_s30, %s6287_s5  ;;  %p7120_p9 = scmp.ne.s32.totalorder %s7102_s16, 0 }
  0xe5   : > { %s6391_s28 = smov [#allocation17]  }
  0xe6   : > { %1360 = vmatpush1.bf16.msra.mxu0 %v5660_v40  ;;  %1401 = vmatpush1.bf16.msra.mxu1 %v5661_v41  ;;  %v5736_v40 = vld [vmem:[#allocation10 + $0x144] ss:$48 sps:$4 sm:$0xff]   ;;  %v5739_v41 = vld [vmem:[#allocation10 + $0x14c] ss:$48 sps:$4 sm:$0xff]   ;;  %p6289_p1 = pnand %p6288_p8, %p7120_p9  ;;  %s6291_s26 = sshll.u32 %s6391_s28, 4  ;;  %s6292_s26 = int_to_ptr.vmem [resolvable:$false] %s6291_s26 }
  0xe7   : > { %1427 = vmatprep.subr.bf16.mxu0 %v5664_v42  ;;  %1468 = vmatprep.subr.bf16.mxu1 %v5667_v43  ;;  %v5734_v42 = vld [vmem:[#allocation10 + $0x140] ss:$48 sps:$4 sm:$0xff]   ;;  %v5737_v43 = vld [vmem:[#allocation10 + $0x148] ss:$48 sps:$4 sm:$0xff]   ;;  %s6293_s27 = scalar_lea.vmem %s6292_s26, 256  ;;  %p6294_p2 = scmp.lt.s32.totalorder %s4648_s30, %s6292_s26 }
  0xe8   : > { %s4645_s10 = scalar_lea.hbm %s7119_s25, %s5148_s12  ;;  %p6290_p6 = pneg %p6289_p1 }
  0xe9   : > { %p6295_p7 = scmp.lt.s32.totalorder %s6293_s27, %s6287_s5 }
  0xeb   : > { %p6296_p5 = por %p6295_p7, %p6294_p2 }
  0xed   : > { %p6297_p10 = pnand %p6296_p5, %p6290_p6 }
 0x151   : > { %v679_v11 = vpop.xlane.xlu0 %678 }
 0x152   : > { %v680_v12 = vmul.f32 0.03125, %v679_v11  ;;  %v5697_v11 = vld [vmem:[#allocation10 + $0xdc] ss:$48 sps:$4 sm:$0xff]  }
 0x154   : > { %v6720_v15 = vsub.f32 %v669_v0, %v680_v12  ;;  %v5677_v0 = vld [vmem:[#allocation10 + $0x1f8] ss:$48 sps:$4 sm:$0xff]   ;;  %v5692_v12 = vld [vmem:[#allocation10 + $0xd0] ss:$48 sps:$4 sm:$0xff]  }
 0x156   : > { %v682_v16 = vmul.f32 %v6718_v14, %v6720_v15 }
 0x158   : > { %v683_v17 = vmul.f32 %v682_v16, %v682_v16  ;;  %v5700_v16 = vld [vmem:[#allocation10 + $0x74] ss:$48 sps:$4 sm:$0xff]  }
 0x15a   : > { %684 = vadd.xlane.f32.xlu0 %v683_v17  ;;  %v5703_v17 = vld [vmem:[#allocation10 + $0x7c] ss:$48 sps:$4 sm:$0xff]  }
 0x1e3   : > { %v685_v45 = vpop.xlane.xlu0 %684 }
 0x1e4   : > { %v686_v46 = vmul.f32 0.03125, %v685_v45  ;;  %v5742_v45 = vld [vmem:[#allocation10 + $0xe4] ss:$48 sps:$4 sm:$0xff]  }
 0x1e6   : > { %v687_v47 = vadd.f32 1e-12, %v686_v46  ;;  %v5745_v46 = vld [vmem:[#allocation10 + $0xec] ss:$48 sps:$4 sm:$0xff]  }
 0x1e8   : > { %5998 = vrsqrt.f32 %v687_v47  ;;  %v5740_v47 = vld [vmem:[#allocation10 + $0xe0] ss:$48 sps:$4 sm:$0xff]  }
 0x1f5   : > { %v5999_v48 = vpop.eup %5998 }
 0x1f6   : > { %v689_v50 = vmul.f32 %v5999_v48, %v6720_v15  ;;  %v5695_v15 = vld [vmem:[#allocation10 + $0xd8] ss:$48 sps:$4 sm:$0xff]  }
 0x1f7   : > { %v5743_v48 = vld [vmem:[#allocation10 + $0xe8] ss:$48 sps:$4 sm:$0xff]  }
 0x1f8   : > { %v696_v52 = vmul.f32 %v4827_v49, %v689_v50  ;;  %v5748_v49 = vld [vmem:[#allocation10 + $0x84] ss:$48 sps:$4 sm:$0xff]   ;;  %v5751_v50 = vld [vmem:[#allocation10 + $0x8c] ss:$48 sps:$4 sm:$0xff]  }
 0x1fa   : > { %v6727_v53 = vadd.f32 %v4828_v51, %v696_v52  ;;  %v5746_v51 = vld [vmem:[#allocation10 + $0x80] ss:$48 sps:$4 sm:$0xff]   ;;  %v5749_v52 = vld [vmem:[#allocation10 + $0x88] ss:$48 sps:$4 sm:$0xff]  }
 0x1fc   : > { %v6731_v56 = vpack.c.bf16 %v6727_v53, %v6727_v53 }
 0x1fe   : > { %1378 = vmatmul.mubr.bf16.vlgmr.msra.gmra.mxu0 %v6731_v56  ;;  %1419 = vmatmul.mubr.bf16.vlgmr.msra.gmra.mxu1 %v6731_v56 }
 0x1ff   : > { %1428 = vmatpush1.bf16.msra.mxu0 %v5662_v54  ;;  %1469 = vmatpush1.bf16.msra.mxu1 %v5665_v55  ;;  %v5754_v54 = vld [vmem:[#allocation10 + $0x24] ss:$48 sps:$4 sm:$0xff]   ;;  %v5757_v55 = vld [vmem:[#allocation10 + $0x2c] ss:$48 sps:$4 sm:$0xff]  }
 0x200   : > { %1429 = vmatprep.subr.bf16.mxu0 %v5670_v57  ;;  %1470 = vmatprep.subr.bf16.mxu1 %v5673_v58  ;;  %v5752_v57 = vld [vmem:[#allocation10 + $0x20] ss:$48 sps:$4 sm:$0xff]   ;;  %v5755_v58 = vld [vmem:[#allocation10 + $0x28] ss:$48 sps:$4 sm:$0xff]  }
 0x201   : > { %1459 = vmatprep.mubr.bf16.mxu0 %v6389_v44  ;;  %1500 = vmatprep.mubr.bf16.mxu1 %v6389_v44 }
 0x203   : > { %1430 = vmatpush1.bf16.msra.mxu0 %v5668_v59  ;;  %1471 = vmatpush1.bf16.msra.mxu1 %v5671_v60 }
 0x204   : > { %1431 = vmatprep.subr.bf16.mxu0 %v5676_v61  ;;  %1472 = vmatprep.subr.bf16.mxu1 %v5679_v62 }
 0x207   : > { %1432 = vmatpush1.bf16.msra.mxu0 %v5674_v63  ;;  %1473 = vmatpush1.bf16.msra.mxu1 %v5677_v0 }
 0x208   : > { %1433 = vmatprep.subr.bf16.mxu0 %v5682_v1  ;;  %1474 = vmatprep.subr.bf16.mxu1 %v5685_v2 }
 0x20b   : > { %1434 = vmatpush1.bf16.msra.mxu0 %v5680_v3  ;;  %1475 = vmatpush1.bf16.msra.mxu1 %v5683_v4  ;;  %v6750_v3 = vshrl.u32 %v670_v9, 7 }
 0x20c   : > { %1435 = vmatprep.subr.bf16.mxu0 %v5688_v5  ;;  %1476 = vmatprep.subr.bf16.mxu1 %v5691_v6  ;;  %v801_v5 = vld [vmem:[#allocation11] sm:$0xff] }
 0x20d   : > { %v827_v4 = vsub.s32 5, %v6750_v3 }
 0x20f   : > { %1436 = vmatpush1.bf16.msra.mxu0 %v5686_v7  ;;  %1477 = vmatpush1.bf16.msra.mxu1 %v5689_v8  ;;  %v6757_v7 = vsub.s32 0, %v6750_v3  ;;  %v831_v8 = vsub.s32 6, %v6750_v3 }
 0x210   : > { %1437 = vmatprep.subr.bf16.mxu0 %v5694_v10  ;;  %1478 = vmatprep.subr.bf16.mxu1 %v5697_v11  ;;  %v828_v10 = vrot.slane %v801_v5, %v827_v4  ;;  %v6763_v11 = vsub.s32 1, %v6750_v3 }
 0x213   : > { %1438 = vmatpush1.bf16.msra.mxu0 %v5692_v12  ;;  %1479 = vmatpush1.bf16.msra.mxu1 %v5695_v15 }
 0x214   : > { %1439 = vmatprep.subr.bf16.mxu0 %v5700_v16  ;;  %1480 = vmatprep.subr.bf16.mxu1 %v5703_v17  ;;  %v835_v16 = vsub.s32 7, %v6750_v3  ;;  %v808_v17 = vrot.slane %v801_v5, %v6757_v7 }
 0x217   : > { %1440 = vmatpush1.bf16.msra.mxu0 %v5698_v18  ;;  %1481 = vmatpush1.bf16.msra.mxu1 %v5701_v19 }
 0x218   : > { %1441 = vmatprep.subr.bf16.mxu0 %v5706_v20  ;;  %1482 = vmatprep.subr.bf16.mxu1 %v5709_v21  ;;  %v832_v21 = vrot.slane %v801_v5, %v831_v8 }
 0x21b   : > { %1442 = vmatpush1.bf16.msra.mxu0 %v5704_v22  ;;  %1483 = vmatpush1.bf16.msra.mxu1 %v5707_v23  ;;  %v812_v23 = vrot.slane %v801_v5, %v6763_v11 }
 0x21c   : > { %1509 = vmatprep.subr.bf16.mxu0 %v5712_v24  ;;  %1550 = vmatprep.subr.bf16.mxu1 %v5715_v25 }
 0x21e   : > { %1460 = vmatmul.mubr.bf16.vlgmr.msra.gmra.mxu0 %v6731_v56  ;;  %1501 = vmatmul.mubr.bf16.vlgmr.msra.gmra.mxu1 %v6731_v56 }
 0x21f   : > { %1510 = vmatpush1.bf16.msra.mxu0 %v5710_v26  ;;  %1551 = vmatpush1.bf16.msra.mxu1 %v5713_v27  ;;  %v836_v27 = vrot.slane %v801_v5, %v835_v16 }
 0x220   : > { %1511 = vmatprep.subr.bf16.mxu0 %v5718_v28  ;;  %1552 = vmatprep.subr.bf16.mxu1 %v5721_v29  ;;  %v6773_v29 = vsub.s32 2, %v6750_v3 }
 0x221   : > { %1541 = vmatprep.mubr.bf16.mxu0 %v6389_v44  ;;  %1582 = vmatprep.mubr.bf16.mxu1 %v6389_v44 }
 0x223   : > { %1512 = vmatpush1.bf16.msra.mxu0 %v5716_v30  ;;  %1553 = vmatpush1.bf16.msra.mxu1 %v5719_v31 }
 0x224   : > { %1513 = vmatprep.subr.bf16.mxu0 %v5724_v32  ;;  %1554 = vmatprep.subr.bf16.mxu1 %v5727_v33 }
 0x227   : > { %1514 = vmatpush1.bf16.msra.mxu0 %v5722_v34  ;;  %1555 = vmatpush1.bf16.msra.mxu1 %v5725_v35  ;;  %v6777_v34 = vsub.s32 3, %v6750_v3 }
 0x228   : > { %1515 = vmatprep.subr.bf16.mxu0 %v5730_v36  ;;  %1556 = vmatprep.subr.bf16.mxu1 %v5733_v37  ;;  %v816_v37 = vrot.slane %v801_v5, %v6773_v29 }
 0x22b   : > { %1516 = vmatpush1.bf16.msra.mxu0 %v5728_v38  ;;  %1557 = vmatpush1.bf16.msra.mxu1 %v5731_v39 }
 0x22c   : > { %1517 = vmatprep.subr.bf16.mxu0 %v5736_v40  ;;  %1558 = vmatprep.subr.bf16.mxu1 %v5739_v41  ;;  %v820_v40 = vrot.slane %v801_v5, %v6777_v34 }
 0x22f   : > { %1518 = vmatpush1.bf16.msra.mxu0 %v5734_v42  ;;  %1559 = vmatpush1.bf16.msra.mxu1 %v5737_v43 }
 0x230   : > { %1519 = vmatprep.subr.bf16.mxu0 %v5742_v45  ;;  %1560 = vmatprep.subr.bf16.mxu1 %v5745_v46 }
 0x233   : > { %1520 = vmatpush1.bf16.msra.mxu0 %v5740_v47  ;;  %1561 = vmatpush1.bf16.msra.mxu1 %v5743_v48  ;;  %v802_v47 = vld [vmem:[#allocation11 + $0x8] sm:$0xf] }
 0x234   : > { %1521 = vmatprep.subr.bf16.mxu0 %v5748_v49  ;;  %1562 = vmatprep.subr.bf16.mxu1 %v5751_v50  ;;  %v840_v48 = vrot.slane %v802_v47, %v6757_v7  ;;  %v848_v49 = vrot.slane %v802_v47, %v6773_v29  ;;  %v844_v50 = vrot.slane %v802_v47, %v6763_v11 }
 0x237   : > { %1522 = vmatpush1.bf16.msra.mxu0 %v5746_v51  ;;  %1563 = vmatpush1.bf16.msra.mxu1 %v5749_v52  ;;  %v852_v51 = vrot.slane %v802_v47, %v6777_v34 }
 0x238   : > { %1523 = vmatprep.subr.bf16.mxu0 %v5754_v54  ;;  %1564 = vmatprep.subr.bf16.mxu1 %v5757_v55 }
 0x23b   : > { %1524 = vmatpush1.bf16.msra.mxu0 %v5752_v57  ;;  %1565 = vmatpush1.bf16.msra.mxu1 %v5755_v58 }
 0x23c   : > { %5307 = vmatprep.subr.bf16.mxu0 %v6388_v13  ;;  %5313 = vmatprep.subr.bf16.mxu1 %v6388_v13 }
 0x23e   : > { %1542 = vmatmul.mubr.bf16.vlgmr.msra.gmra.mxu0 %v6731_v56  ;;  %1583 = vmatmul.mubr.bf16.vlgmr.msra.gmra.mxu1 %v6731_v56  ;;  %v823_v56 = vsub.s32 4, %v6750_v3 }
 0x23f   : > { %5309 = vmatprep.mubr.msk.bf16.mxu0 %vm6390_vm1, %v6388_v13  ;;  %5315 = vmatprep.mubr.msk.bf16.mxu1 %vm6390_vm1, %v6388_v13 }
 0x240   : > { %v824_v6 = vrot.slane %v801_v5, %v823_v56 }
 0x2be   : > { %v1379_v59 = vpop.f32.mrf.mxu0  ;;  %v1420_v60 = vpop.f32.mrf.mxu1 }
 0x2bf   : > { %v1380_v28 = vadd.f32 %v1379_v59, %v808_v17  ;;  %v1421_v42 = vadd.f32 %v1420_v60, %v816_v37 }
 0x2c0   : > { %v1381_v61 = vpop.f32.mrf.mxu0  ;;  %v1422_v62 = vpop.f32.mrf.mxu1 }
 0x2c1   : > { %v1382_v33 = vadd.f32 %v1381_v61, %v812_v23  ;;  %v1591_v36 = vpack.c.bf16 %v1380_v28, %v1380_v28  ;;  %v1423_v43 = vadd.f32 %v1422_v62, %v820_v40  ;;  %v1593_v45 = vpack.c.bf16 %v1421_v42, %v1421_v42 }
 0x2c2   : > { %v1383_v63 = vpop.f32.mrf.mxu0  ;;  %v1424_v0 = vpop.f32.mrf.mxu1 }
 0x2c3   : > { %v1592_v39 = vpack.c.bf16 %v1382_v33, %v1382_v33  ;;  %v1594_v46 = vpack.c.bf16 %v1423_v43, %v1423_v43 }
 0x2c4   : > { %v1384_v1 = vpop.f32.mrf.mxu0  ;;  %v1425_v2 = vpop.f32.mrf.mxu1 }
 0x2de   : > { %v1461_v9 = vpop.f32.mrf.mxu0  ;;  %v1502_v12 = vpop.f32.mrf.mxu1 }
 0x2df   : > { %v1462_v15 = vadd.f32 %v1461_v9, %v824_v6  ;;  %v1503_v32 = vadd.f32 %v1502_v12, %v832_v21  ;;  %v4925_v21 = vld [vmem:[%s587_s15] ss:$0 sm:$0xff] }
 0x2e0   : > { %v1463_v18 = vpop.f32.mrf.mxu0  ;;  %v1504_v19 = vpop.f32.mrf.mxu1 }
 0x2e1   : > { %v1595_v20 = vpack.c.bf16 %v1462_v15, %v1462_v15  ;;  %v1464_v22 = vadd.f32 %v1463_v18, %v828_v10  ;;  %v1505_v35 = vadd.f32 %v1504_v19, %v836_v27  ;;  %v1597_v38 = vpack.c.bf16 %v1503_v32, %v1503_v32 }
 0x2e2   : > { %v1465_v24 = vpop.f32.mrf.mxu0  ;;  %v1506_v25 = vpop.f32.mrf.mxu1 }
 0x2e3   : > { %v1596_v26 = vpack.c.bf16 %v1464_v22, %v1464_v22  ;;  %5308 = vmatpush3.bf16.xpose.msra.mxu0 %v1595_v20  ;;  %v1598_v41 = vpack.c.bf16 %v1505_v35, %v1505_v35 }
 0x2e4   : > { %v1466_v30 = vpop.f32.mrf.mxu0  ;;  %v1507_v31 = vpop.f32.mrf.mxu1  ;;  %5319 = vmatprep.subr.bf16.mxu0 %v6388_v13 }
 0x2e5   : > { %5314 = vmatpush3.bf16.xpose.msra.mxu1 %v1596_v26 }
 0x2e6   : > { %5325 = vmatprep.subr.bf16.mxu1 %v6388_v13 }
 0x2ea   : > { %5310 = vmatmul.mubr.bf16.vlgmr.msra.gmra.mxu0 %v1591_v36 }
 0x2eb   : > { %5320 = vmatpush3.bf16.xpose.msra.mxu0 %v1597_v38  ;;  %5321 = vmatprep.mubr.msk.bf16.mxu0 %vm6390_vm1, %v6388_v13 }
 0x2ec   : > { %5316 = vmatmul.mubr.bf16.vlgmr.msra.gmra.mxu1 %v1592_v39  ;;  %5331 = vmatprep.subr.bf16.mxu0 %v6388_v13 }
 0x2ed   : > { %5326 = vmatpush3.bf16.xpose.msra.mxu1 %v1598_v41  ;;  %5327 = vmatprep.mubr.msk.bf16.mxu1 %vm6390_vm1, %v6388_v13 }
 0x2ee   : > { %5337 = vmatprep.subr.bf16.mxu1 %v6388_v13 }
 0x2f2   : > { %5322 = vmatmul.mubr.bf16.vlgmr.msra.gmra.mxu0 %v1593_v45 }
 0x2f3   : > { %5333 = vmatprep.mubr.msk.bf16.mxu0 %vm6390_vm1, %v6388_v13 }
 0x2f4   : > { %5328 = vmatmul.mubr.bf16.vlgmr.msra.gmra.mxu1 %v1594_v46 }
 0x2f5   : > { %5339 = vmatprep.mubr.msk.bf16.mxu1 %vm6390_vm1, %v6388_v13 }
 0x2fe   : > { %v1543_v52 = vpop.f32.mrf.mxu0  ;;  %v1584_v54 = vpop.f32.mrf.mxu1 }
 0x2ff   : > { %v1544_v55 = vadd.f32 %v1543_v52, %v840_v48  ;;  %v6796_v57 = vadd.f32 %v1584_v54, %v848_v49 }
 0x300   : > { %v1545_v58 = vpop.f32.mrf.mxu0  ;;  %v1586_v59 = vpop.f32.mrf.mxu1 }
 0x301   : > { %v1599_v60 = vpack.c.bf16 %v1544_v55, %v1544_v55  ;;  %v1546_v61 = vadd.f32 %v1545_v58, %v844_v50  ;;  %v6798_v62 = vadd.f32 %v1586_v59, %v852_v51 }
 0x302   : > { %v1547_v63 = vpop.f32.mrf.mxu0  ;;  %v1588_v0 = vpop.f32.mrf.mxu1 }
 0x303   : > { %v1831_v1 = vsel %vm1829_vm2, %v1599_v60, 0  ;;  %v1600_v2 = vpack.c.bf16 %v1546_v61, %v1546_v61 }
 0x304   : > { %v1548_v5 = vpop.f32.mrf.mxu0  ;;  %v1589_v6 = vpop.f32.mrf.mxu1  ;;  %5332 = vmatpush3.bf16.msra.mxu0 %v1831_v1 }
 0x305   : > { %v1877_v10 = vsel %vm1829_vm2, %v1600_v2, 0  ;;  %5343 = vmatprep.subr.bf16.mxu0 %v6388_v13 }
 0x306   : > { %5338 = vmatpush3.bf16.msra.mxu1 %v1877_v10 }
 0x307   : > { %5349 = vmatprep.subr.bf16.mxu1 %v6388_v13 }
 0x3aa   : > { %v1637_v9 = vpop.f32.mrf.mxu0 }
 0x3ab   : > { %v1763_v17 = vmul.f32 0.35355338, %v1637_v9 }
 0x3ac   : > { %v5311_v12 = vpop.f32.mrf.mxu0  ;;  %v1677_v15 = vpop.f32.mrf.mxu1 }
 0x3ad   : > { %v1764_v18 = vmul.f32 0.35355338, %v1677_v15  ;;  %v1773_v26 = vadd.f32 %v4925_v21, %v1763_v17 }
 0x3ae   : > { %v1640_v19 = vpop.f32.mrf.mxu0  ;;  %v5317_v20 = vpop.f32.mrf.mxu1 }
 0x3af   : > { %v1774_v22 = vadd.f32 %v4925_v21, %v1764_v18  ;;  %v1778_v35 = vsel %vm1777_vm3, %v1773_v26, -inf  ;;  %v1602_v19 = vpack.c.bf16 %v6798_v62, %v6798_v62 }
 0x3b0   : > { %v5312_v23 = vpop.f32.mrf.mxu0  ;;  %v1680_v24 = vpop.f32.mrf.mxu1 }
 0x3b1   : > { %v1781_v25 = vsel %vm1777_vm3, %v1774_v22, -inf  ;;  %v1601_v24 = vpack.c.bf16 %v6796_v57, %v6796_v57  ;;  %v5765_v57 = vld [vmem:[#allocation13 + $0xb8] sm:$0xff]  }
 0x3b2   : > { %1782 = vmax.xlane.f32.xlu1 %v1781_v25  ;;  %v5318_v27 = vpop.f32.mrf.mxu1  ;;  %v1717_v28 = vpop.f32.mrf.mxu0  ;;  %v1969_v25 = vsel %vm1829_vm2, %v1602_v19, 0 }
 0x3b3   : > { %v1765_v30 = vmul.f32 0.35355338, %v1717_v28  ;;  %v5758_v28 = vld [vmem:[#allocation13 + $0x78] sm:$0xff]  }
 0x3b4   : > { %v5323_v31 = vpop.f32.mrf.mxu0  ;;  %v1757_v32 = vpop.f32.mrf.mxu1 }
 0x3b5   : > { %v1766_v33 = vmul.f32 0.35355338, %v1757_v32  ;;  %v1775_v36 = vadd.f32 %v4925_v21, %v1765_v30  ;;  %v1923_v31 = vsel %vm1829_vm2, %v1601_v24, 0 }
 0x3b6   : > { %v5329_v37 = vpop.f32.mrf.mxu1  ;;  %1779 = vmax.xlane.f32.xlu1 %v1778_v35  ;;  %v1720_v38 = vpop.f32.mrf.mxu0 }
 0x3b7   : > { %v1776_v39 = vadd.f32 %v4925_v21, %v1766_v33  ;;  %v1784_v43 = vsel %vm1777_vm3, %v1775_v36, -inf  ;;  %v5759_v37 = vld [vmem:[#allocation13 + $0x38] sm:$0xff]   ;;  %v5769_v38 = vld [vmem:[#allocation13 + $0xb0] sm:$0xff]  }
 0x3b8   : > { %v5324_v40 = vpop.f32.mrf.mxu0  ;;  %v1760_v41 = vpop.f32.mrf.mxu1 }
 0x3b9   : > { %v1787_v42 = vsel %vm1777_vm3, %v1776_v39, -inf  ;;  %v5760_v40 = vld [vmem:[#allocation13 + $0x70] sm:$0xff]   ;;  %v5771_v41 = vld [vmem:[#allocation13 + $0xe8] sm:$0xff]  }
 0x3ba   : > { %1788 = vmax.xlane.f32.xlu0 %v1787_v42  ;;  %v5330_v45 = vpop.f32.mrf.mxu1  ;;  %1785 = vmax.xlane.f32.xlu1 %v1784_v43  ;;  %v5761_v42 = vld [vmem:[#allocation13 + $0x30] sm:$0xff]   ;;  %v5773_v43 = vld [vmem:[#allocation13 + $0xa8] sm:$0xff]  }
 0x3bb   : > { %v5762_v45 = vld [vmem:[#allocation13 + $0x68] sm:$0xff]  }
 0x43b   : > { %v1783_v46 = vpop.xlane.xlu1 %1782 }
 0x43c   : > { %v1791_v47 = vsub.f32 %v1774_v22, %v1783_v46  ;;  %v5763_v22 = vld [vmem:[#allocation13 + $0xf8] sm:$0xff]   ;;  %v5775_v46 = vld [vmem:[#allocation13 + $0xe0] sm:$0xff]  }
 0x43e   : > { %v1796_v48 = vmul.f32 1.442695, %v1791_v47  ;;  %v5764_v47 = vld [vmem:[#allocation13 + $0x28] sm:$0xff]  }
 0x43f   : > { %v1780_v49 = vpop.xlane.xlu1 %1779 }
 0x440   : > { %6000 = vpow2.f32 %v1796_v48  ;;  %v1790_v50 = vsub.f32 %v1773_v26, %v1780_v49  ;;  %v5777_v48 = vld [vmem:[#allocation13 + $0xa0] sm:$0xff]  }
 0x441   : > { %v5766_v49 = vld [vmem:[#allocation13 + $0x60] sm:$0xff]  }
 0x442   : > { %v1794_v51 = vmul.f32 1.442695, %v1790_v50  ;;  %v5779_v50 = vld [vmem:[#allocation13 + $0xd8] sm:$0xff]  }
 0x443   : > { %v1789_v52 = vpop.xlane.xlu0 %1788  ;;  %v1786_v54 = vpop.xlane.xlu1 %1785 }
 0x444   : > { %6002 = vpow2.f32 %v1794_v51  ;;  %v1793_v55 = vsub.f32 %v1776_v39, %v1789_v52  ;;  %v1792_v58 = vsub.f32 %v1775_v36, %v1786_v54  ;;  %v5767_v36 = vld [vmem:[#allocation13 + $0xf0] sm:$0xff]   ;;  %v5768_v51 = vld [vmem:[#allocation13 + $0x20] sm:$0xff]   ;;  %v5770_v52 = vld [vmem:[#allocation13 + $0x58] sm:$0xff]  }
 0x445   : > { %v5772_v54 = vld [vmem:[#allocation13 + $0x18] sm:$0xff]  }
 0x446   : > { %v1800_v59 = vmul.f32 1.442695, %v1793_v55  ;;  %v1798_v60 = vmul.f32 1.442695, %v1792_v58  ;;  %v5774_v55 = vld [vmem:[#allocation13 + $0x50] sm:$0xff]  }
 0x447   : > { %v5776_v58 = vld [vmem:[#allocation13 + $0x10] sm:$0xff]  }
 0x448   : > { %6004 = vpow2.f32 %v1800_v59  ;;  %v5778_v59 = vld [vmem:[#allocation13 + $0x48] sm:$0xff]  }
 0x449   : > { %6006 = vpow2.f32 %v1798_v60  ;;  %v5780_v60 = vld [vmem:[#allocation13 + $0x8] sm:$0xff]  }
 0x44d   : > { %v6001_v61 = vpop.eup %6000 }
 0x44e   : > { %v1805_v63 = vsel %vm1777_vm3, %v6001_v61, 0.0 }
 0x44f   : > { %1806 = vadd.xlane.f32.xlu0 %v1805_v63  ;;  %v5782_v63 = vld [vmem:[#allocation13 + $0x40] sm:$0xff]  }
 0x451   : > { %v6003_v0 = vpop.eup %6002 }
 0x452   : > { %v1802_v1 = vsel %vm1777_vm3, %v6003_v0, 0.0 }
 0x453   : > { %1803 = vadd.xlane.f32.xlu1 %v1802_v1  ;;  %v5784_v1 = vld [vmem:[#allocation13] sm:$0xff]  }
 0x455   : > { %v6005_v2 = vpop.eup %6004 }
 0x456   : > { %v6007_v5 = vpop.eup %6006  ;;  %v1811_v6 = vsel %vm1777_vm3, %v6005_v2, 0.0 }
 0x457   : > { %1812 = vadd.xlane.f32.xlu0 %v1811_v6  ;;  %v1808_v10 = vsel %vm1777_vm3, %v6007_v5, 0.0  ;;  %v5787_v6 = vld [vmem:[#allocation13 + $0x88] sm:$0xff]  }
 0x458   : > { %1809 = vadd.xlane.f32.xlu1 %v1808_v10  ;;  %v5788_v10 = vld [vmem:[#allocation13 + $0xc0] sm:$0xff]  }
 0x4d8   : > { %v1807_v9 = vpop.xlane.xlu0 %1806 }
 0x4d9   : > { %6008 = vrcp.f32 %v1807_v9  ;;  %v5789_v9 = vld [vmem:[#allocation13 + $0x80] sm:$0xff]  }
 0x4dc   : > { %v1804_v12 = vpop.xlane.xlu1 %1803 }
 0x4dd   : > { %6010 = vrcp.f32 %v1804_v12 }
 0x4e0   : > { %v1813_v15 = vpop.xlane.xlu0 %1812 }
 0x4e1   : > { %6012 = vrcp.f32 %v1813_v15  ;;  %v1810_v17 = vpop.xlane.xlu1 %1809 }
 0x4e2   : > { %6014 = vrcp.f32 %v1810_v17 }
 0x4e6   : > { %v6009_v18 = vpop.eup %6008 }
 0x4e7   : > { %v1819_v20 = vmul.f32 %v6009_v18, %v6001_v61  ;;  %v5781_v61 = vld [vmem:[#allocation13 + $0x98] sm:$0xff]  }
 0x4e9   : > { %v1823_v21 = vpack.c.bf16 %v1819_v20, %v1819_v20 }
 0x4ea   : > { %v6011_v23 = vpop.eup %6010 }
 0x4eb   : > { %5340 = vmatmul.mubr.msk.bf16.vlgmr.msra.gmra.mxu1 %vm1777_vm3, %v1823_v21  ;;  %v1818_v26 = vmul.f32 %v6011_v23, %v6003_v0  ;;  %v5783_v0 = vld [vmem:[#allocation13 + $0xd0] sm:$0xff]  }
 0x4ec   : > { %5350 = vmatpush3.bf16.msra.mxu1 %v1969_v25  ;;  %5351 = vmatprep.mubr.msk.bf16.mxu1 %vm6390_vm1, %v6388_v13 }
 0x4ed   : > { %v1822_v27 = vpack.c.bf16 %v1818_v26, %v1818_v26  ;;  %5189 = vmatprep.subr.bf16.mxu1 %v5763_v22 }
 0x4ee   : > { %v6013_v62 = vpop.eup %6012 }
 0x4ef   : > { %v6015_v30 = vpop.eup %6014  ;;  %5334 = vmatmul.mubr.msk.bf16.vlgmr.msra.gmra.mxu0 %vm1777_vm3, %v1822_v27  ;;  %v1821_v32 = vmul.f32 %v6013_v62, %v6005_v2  ;;  %v5785_v2 = vld [vmem:[#allocation13 + $0x90] sm:$0xff]  }
 0x4f0   : > { %5344 = vmatpush3.bf16.msra.mxu0 %v1923_v31  ;;  %5345 = vmatprep.mubr.msk.bf16.mxu0 %vm6390_vm1, %v6388_v13  ;;  %v1820_v35 = vmul.f32 %v6015_v30, %v6007_v5  ;;  %v5786_v5 = vld [vmem:[#allocation13 + $0xc8] sm:$0xff]  }
 0x4f1   : > { %v1825_v33 = vpack.c.bf16 %v1821_v32, %v1821_v32  ;;  %5167 = vmatprep.subr.bf16.mxu0 %v5758_v28 }
 0x4f2   : > { %v1824_v39 = vpack.c.bf16 %v1820_v35, %v1820_v35 }
 0x4f3   : > { %5352 = vmatmul.mubr.msk.bf16.vlgmr.msra.gmra.mxu1 %vm1777_vm3, %v1825_v33 }
 0x4f4   : > { %5190 = vmatpush3.bf16.msra.mxu1 %v5765_v57 }
 0x4f5   : > { %5191 = vmatprep.subr.bf16.mxu1 %v5767_v36 }
 0x4f7   : > { %5346 = vmatmul.mubr.msk.bf16.vlgmr.msra.gmra.mxu0 %vm1777_vm3, %v1824_v39 }
 0x4f8   : > { %5168 = vmatpush3.bf16.msra.mxu0 %v5759_v37  ;;  %5192 = vmatpush3.bf16.msra.mxu1 %v5769_v38 }
 0x4f9   : > { %5169 = vmatprep.subr.bf16.mxu0 %v5760_v40  ;;  %5193 = vmatprep.subr.bf16.mxu1 %v5771_v41  ;;  %v4930_v40 = vld [vmem:[%s7054_s7] ss:$0 sm:$0xff] }
 0x4fc   : > { %5170 = vmatpush3.bf16.msra.mxu0 %v5761_v42  ;;  %5194 = vmatpush3.bf16.msra.mxu1 %v5773_v43 }
 0x4fd   : > { %5171 = vmatprep.subr.bf16.mxu0 %v5762_v45  ;;  %5195 = vmatprep.subr.bf16.mxu1 %v5775_v46 }
 0x500   : > { %5172 = vmatpush3.bf16.msra.mxu0 %v5764_v47  ;;  %5196 = vmatpush3.bf16.msra.mxu1 %v5777_v48 }
 0x501   : > { %5173 = vmatprep.subr.bf16.mxu0 %v5766_v49  ;;  %5197 = vmatprep.subr.bf16.mxu1 %v5779_v50  ;;  %v5790_v50 = vld [vmem:[#allocation14 + $0x38] sm:$0xff]  }
 0x504   : > { %5174 = vmatpush3.bf16.msra.mxu0 %v5768_v51  ;;  %5198 = vmatpush3.bf16.msra.mxu1 %v5781_v61  ;;  %v5791_v51 = vld [vmem:[#allocation14 + $0x30] sm:$0xff]   ;;  %v5793_v61 = vld [vmem:[#allocation14 + $0x20] sm:$0xff]  }
 0x505   : > { %5175 = vmatprep.subr.bf16.mxu0 %v5770_v52  ;;  %5199 = vmatprep.subr.bf16.mxu1 %v5783_v0  ;;  %v5796_v0 = vld [vmem:[#allocation14 + $0x8] sm:$0xff]  }
 0x508   : > { %5176 = vmatpush3.bf16.msra.mxu0 %v5772_v54  ;;  %5200 = vmatpush3.bf16.msra.mxu1 %v5785_v2 }
 0x509   : > { %5177 = vmatprep.subr.bf16.mxu0 %v5774_v55  ;;  %5201 = vmatprep.subr.bf16.mxu1 %v5786_v5 }
 0x50c   : > { %5178 = vmatpush3.bf16.msra.mxu0 %v5776_v58  ;;  %5202 = vmatpush3.bf16.msra.mxu1 %v5787_v6 }
 0x50d   : > { %5179 = vmatprep.subr.bf16.mxu0 %v5778_v59  ;;  %5203 = vmatprep.subr.bf16.mxu1 %v5788_v10 }
 0x510   : > { %5180 = vmatpush3.bf16.msra.mxu0 %v5780_v60  ;;  %5204 = vmatpush3.bf16.msra.mxu1 %v5789_v9  ;;  %v5792_v60 = vld [vmem:[#allocation14 + $0x28] sm:$0xff]   ;;  %v4963_v9 = vld [vmem:[%s7055_s8] ss:$0 sm:$0xff] }
 0x511   : > { %5181 = vmatprep.subr.bf16.mxu0 %v5782_v63  ;;  %5375 = vmatprep.subr.bf16.mxu1 %v6388_v13  ;;  %v5795_v63 = vld [vmem:[#allocation14 + $0x10] sm:$0xff]  }
 0x514   : > { %5182 = vmatpush3.bf16.msra.mxu0 %v5784_v1  ;;  %v5797_v1 = vld [vmem:[#allocation14] sm:$0xff]  }
 0x515   : > { %5355 = vmatprep.subr.bf16.mxu0 %v6388_v13 }
 0x5ab   : > { %v1913_v12 = vpop.f32.mrf.mxu1 }
 0x5ac   : > { %v2012_v15 = vpack.c.bf16 %v1913_v12, %v1913_v12 }
 0x5ad   : > { %v5341_v17 = vpop.f32.mrf.mxu1 }
 0x5ae   : > { %2310 = vmatprep.mubr.bf16.mxu0 %v2012_v15  ;;  %v4964_v15 = vld [vmem:[%s7056_s9] ss:$0 sm:$0xff] }
 0x5af   : > { %v1867_v18 = vpop.f32.mrf.mxu0  ;;  %v1916_v19 = vpop.f32.mrf.mxu1 }
 0x5b0   : > { %v2011_v20 = vpack.c.bf16 %v1867_v18, %v1867_v18 }
 0x5b1   : > { %v5335_v21 = vpop.f32.mrf.mxu0  ;;  %v5342_v22 = vpop.f32.mrf.mxu1 }
 0x5b2   : > { %2311 = vmatmul.mubr.bf16.vlgmr.msra.gmra.mxu0 %v2011_v20  ;;  %v5798_v20 = vld [vmem:[#allocation16 + $0x38] sm:$0xff]   ;;  %v5799_v21 = vld [vmem:[#allocation16 + $0x30] sm:$0xff]   ;;  %v5800_v22 = vld [vmem:[#allocation16 + $0x28] sm:$0xff]  }
 0x5b3   : > { %v1870_v23 = vpop.f32.mrf.mxu0  ;;  %v2005_v24 = vpop.f32.mrf.mxu1  ;;  %5371 = vmatprep.mubr.msk.bf16.mxu0 %vm6390_vm1, %v6388_v13  ;;  %5356 = vmatpush3.bf16.msra.mxu0 %v5790_v50 }
 0x5b4   : > { %v2014_v25 = vpack.c.bf16 %v2005_v24, %v2005_v24  ;;  %5357 = vmatprep.subr.bf16.mxu0 %v6388_v13  ;;  %v5801_v23 = vld [vmem:[#allocation16 + $0x20] sm:$0xff]   ;;  %v5802_v24 = vld [vmem:[#allocation16 + $0x18] sm:$0xff]  }
 0x5b5   : > { %v5336_v26 = vpop.f32.mrf.mxu0  ;;  %v5353_v27 = vpop.f32.mrf.mxu1 }
 0x5b6   : > { %2350 = vmatprep.mubr.bf16.mxu1 %v2014_v25  ;;  %v5803_v25 = vld [vmem:[#allocation16 + $0x10] sm:$0xff]   ;;  %v5804_v26 = vld [vmem:[#allocation16 + $0x8] sm:$0xff]   ;;  %v5805_v27 = vld [vmem:[#allocation16] sm:$0xff]  }
 0x5b7   : > { %v1959_v28 = vpop.f32.mrf.mxu0  ;;  %v2008_v62 = vpop.f32.mrf.mxu1  ;;  %5358 = vmatpush3.bf16.msra.mxu0 %v5791_v51 }
 0x5b8   : > { %v2013_v30 = vpack.c.bf16 %v1959_v28, %v1959_v28  ;;  %5359 = vmatprep.subr.bf16.mxu0 %v6388_v13  ;;  %v4965_v28 = vld [vmem:[%s7058_s11] ss:$0 sm:$0xff] }
 0x5b9   : > { %v5347_v31 = vpop.f32.mrf.mxu0  ;;  %v5354_v32 = vpop.f32.mrf.mxu1 }
 0x5ba   : > { %2351 = vmatmul.mubr.bf16.vlgmr.msra.gmra.mxu1 %v2013_v30 }
 0x5bb   : > { %v1962_v57 = vpop.f32.mrf.mxu0  ;;  %5391 = vmatprep.mubr.msk.bf16.mxu1 %vm6390_vm1, %v6388_v13  ;;  %5360 = vmatpush3.bf16.msra.mxu0 %v5792_v60 }
 0x5bc   : > { %5361 = vmatprep.subr.bf16.mxu0 %v6388_v13  ;;  %5376 = vmatpush3.bf16.msra.mxu1 %v5798_v20  ;;  %v5814_v20 = vld [vmem:[#allocation10 + $0x544] ss:$48 sps:$4 sm:$0xff]  }
 0x5bd   : > { %v5348_v33 = vpop.f32.mrf.mxu0  ;;  %5377 = vmatprep.subr.bf16.mxu1 %v6388_v13 }
 0x5bf   : > { %5362 = vmatpush3.bf16.msra.mxu0 %v5793_v61 }
 0x5c0   : > { %5363 = vmatprep.subr.bf16.mxu0 %v6388_v13  ;;  %5378 = vmatpush3.bf16.msra.mxu1 %v5799_v21  ;;  %v5817_v21 = vld [vmem:[#allocation10 + $0x54c] ss:$48 sps:$4 sm:$0xff]  }
 0x5c1   : > { %5379 = vmatprep.subr.bf16.mxu1 %v6388_v13 }
 0x5c4   : > { %5380 = vmatpush3.bf16.msra.mxu1 %v5800_v22  ;;  %v5812_v22 = vld [vmem:[#allocation10 + $0x540] ss:$48 sps:$4 sm:$0xff]  }
 0x5c5   : > { %5381 = vmatprep.subr.bf16.mxu1 %v6388_v13 }
 0x5c8   : > { %5382 = vmatpush3.bf16.msra.mxu1 %v5801_v23  ;;  %v5815_v23 = vld [vmem:[#allocation10 + $0x548] ss:$48 sps:$4 sm:$0xff]  }
 0x5c9   : > { %5383 = vmatprep.subr.bf16.mxu1 %v6388_v13 }
 0x5cc   : > { %5384 = vmatpush3.bf16.msra.mxu1 %v5802_v24 }
 0x5cd   : > { %5385 = vmatprep.subr.bf16.mxu1 %v6388_v13 }
 0x5d0   : > { %5386 = vmatpush3.bf16.msra.mxu1 %v5803_v25 }
 0x5d1   : > { %5387 = vmatprep.subr.bf16.mxu1 %v6388_v13 }
 0x5d4   : > { %5388 = vmatpush3.bf16.msra.mxu1 %v5804_v26 }
 0x5d5   : > { %5389 = vmatprep.subr.bf16.mxu1 %v6388_v13 }
 0x5d8   : > { %5390 = vmatpush3.bf16.msra.mxu1 %v5805_v27 }
 0x672   : > { %v5183_v35 = vpop.f32.mrf.mxu0 }
 0x674   : > { %v5184_v36 = vpop.f32.mrf.mxu0 }
 0x675   : > { %v5185_v39 = vadd.f32 %v5184_v36, %v5183_v35 }
 0x676   : > { %v5186_v37 = vpop.f32.mrf.mxu0 }
 0x677   : > { %v2313_v43 = vadd.f32 %v5185_v39, %v4930_v40 }
 0x678   : > { %v5187_v38 = vpop.f32.mrf.mxu0 }
 0x67a   : > { %v5205_v41 = vpop.f32.mrf.mxu1 }
 0x67c   : > { %v5206_v42 = vpop.f32.mrf.mxu1 }
 0x67d   : > { %v5207_v45 = vadd.f32 %v5206_v42, %v5205_v41 }
 0x67e   : > { %v5208_v46 = vpop.f32.mrf.mxu1 }
 0x67f   : > { %v2353_v47 = vadd.f32 %v5207_v45, %v2313_v43 }
 0x680   : > { %v5209_v48 = vpop.f32.mrf.mxu1 }
 0x681   : > { %v2358_v49 = vadd.f32 %v2353_v47, %v6727_v53  ;;  %v5794_v53 = vld [vmem:[#allocation14 + $0x18] sm:$0xff]  }
 0x682   : > { %5364 = vmatpush3.bf16.msra.mxu0 %v5794_v53 }
 0x683   : > { %2361 = vadd.xlane.f32.xlu0 %v2358_v49  ;;  %5365 = vmatprep.subr.bf16.mxu0 %v6388_v13 }
 0x686   : > { %5366 = vmatpush3.bf16.msra.mxu0 %v5795_v63 }
 0x687   : > { %5367 = vmatprep.subr.bf16.mxu0 %v6388_v13 }
 0x68a   : > { %5368 = vmatpush3.bf16.msra.mxu0 %v5796_v0  ;;  %v4974_v0 = vld [vmem:[%s7060_s13] ss:$0 sm:$0xff] }
 0x68b   : > { %5369 = vmatprep.subr.bf16.mxu0 %v6388_v13 }
 0x68e   : > { %5370 = vmatpush3.bf16.msra.mxu0 %v5797_v1 }
 0x70c   : > { %v2362_v52 = vpop.xlane.xlu0 %2361 }
 0x70d   : > { %v2363_v54 = vmul.f32 0.03125, %v2362_v52 }
 0x70f   : > { %v2364_v55 = vsub.f32 %v2358_v49, %v2363_v54 }
 0x711   : > { %v2365_v58 = vmul.f32 %v6718_v14, %v2364_v55 }
 0x713   : > { %v2366_v59 = vmul.f32 %v2365_v58, %v2365_v58 }
 0x715   : > { %2367 = vadd.xlane.f32.xlu1 %v2366_v59 }
 0x79e   : > { %v2368_v2 = vpop.xlane.xlu1 %2367 }
 0x79f   : > { %v2369_v5 = vmul.f32 0.03125, %v2368_v2 }
 0x7a1   : > { %v2370_v6 = vadd.f32 1e-12, %v2369_v5 }
 0x7a3   : > { %6016 = vrsqrt.f32 %v2370_v6 }
 0x7b0   : > { %v6017_v10 = vpop.eup %6016 }
 0x7b1   : > { %v2372_v12 = vmul.f32 %v6017_v10, %v2364_v55 }
 0x7b3   : > { %v2379_v17 = vmul.f32 %v4963_v9, %v2372_v12  ;;  %v5806_v12 = vld [vmem:[#allocation10 + $0x5a0] ss:$48 sps:$4 sm:$0xff]  }
 0x7b5   : > { %v6852_v18 = vadd.f32 %v4964_v15, %v2379_v17  ;;  %v5808_v15 = vld [vmem:[#allocation10 + $0x5a4] ss:$48 sps:$4 sm:$0xff]   ;;  %v5809_v17 = vld [vmem:[#allocation10 + $0x5a8] ss:$48 sps:$4 sm:$0xff]  }
 0x7b6   : > { %3309 = vmatprep.subr.bf16.mxu0 %v5808_v15  ;;  %v5860_v15 = vld [vmem:[#allocation10 + $0x550] ss:$48 sps:$4 sm:$0xff]  }
 0x7b7   : > { %v2387_v19 = vpack.c.bf16 %v6852_v18, %v6852_v18 }
 0x7b9   : > { %5372 = vmatmul.mubr.bf16.vlgmr.msra.gmra.mxu0 %v2387_v19  ;;  %v5811_v19 = vld [vmem:[#allocation10 + $0x5ac] ss:$48 sps:$4 sm:$0xff]  }
 0x7ba   : > { %3341 = vmatprep.mubr.bf16.mxu0 %v6389_v44  ;;  %3350 = vmatprep.subr.bf16.mxu1 %v5811_v19  ;;  %v5868_v19 = vld [vmem:[#allocation10 + $0x4f4] ss:$48 sps:$4 sm:$0xff]  }
 0x7bb   : > { %3310 = vmatpush1.bf16.msra.mxu0 %v5806_v12  ;;  %v5865_v12 = vld [vmem:[#allocation10 + $0x55c] ss:$48 sps:$4 sm:$0xff]  }
 0x7bc   : > { %3311 = vmatprep.subr.bf16.mxu0 %v5814_v20  ;;  %v5871_v20 = vld [vmem:[#allocation10 + $0x4fc] ss:$48 sps:$4 sm:$0xff]  }
 0x7bf   : > { %3312 = vmatpush1.bf16.msra.mxu0 %v5812_v22  ;;  %v5869_v22 = vld [vmem:[#allocation10 + $0x4f8] ss:$48 sps:$4 sm:$0xff]  }
 0x879   : > { %v2493_v62 = vpop.f32.mrf.mxu0 }
 0x87a   : > { %v2494_v30 = vadd.f32 %v4965_v28, %v2493_v62  ;;  %v5820_v28 = vld [vmem:[#allocation10 + $0x4e4] ss:$48 sps:$4 sm:$0xff]   ;;  %v5823_v62 = vld [vmem:[#allocation10 + $0x4ec] ss:$48 sps:$4 sm:$0xff]  }
 0x87b   : > { %v5373_v31 = vpop.f32.mrf.mxu0  ;;  %3313 = vmatprep.subr.bf16.mxu0 %v5820_v28  ;;  %v5878_v28 = vld [vmem:[#allocation10 + $0x430] ss:$48 sps:$4 sm:$0xff]  }
 0x87c   : > { %v2500_v32 = vmul.f32 0.70710677, %v2494_v30  ;;  %v2499_v60 = vmul.f32 0.5, %v2494_v30  ;;  %v5818_v30 = vld [vmem:[#allocation10 + $0x4e0] ss:$48 sps:$4 sm:$0xff]  }
 0x87d   : > { %v2496_v57 = vpop.f32.mrf.mxu0  ;;  %v5821_v31 = vld [vmem:[#allocation10 + $0x4e8] ss:$48 sps:$4 sm:$0xff]   ;;  %3314 = vmatpush1.bf16.msra.mxu0 %v5818_v30  ;;  %v5886_v30 = vld [vmem:[#allocation10 + $0x3d4] ss:$48 sps:$4 sm:$0xff]  }
 0x87e   : > { %v2501_v33 = vand.u32 2147483647, %v2500_v32  ;;  %vm2520_vm4 = vcmp.ge.f32.partialorder %v2500_v32, 0.0  ;;  %v5826_v32 = vld [vmem:[#allocation10 + $0x484] ss:$48 sps:$4 sm:$0xff]  }
 0x87f   : > { %v5374_v35 = vpop.f32.mrf.mxu0  ;;  %v5829_v57 = vld [vmem:[#allocation10 + $0x48c] ss:$48 sps:$4 sm:$0xff]   ;;  %3315 = vmatprep.subr.bf16.mxu0 %v5826_v32  ;;  %v5884_v32 = vld [vmem:[#allocation10 + $0x3d0] ss:$48 sps:$4 sm:$0xff]  }
 0x880   : > { %v2502_v36 = vmul.f32 0.3275911, %v2501_v33  ;;  %v2514_v38 = vsub.f32 0.0, %v2501_v33  ;;  %v5827_v35 = vld [vmem:[#allocation10 + $0x488] ss:$48 sps:$4 sm:$0xff]  }
 0x882   : > { %v2503_v37 = vadd.f32 1.0, %v2502_v36  ;;  %v2515_v39 = vmul.f32 %v2514_v38, %v2501_v33  ;;  %v5824_v33 = vld [vmem:[#allocation10 + $0x480] ss:$48 sps:$4 sm:$0xff]   ;;  %v5832_v36 = vld [vmem:[#allocation10 + $0x424] ss:$48 sps:$4 sm:$0xff]  }
 0x883   : > { %3316 = vmatpush1.bf16.msra.mxu0 %v5824_v33  ;;  %v5830_v38 = vld [vmem:[#allocation10 + $0x420] ss:$48 sps:$4 sm:$0xff]   ;;  %v5892_v33 = vld [vmem:[#allocation10 + $0x374] ss:$48 sps:$4 sm:$0xff]  }
 0x884   : > { %6018 = vrcp.f32 %v2503_v37  ;;  %v2516_v42 = vmul.f32 1.442695, %v2515_v39  ;;  %v5835_v37 = vld [vmem:[#allocation10 + $0x42c] ss:$48 sps:$4 sm:$0xff]   ;;  %v5833_v39 = vld [vmem:[#allocation10 + $0x428] ss:$48 sps:$4 sm:$0xff]   ;;  %3317 = vmatprep.subr.bf16.mxu0 %v5832_v36 }
 0x885   : > { %v5890_v36 = vld [vmem:[#allocation10 + $0x370] ss:$48 sps:$4 sm:$0xff]  }
 0x886   : > { %6020 = vpow2.f32 %v2516_v42  ;;  %v5836_v42 = vld [vmem:[#allocation10 + $0x3c0] ss:$48 sps:$4 sm:$0xff]  }
 0x887   : > { %3318 = vmatpush1.bf16.msra.mxu0 %v5830_v38  ;;  %v5898_v38 = vld [vmem:[#allocation10 + $0x314] ss:$48 sps:$4 sm:$0xff]  }
 0x891   : > { %v6019_v40 = vpop.eup %6018 }
 0x892   : > { %v2505_v41 = vmul.f32 1.0614054, %v6019_v40 }
 0x893   : > { %v6021_v52 = vpop.eup %6020 }
 0x894   : > { %v2506_v43 = vadd.f32 -1.4531521, %v2505_v41  ;;  %v5841_v41 = vld [vmem:[#allocation10 + $0x3cc] ss:$48 sps:$4 sm:$0xff]  }
 0x896   : > { %v2507_v45 = vmul.f32 %v6019_v40, %v2506_v43  ;;  %v5839_v43 = vld [vmem:[#allocation10 + $0x3c8] ss:$48 sps:$4 sm:$0xff]  }
 0x898   : > { %v2508_v46 = vadd.f32 1.4214138, %v2507_v45  ;;  %v5844_v45 = vld [vmem:[#allocation10 + $0x364] ss:$48 sps:$4 sm:$0xff]  }
 0x89a   : > { %v2509_v47 = vmul.f32 %v6019_v40, %v2508_v46  ;;  %v5847_v46 = vld [vmem:[#allocation10 + $0x36c] ss:$48 sps:$4 sm:$0xff]  }
 0x89c   : > { %v2510_v48 = vadd.f32 -0.28449672, %v2509_v47  ;;  %v5842_v47 = vld [vmem:[#allocation10 + $0x360] ss:$48 sps:$4 sm:$0xff]  }
 0x89e   : > { %v2511_v49 = vmul.f32 %v6019_v40, %v2510_v48  ;;  %v5845_v48 = vld [vmem:[#allocation10 + $0x368] ss:$48 sps:$4 sm:$0xff]  }
 0x8a0   : > { %v2512_v50 = vadd.f32 0.2548296, %v2511_v49  ;;  %v5848_v49 = vld [vmem:[#allocation10 + $0x300] ss:$48 sps:$4 sm:$0xff]  }
 0x8a2   : > { %v2513_v51 = vmul.f32 %v6019_v40, %v2512_v50  ;;  %v5838_v40 = vld [vmem:[#allocation10 + $0x3c4] ss:$48 sps:$4 sm:$0xff]  }
 0x8a3   : > { %3319 = vmatprep.subr.bf16.mxu0 %v5838_v40  ;;  %v5850_v50 = vld [vmem:[#allocation10 + $0x304] ss:$48 sps:$4 sm:$0xff]   ;;  %v5896_v40 = vld [vmem:[#allocation10 + $0x310] ss:$48 sps:$4 sm:$0xff]  }
 0x8a4   : > { %v2518_v54 = vmul.f32 %v6021_v52, %v2513_v51  ;;  %3320 = vmatpush1.bf16.msra.mxu0 %v5836_v42  ;;  %v5851_v51 = vld [vmem:[#allocation10 + $0x308] ss:$48 sps:$4 sm:$0xff]   ;;  %v5853_v52 = vld [vmem:[#allocation10 + $0x30c] ss:$48 sps:$4 sm:$0xff]   ;;  %v5904_v42 = vld [vmem:[#allocation10 + $0x5c4] ss:$48 sps:$4 sm:$0xff]  }
 0x8a5   : > { %3321 = vmatprep.subr.bf16.mxu0 %v5844_v45  ;;  %v5902_v45 = vld [vmem:[#allocation10 + $0x5c0] ss:$48 sps:$4 sm:$0xff]  }
 0x8a6   : > { %v2519_v55 = vsub.f32 1.0, %v2518_v54  ;;  %v5856_v54 = vld [vmem:[#allocation10 + $0x5b4] ss:$48 sps:$4 sm:$0xff]  }
 0x8a8   : > { %v2521_v58 = vsub.f32 0.0, %v2519_v55  ;;  %3322 = vmatpush1.bf16.msra.mxu0 %v5842_v47  ;;  %v5910_v47 = vld [vmem:[#allocation10 + $0x564] ss:$48 sps:$4 sm:$0xff]  }
 0x8a9   : > { %3323 = vmatprep.subr.bf16.mxu0 %v5850_v50  ;;  %v5911_v50 = vld [vmem:[#allocation10 + $0x568] ss:$48 sps:$4 sm:$0xff]  }
 0x8aa   : > { %v2522_v59 = vsel %vm2520_vm4, %v2519_v55, %v2521_v58  ;;  %v5859_v55 = vld [vmem:[#allocation10 + $0x5bc] ss:$48 sps:$4 sm:$0xff]  }
 0x8ab   : > { %v2523_v61 = vadd.f32 1.0, %v2522_v59 }
 0x8ac   : > { %3324 = vmatpush1.bf16.msra.mxu0 %v5848_v49  ;;  %v5908_v49 = vld [vmem:[#allocation10 + $0x560] ss:$48 sps:$4 sm:$0xff]  }
 0x8ad   : > { %v2524_v53 = vmul.f32 %v2523_v61, %v2499_v60  ;;  %3391 = vmatprep.subr.bf16.mxu0 %v5856_v54  ;;  %v5914_v54 = vld [vmem:[#allocation10 + $0x500] ss:$48 sps:$4 sm:$0xff]  }
 0x8af   : > { %v2525_v63 = vpack.c.bf16 %v2524_v53, %v2524_v53  ;;  %v4983_v53 = vld [vmem:[%s7061_s14] ss:$0 sm:$0xff] }
 0x8b1   : > { %5392 = vmatmul.mubr.bf16.vlgmr.msra.gmra.mxu1 %v2525_v63 }
 0x8b2   : > { %3382 = vmatprep.mubr.bf16.mxu1 %v6389_v44  ;;  %3351 = vmatpush1.bf16.msra.mxu1 %v5809_v17  ;;  %v5863_v17 = vld [vmem:[#allocation10 + $0x558] ss:$48 sps:$4 sm:$0xff]  }
 0x8b3   : > { %3352 = vmatprep.subr.bf16.mxu1 %v5817_v21  ;;  %v5866_v21 = vld [vmem:[#allocation10 + $0x4f0] ss:$48 sps:$4 sm:$0xff]  }
 0x8b6   : > { %3353 = vmatpush1.bf16.msra.mxu1 %v5815_v23  ;;  %v5874_v23 = vld [vmem:[#allocation10 + $0x494] ss:$48 sps:$4 sm:$0xff]  }
 0x8b7   : > { %3354 = vmatprep.subr.bf16.mxu1 %v5823_v62  ;;  %v5881_v62 = vld [vmem:[#allocation10 + $0x438] ss:$48 sps:$4 sm:$0xff]  }
 0x8ba   : > { %3355 = vmatpush1.bf16.msra.mxu1 %v5821_v31  ;;  %v5889_v31 = vld [vmem:[#allocation10 + $0x3dc] ss:$48 sps:$4 sm:$0xff]  }
 0x8bb   : > { %3356 = vmatprep.subr.bf16.mxu1 %v5829_v57  ;;  %v5887_v57 = vld [vmem:[#allocation10 + $0x3d8] ss:$48 sps:$4 sm:$0xff]  }
 0x8be   : > { %3357 = vmatpush1.bf16.msra.mxu1 %v5827_v35  ;;  %v5895_v35 = vld [vmem:[#allocation10 + $0x37c] ss:$48 sps:$4 sm:$0xff]  }
 0x8bf   : > { %3358 = vmatprep.subr.bf16.mxu1 %v5835_v37  ;;  %v5893_v37 = vld [vmem:[#allocation10 + $0x378] ss:$48 sps:$4 sm:$0xff]  }
 0x8c2   : > { %3359 = vmatpush1.bf16.msra.mxu1 %v5833_v39  ;;  %v5901_v39 = vld [vmem:[#allocation10 + $0x31c] ss:$48 sps:$4 sm:$0xff]  }
 0x8c3   : > { %3360 = vmatprep.subr.bf16.mxu1 %v5841_v41  ;;  %v5899_v41 = vld [vmem:[#allocation10 + $0x318] ss:$48 sps:$4 sm:$0xff]  }
 0x8c6   : > { %3361 = vmatpush1.bf16.msra.mxu1 %v5839_v43  ;;  %v5907_v43 = vld [vmem:[#allocation10 + $0x5cc] ss:$48 sps:$4 sm:$0xff]  }
 0x8c7   : > { %3362 = vmatprep.subr.bf16.mxu1 %v5847_v46  ;;  %v5905_v46 = vld [vmem:[#allocation10 + $0x5c8] ss:$48 sps:$4 sm:$0xff]  }
 0x8ca   : > { %3363 = vmatpush1.bf16.msra.mxu1 %v5845_v48  ;;  %v5913_v48 = vld [vmem:[#allocation10 + $0x56c] ss:$48 sps:$4 sm:$0xff]  }
 0x8cb   : > { %3364 = vmatprep.subr.bf16.mxu1 %v5853_v52  ;;  %v5919_v52 = vld [vmem:[#allocation10 + $0x50c] ss:$48 sps:$4 sm:$0xff]  }
 0x8ce   : > { %3365 = vmatpush1.bf16.msra.mxu1 %v5851_v51  ;;  %v5916_v51 = vld [vmem:[#allocation10 + $0x504] ss:$48 sps:$4 sm:$0xff]  }
 0x8cf   : > { %3432 = vmatprep.subr.bf16.mxu1 %v5859_v55  ;;  %v5917_v55 = vld [vmem:[#allocation10 + $0x508] ss:$48 sps:$4 sm:$0xff]  }
 0x971   : > { %v2631_v1 = vpop.f32.mrf.mxu1 }
 0x972   : > { %v2632_v2 = vadd.f32 %v4974_v0, %v2631_v1  ;;  %v4984_v0 = vld [vmem:[%s7117_s23] ss:$0 sm:$0xff] }
 0x973   : > { %v5393_v5 = vpop.f32.mrf.mxu1 }
 0x974   : > { %v2637_v6 = vadd.f32 %v2632_v2, %v6852_v18  ;;  %v5854_v5 = vld [vmem:[#allocation10 + $0x5b0] ss:$48 sps:$4 sm:$0xff]  }
 0x975   : > { %v2634_v10 = vpop.f32.mrf.mxu1 }
 0x976   : > { %2640 = vadd.xlane.f32.xlu0 %v2637_v6 }
 0x977   : > { %v5394_v9 = vpop.f32.mrf.mxu1 }
 0x978   : > { %v5862_v9 = vld [vmem:[#allocation10 + $0x554] ss:$48 sps:$4 sm:$0xff]  }
 0x9ff   : > { %v2641_v18 = vpop.xlane.xlu0 %2640 }
 0xa00   : > { %v2642_v24 = vmul.f32 0.03125, %v2641_v18  ;;  %v5877_v18 = vld [vmem:[#allocation10 + $0x49c] ss:$48 sps:$4 sm:$0xff]  }
 0xa02   : > { %v2643_v25 = vsub.f32 %v2637_v6, %v2642_v24  ;;  %v5857_v6 = vld [vmem:[#allocation10 + $0x5b8] ss:$48 sps:$4 sm:$0xff]   ;;  %v5872_v24 = vld [vmem:[#allocation10 + $0x490] ss:$48 sps:$4 sm:$0xff]  }
 0xa04   : > { %v2644_v26 = vmul.f32 %v6718_v14, %v2643_v25 }
 0xa06   : > { %v2645_v27 = vmul.f32 %v2644_v26, %v2644_v26  ;;  %v5880_v26 = vld [vmem:[#allocation10 + $0x434] ss:$48 sps:$4 sm:$0xff]  }
 0xa08   : > { %2646 = vadd.xlane.f32.xlu1 %v2645_v27  ;;  %v5883_v27 = vld [vmem:[#allocation10 + $0x43c] ss:$48 sps:$4 sm:$0xff]  }
 0xa91   : > { %v2647_v58 = vpop.xlane.xlu1 %2646 }
 0xa92   : > { %v2648_v59 = vmul.f32 0.03125, %v2647_v58  ;;  %v5922_v58 = vld [vmem:[#allocation10 + $0x4a4] ss:$48 sps:$4 sm:$0xff]  }
 0xa94   : > { %v2649_v60 = vadd.f32 1e-12, %v2648_v59  ;;  %v5925_v59 = vld [vmem:[#allocation10 + $0x4ac] ss:$48 sps:$4 sm:$0xff]  }
 0xa96   : > { %6022 = vrsqrt.f32 %v2649_v60  ;;  %v5920_v60 = vld [vmem:[#allocation10 + $0x4a0] ss:$48 sps:$4 sm:$0xff]  }
 0xaa3   : > { %v6023_v61 = vpop.eup %6022 }
 0xaa4   : > { %v2651_v63 = vmul.f32 %v6023_v61, %v2643_v25  ;;  %v5875_v25 = vld [vmem:[#allocation10 + $0x498] ss:$48 sps:$4 sm:$0xff]  }
 0xaa5   : > { %v5923_v61 = vld [vmem:[#allocation10 + $0x4a8] ss:$48 sps:$4 sm:$0xff]  }
 0xaa6   : > { %v2658_v1 = vmul.f32 %v4983_v53, %v2651_v63  ;;  %v5928_v53 = vld [vmem:[#allocation10 + $0x444] ss:$48 sps:$4 sm:$0xff]   ;;  %v5931_v63 = vld [vmem:[#allocation10 + $0x44c] ss:$48 sps:$4 sm:$0xff]  }
 0xaa8   : > { %v6879_v2 = vadd.f32 %v4984_v0, %v2658_v1  ;;  %v5926_v0 = vld [vmem:[#allocation10 + $0x440] ss:$48 sps:$4 sm:$0xff]   ;;  %v5934_v1 = vld [vmem:[#allocation10 + $0x3e4] ss:$48 sps:$4 sm:$0xff]  }
 0xaaa   : > { %v6883_v10 = vpack.c.bf16 %v6879_v2, %v6879_v2 }
 0xaac   : > { %3342 = vmatmul.mubr.bf16.vlgmr.msra.gmra.mxu0 %v6883_v10  ;;  %3383 = vmatmul.mubr.bf16.vlgmr.msra.gmra.mxu1 %v6883_v10 }
 0xaad   : > { %3392 = vmatpush1.bf16.msra.mxu0 %v5854_v5  ;;  %3433 = vmatpush1.bf16.msra.mxu1 %v5857_v6  ;;  %v5937_v5 = vld [vmem:[#allocation10 + $0x3ec] ss:$48 sps:$4 sm:$0xff]   ;;  %v5932_v6 = vld [vmem:[#allocation10 + $0x3e0] ss:$48 sps:$4 sm:$0xff]  }
 0xaae   : > { %3393 = vmatprep.subr.bf16.mxu0 %v5862_v9  ;;  %3434 = vmatprep.subr.bf16.mxu1 %v5865_v12  ;;  %v5935_v9 = vld [vmem:[#allocation10 + $0x3e8] ss:$48 sps:$4 sm:$0xff]   ;;  %v5940_v12 = vld [vmem:[#allocation10 + $0x384] ss:$48 sps:$4 sm:$0xff]  }
 0xaaf   : > { %3423 = vmatprep.mubr.bf16.mxu0 %v6389_v44  ;;  %3464 = vmatprep.mubr.bf16.mxu1 %v6389_v44 }
 0xab1   : > { %3394 = vmatpush1.bf16.msra.mxu0 %v5860_v15  ;;  %3435 = vmatpush1.bf16.msra.mxu1 %v5863_v17  ;;  %v5943_v15 = vld [vmem:[#allocation10 + $0x38c] ss:$48 sps:$4 sm:$0xff]   ;;  %v5938_v17 = vld [vmem:[#allocation10 + $0x380] ss:$48 sps:$4 sm:$0xff]  }
 0xab2   : > { %3395 = vmatprep.subr.bf16.mxu0 %v5868_v19  ;;  %3436 = vmatprep.subr.bf16.mxu1 %v5871_v20  ;;  %v5941_v19 = vld [vmem:[#allocation10 + $0x388] ss:$48 sps:$4 sm:$0xff]   ;;  %v5946_v20 = vld [vmem:[#allocation10 + $0x324] ss:$48 sps:$4 sm:$0xff]  }
 0xab5   : > { %3396 = vmatpush1.bf16.msra.mxu0 %v5866_v21  ;;  %3437 = vmatpush1.bf16.msra.mxu1 %v5869_v22  ;;  %v5949_v21 = vld [vmem:[#allocation10 + $0x32c] ss:$48 sps:$4 sm:$0xff]   ;;  %v5944_v22 = vld [vmem:[#allocation10 + $0x320] ss:$48 sps:$4 sm:$0xff]  }
 0xab6   : > { %3397 = vmatprep.subr.bf16.mxu0 %v5874_v23  ;;  %3438 = vmatprep.subr.bf16.mxu1 %v5877_v18  ;;  %v5947_v23 = vld [vmem:[#allocation10 + $0x328] ss:$48 sps:$4 sm:$0xff]  }
 0xab9   : > { %3398 = vmatpush1.bf16.msra.mxu0 %v5872_v24  ;;  %3439 = vmatpush1.bf16.msra.mxu1 %v5875_v25 }
 0xaba   : > { %3399 = vmatprep.subr.bf16.mxu0 %v5880_v26  ;;  %3440 = vmatprep.subr.bf16.mxu1 %v5883_v27 }
 0xabd   : > { %3400 = vmatpush1.bf16.msra.mxu0 %v5878_v28  ;;  %3441 = vmatpush1.bf16.msra.mxu1 %v5881_v62 }
 0xabe   : > { %3401 = vmatprep.subr.bf16.mxu0 %v5886_v30  ;;  %3442 = vmatprep.subr.bf16.mxu1 %v5889_v31  ;;  %v2765_v31 = vld [vmem:[#allocation11 + $0xc] sm:$0xff] }
 0xabf   : > { %v2784_v3 = vrot.slane %v2765_v31, %v6777_v34 }
 0xac1   : > { %3402 = vmatpush1.bf16.msra.mxu0 %v5884_v32  ;;  %3443 = vmatpush1.bf16.msra.mxu1 %v5887_v57  ;;  %v2788_v32 = vrot.slane %v2765_v31, %v823_v56 }
 0xac2   : > { %3403 = vmatprep.subr.bf16.mxu0 %v5892_v33  ;;  %3444 = vmatprep.subr.bf16.mxu1 %v5895_v35 }
 0xac5   : > { %3404 = vmatpush1.bf16.msra.mxu0 %v5890_v36  ;;  %3445 = vmatpush1.bf16.msra.mxu1 %v5893_v37  ;;  %v2772_v36 = vrot.slane %v2765_v31, %v6757_v7 }
 0xac6   : > { %3405 = vmatprep.subr.bf16.mxu0 %v5898_v38  ;;  %3446 = vmatprep.subr.bf16.mxu1 %v5901_v39 }
 0xac9   : > { %3406 = vmatpush1.bf16.msra.mxu0 %v5896_v40  ;;  %3447 = vmatpush1.bf16.msra.mxu1 %v5899_v41  ;;  %v2796_v40 = vrot.slane %v2765_v31, %v831_v8 }
 0xaca   : > { %3473 = vmatprep.subr.bf16.mxu0 %v5904_v42  ;;  %3514 = vmatprep.subr.bf16.mxu1 %v5907_v43  ;;  %v2776_v42 = vrot.slane %v2765_v31, %v6763_v11 }
 0xacc   : > { %3424 = vmatmul.mubr.bf16.vlgmr.msra.gmra.mxu0 %v6883_v10  ;;  %3465 = vmatmul.mubr.bf16.vlgmr.msra.gmra.mxu1 %v6883_v10 }
 0xacd   : > { %3474 = vmatpush1.bf16.msra.mxu0 %v5902_v45  ;;  %3515 = vmatpush1.bf16.msra.mxu1 %v5905_v46 }
 0xace   : > { %3475 = vmatprep.subr.bf16.mxu0 %v5910_v47  ;;  %3516 = vmatprep.subr.bf16.mxu1 %v5913_v48 }
 0xacf   : > { %3505 = vmatprep.mubr.bf16.mxu0 %v6389_v44  ;;  %3546 = vmatprep.mubr.bf16.mxu1 %v6389_v44  ;;  %v5929_v44 = vld [vmem:[#allocation10 + $0x448] ss:$48 sps:$4 sm:$0xff]  }
 0xad1   : > { %3476 = vmatpush1.bf16.msra.mxu0 %v5908_v49  ;;  %3517 = vmatpush1.bf16.msra.mxu1 %v5911_v50 }
 0xad2   : > { %3477 = vmatprep.subr.bf16.mxu0 %v5916_v51  ;;  %3518 = vmatprep.subr.bf16.mxu1 %v5919_v52  ;;  %v2780_v52 = vrot.slane %v2765_v31, %v6773_v29 }
 0xad5   : > { %3478 = vmatpush1.bf16.msra.mxu0 %v5914_v54  ;;  %3519 = vmatpush1.bf16.msra.mxu1 %v5917_v55 }
 0xad6   : > { %3479 = vmatprep.subr.bf16.mxu0 %v5922_v58  ;;  %3520 = vmatprep.subr.bf16.mxu1 %v5925_v59 }
 0xad9   : > { %3480 = vmatpush1.bf16.msra.mxu0 %v5920_v60  ;;  %3521 = vmatpush1.bf16.msra.mxu1 %v5923_v61 }
 0xada   : > { %3481 = vmatprep.subr.bf16.mxu0 %v5928_v53  ;;  %3522 = vmatprep.subr.bf16.mxu1 %v5931_v63  ;;  %v2766_v53 = vld [vmem:[#allocation11 + $0x14] sm:$0xf] }
 0xadb   : > { %v2804_v63 = vrot.slane %v2766_v53, %v6757_v7 }
 0xadd   : > { %3482 = vmatpush1.bf16.msra.mxu0 %v5926_v0  ;;  %3523 = vmatpush1.bf16.msra.mxu1 %v5929_v44  ;;  %v2812_v0 = vrot.slane %v2766_v53, %v6773_v29  ;;  %v2808_v44 = vrot.slane %v2766_v53, %v6763_v11 }
 0xade   : > { %3483 = vmatprep.subr.bf16.mxu0 %v5934_v1  ;;  %3524 = vmatprep.subr.bf16.mxu1 %v5937_v5  ;;  %v2816_v1 = vrot.slane %v2766_v53, %v6777_v34 }
 0xae1   : > { %3484 = vmatpush1.bf16.msra.mxu0 %v5932_v6  ;;  %3525 = vmatpush1.bf16.msra.mxu1 %v5935_v9 }
 0xae2   : > { %3485 = vmatprep.subr.bf16.mxu0 %v5940_v12  ;;  %3526 = vmatprep.subr.bf16.mxu1 %v5943_v15 }
 0xae5   : > { %3486 = vmatpush1.bf16.msra.mxu0 %v5938_v17  ;;  %3527 = vmatpush1.bf16.msra.mxu1 %v5941_v19 }
 0xae6   : > { %3487 = vmatprep.subr.bf16.mxu0 %v5946_v20  ;;  %3528 = vmatprep.subr.bf16.mxu1 %v5949_v21 }
 0xae9   : > { %3488 = vmatpush1.bf16.msra.mxu0 %v5944_v22  ;;  %3529 = vmatpush1.bf16.msra.mxu1 %v5947_v23 }
 0xaea   : > { %5395 = vmatprep.subr.bf16.mxu0 %v6388_v13  ;;  %5401 = vmatprep.subr.bf16.mxu1 %v6388_v13 }
 0xaec   : > { %3506 = vmatmul.mubr.bf16.vlgmr.msra.gmra.mxu0 %v6883_v10  ;;  %3547 = vmatmul.mubr.bf16.vlgmr.msra.gmra.mxu1 %v6883_v10  ;;  %v2792_v10 = vrot.slane %v2765_v31, %v827_v4  ;;  %v2800_v4 = vrot.slane %v2765_v31, %v835_v16 }
 0xaed   : > { %5397 = vmatprep.mubr.msk.bf16.mxu0 %vm6390_vm1, %v6388_v13  ;;  %5403 = vmatprep.mubr.msk.bf16.mxu1 %vm6390_vm1, %v6388_v13 }
 0xb6c   : > { %v3343_v18 = vpop.f32.mrf.mxu0  ;;  %v3384_v24 = vpop.f32.mrf.mxu1 }
 0xb6d   : > { %v3344_v46 = vadd.f32 %v3343_v18, %v2772_v36  ;;  %v3385_v58 = vadd.f32 %v3384_v24, %v2780_v52 }
 0xb6e   : > { %v3345_v25 = vpop.f32.mrf.mxu0  ;;  %v3386_v26 = vpop.f32.mrf.mxu1 }
 0xb6f   : > { %v3346_v50 = vadd.f32 %v3345_v25, %v2776_v42  ;;  %v3555_v51 = vpack.c.bf16 %v3344_v46, %v3344_v46  ;;  %v3387_v59 = vadd.f32 %v3386_v26, %v2784_v3  ;;  %v3557_v60 = vpack.c.bf16 %v3385_v58, %v3385_v58 }
 0xb70   : > { %v3347_v27 = vpop.f32.mrf.mxu0  ;;  %v3388_v28 = vpop.f32.mrf.mxu1 }
 0xb71   : > { %v3556_v55 = vpack.c.bf16 %v3346_v50, %v3346_v50  ;;  %v3558_v61 = vpack.c.bf16 %v3387_v59, %v3387_v59 }
 0xb72   : > { %v3348_v62 = vpop.f32.mrf.mxu0  ;;  %v3389_v30 = vpop.f32.mrf.mxu1 }
 0xb73   : > { %v6048_v62 = vld [vmem:[%s587_s15] ss:$0 sm:$0xff] }
 0xb8c   : > { %v3425_v57 = vpop.f32.mrf.mxu0  ;;  %v3466_v33 = vpop.f32.mrf.mxu1 }
 0xb8d   : > { %v3426_v35 = vadd.f32 %v3425_v57, %v2788_v32  ;;  %v3467_v49 = vadd.f32 %v3466_v33, %v2796_v40 }
 0xb8e   : > { %v3427_v37 = vpop.f32.mrf.mxu0  ;;  %v3468_v38 = vpop.f32.mrf.mxu1 }
 0xb8f   : > { %v3559_v39 = vpack.c.bf16 %v3426_v35, %v3426_v35  ;;  %v3428_v41 = vadd.f32 %v3427_v37, %v2792_v10  ;;  %v3469_v8 = vadd.f32 %v3468_v38, %v2800_v4  ;;  %v3561_v54 = vpack.c.bf16 %v3467_v49, %v3467_v49 }
 0xb90   : > { %v3429_v43 = vpop.f32.mrf.mxu0  ;;  %v3470_v45 = vpop.f32.mrf.mxu1 }
 0xb91   : > { %v3560_v56 = vpack.c.bf16 %v3428_v41, %v3428_v41  ;;  %5396 = vmatpush3.bf16.xpose.msra.mxu0 %v3559_v39  ;;  %v3562_v16 = vpack.c.bf16 %v3469_v8, %v3469_v8 }
 0xb92   : > { %v3430_v47 = vpop.f32.mrf.mxu0  ;;  %v3471_v48 = vpop.f32.mrf.mxu1  ;;  %5407 = vmatprep.subr.bf16.mxu0 %v6388_v13 }
 0xb93   : > { %5402 = vmatpush3.bf16.xpose.msra.mxu1 %v3560_v56 }
 0xb94   : > { %5413 = vmatprep.subr.bf16.mxu1 %v6388_v13 }
 0xb98   : > { %5398 = vmatmul.mubr.bf16.vlgmr.msra.gmra.mxu0 %v3555_v51 }
 0xb99   : > { %5408 = vmatpush3.bf16.xpose.msra.mxu0 %v3561_v54  ;;  %5409 = vmatprep.mubr.msk.bf16.mxu0 %vm6390_vm1, %v6388_v13 }
 0xb9a   : > { %5404 = vmatmul.mubr.bf16.vlgmr.msra.gmra.mxu1 %v3556_v55  ;;  %5419 = vmatprep.subr.bf16.mxu0 %v6388_v13 }
 0xb9b   : > { %5414 = vmatpush3.bf16.xpose.msra.mxu1 %v3562_v16  ;;  %5415 = vmatprep.mubr.msk.bf16.mxu1 %vm6390_vm1, %v6388_v13 }
 0xb9c   : > { %5425 = vmatprep.subr.bf16.mxu1 %v6388_v13 }
 0xba0   : > { %5410 = vmatmul.mubr.bf16.vlgmr.msra.gmra.mxu0 %v3557_v60 }
 0xba1   : > { %5421 = vmatprep.mubr.msk.bf16.mxu0 %vm6390_vm1, %v6388_v13 }
 0xba2   : > { %5416 = vmatmul.mubr.bf16.vlgmr.msra.gmra.mxu1 %v3558_v61 }
 0xba3   : > { %5427 = vmatprep.mubr.msk.bf16.mxu1 %vm6390_vm1, %v6388_v13 }
 0xbac   : > { %v3507_v5 = vpop.f32.mrf.mxu0  ;;  %v3548_v6 = vpop.f32.mrf.mxu1 }
 0xbad   : > { %v3508_v9 = vadd.f32 %v3507_v5, %v2804_v63  ;;  %v6929_v12 = vadd.f32 %v3548_v6, %v2812_v0 }
 0xbae   : > { %v3509_v15 = vpop.f32.mrf.mxu0  ;;  %v3550_v17 = vpop.f32.mrf.mxu1 }
 0xbaf   : > { %v3563_v19 = vpack.c.bf16 %v3508_v9, %v3508_v9  ;;  %v3510_v20 = vadd.f32 %v3509_v15, %v2808_v44  ;;  %v6931_v21 = vadd.f32 %v3550_v17, %v2816_v1 }
 0xbb0   : > { %v3511_v22 = vpop.f32.mrf.mxu0  ;;  %v3552_v7 = vpop.f32.mrf.mxu1 }
 0xbb1   : > { %v3787_v29 = vsel %vm1829_vm2, %v3563_v19, 0  ;;  %v3564_v23 = vpack.c.bf16 %v3510_v20, %v3510_v20 }
 0xbb2   : > { %v3512_v11 = vpop.f32.mrf.mxu0  ;;  %v3553_v18 = vpop.f32.mrf.mxu1  ;;  %5420 = vmatpush3.bf16.msra.mxu0 %v3787_v29  ;;  %v3565_v29 = vpack.c.bf16 %v6929_v12, %v6929_v12 }
 0xbb3   : > { %v3833_v34 = vsel %vm1829_vm2, %v3564_v23, 0  ;;  %5431 = vmatprep.subr.bf16.mxu0 %v6388_v13  ;;  %v3566_v18 = vpack.c.bf16 %v6931_v21, %v6931_v21 }
 0xbb4   : > { %5426 = vmatpush3.bf16.msra.mxu1 %v3833_v34 }
 0xbb5   : > { %5437 = vmatprep.subr.bf16.mxu1 %v6388_v13  ;;  %v3925_v12 = vsel %vm1829_vm2, %v3566_v18, 0 }
 0xc58   : > { %v3601_v24 = vpop.f32.mrf.mxu0 }
 0xc59   : > { %v3727_v25 = vmul.f32 0.35355338, %v3601_v24 }
 0xc5a   : > { %v5399_v26 = vpop.f32.mrf.mxu0  ;;  %v3641_v27 = vpop.f32.mrf.mxu1 }
 0xc5b   : > { %v3728_v28 = vmul.f32 0.35355338, %v3641_v27  ;;  %v3731_v30 = vadd.f32 %v6048_v62, %v3727_v25  ;;  %v5950_v25 = vld [vmem:[#allocation13 + $0x178] sm:$0xff]   ;;  %v3879_v26 = vsel %vm1829_vm2, %v3565_v29, 0 }
 0xc5c   : > { %v3604_v31 = vpop.f32.mrf.mxu0  ;;  %v5405_v32 = vpop.f32.mrf.mxu1 }
 0xc5d   : > { %v3735_v10 = vsel %vm1777_vm3, %v3731_v30, -inf  ;;  %v3732_v57 = vadd.f32 %v6048_v62, %v3728_v28  ;;  %v5955_v28 = vld [vmem:[#allocation13 + $0x1f8] sm:$0xff]  }
 0xc5e   : > { %v3644_v33 = vpop.f32.mrf.mxu1  ;;  %3736 = vmax.xlane.f32.xlu1 %v3735_v10  ;;  %v5400_v35 = vpop.f32.mrf.mxu0  ;;  %v5951_v31 = vld [vmem:[#allocation13 + $0x138] sm:$0xff]  }
 0xc5f   : > { %v3738_v36 = vsel %vm1777_vm3, %v3732_v57, -inf  ;;  %v5957_v33 = vld [vmem:[#allocation13 + $0x1b8] sm:$0xff]  }
 0xc60   : > { %3739 = vmax.xlane.f32.xlu0 %v3738_v36  ;;  %v5406_v37 = vpop.f32.mrf.mxu1  ;;  %v3681_v38 = vpop.f32.mrf.mxu0  ;;  %v5959_v36 = vld [vmem:[#allocation13 + $0x1f0] sm:$0xff]  }
 0xc61   : > { %v3729_v39 = vmul.f32 0.35355338, %v3681_v38  ;;  %v5953_v37 = vld [vmem:[#allocation13 + $0x130] sm:$0xff]   ;;  %v5954_v38 = vld [vmem:[#allocation13 + $0x168] sm:$0xff]  }
 0xc62   : > { %v5411_v40 = vpop.f32.mrf.mxu0  ;;  %v3721_v41 = vpop.f32.mrf.mxu1 }
 0xc63   : > { %v3730_v42 = vmul.f32 0.35355338, %v3721_v41  ;;  %v3733_v43 = vadd.f32 %v6048_v62, %v3729_v39  ;;  %v5961_v39 = vld [vmem:[#allocation13 + $0x1b0] sm:$0xff]   ;;  %v5963_v40 = vld [vmem:[#allocation13 + $0x1e8] sm:$0xff]  }
 0xc64   : > { %v3684_v45 = vpop.f32.mrf.mxu0  ;;  %v5417_v56 = vpop.f32.mrf.mxu1  ;;  %v5956_v41 = vld [vmem:[#allocation13 + $0x128] sm:$0xff]  }
 0xc65   : > { %v3741_v4 = vsel %vm1777_vm3, %v3733_v43, -inf  ;;  %v3734_v46 = vadd.f32 %v6048_v62, %v3730_v42  ;;  %v5958_v42 = vld [vmem:[#allocation13 + $0x160] sm:$0xff]  }
 0xc66   : > { %v3724_v47 = vpop.f32.mrf.mxu1  ;;  %3742 = vmax.xlane.f32.xlu1 %v3741_v4  ;;  %v5412_v48 = vpop.f32.mrf.mxu0  ;;  %v5967_v45 = vld [vmem:[#allocation13 + $0x1e0] sm:$0xff]   ;;  %v5962_v4 = vld [vmem:[#allocation13 + $0x158] sm:$0xff]  }
 0xc67   : > { %v3744_v49 = vsel %vm1777_vm3, %v3734_v46, -inf  ;;  %v5960_v56 = vld [vmem:[#allocation13 + $0x120] sm:$0xff]   ;;  %v5971_v47 = vld [vmem:[#allocation13 + $0x1d8] sm:$0xff]  }
 0xc68   : > { %3745 = vmax.xlane.f32.xlu0 %v3744_v49  ;;  %v5418_v50 = vpop.f32.mrf.mxu1  ;;  %v5964_v48 = vld [vmem:[#allocation13 + $0x118] sm:$0xff]   ;;  %v5966_v49 = vld [vmem:[#allocation13 + $0x150] sm:$0xff]  }
 0xc69   : > { %v5973_v50 = vld [vmem:[#allocation13 + $0x198] sm:$0xff]  }
 0xce7   : > { %v3737_v8 = vpop.xlane.xlu1 %3736 }
 0xce8   : > { %v3747_v51 = vsub.f32 %v3731_v30, %v3737_v8  ;;  %v5968_v8 = vld [vmem:[#allocation13 + $0x110] sm:$0xff]  }
 0xce9   : > { %v3740_v52 = vpop.xlane.xlu0 %3739 }
 0xcea   : > { %v3751_v54 = vmul.f32 1.442695, %v3747_v51  ;;  %v3748_v55 = vsub.f32 %v3732_v57, %v3740_v52  ;;  %v5952_v57 = vld [vmem:[#allocation13 + $0x170] sm:$0xff]   ;;  %v5970_v51 = vld [vmem:[#allocation13 + $0x148] sm:$0xff]  }
 0xceb   : > { %v5972_v52 = vld [vmem:[#allocation13 + $0x108] sm:$0xff]  }
 0xcec   : > { %6024 = vpow2.f32 %v3751_v54  ;;  %v3753_v3 = vmul.f32 1.442695, %v3748_v55  ;;  %v5974_v54 = vld [vmem:[#allocation13 + $0x140] sm:$0xff]   ;;  %v5975_v55 = vld [vmem:[#allocation13 + $0x1d0] sm:$0xff]  }
 0xcee   : > { %6026 = vpow2.f32 %v3753_v3  ;;  %v5976_v3 = vld [vmem:[#allocation13 + $0x100] sm:$0xff]  }
 0xcef   : > { %v3743_v16 = vpop.xlane.xlu1 %3742 }
 0xcf0   : > { %v3749_v58 = vsub.f32 %v3733_v43, %v3743_v16  ;;  %v5965_v43 = vld [vmem:[#allocation13 + $0x1a8] sm:$0xff]   ;;  %v5977_v16 = vld [vmem:[#allocation13 + $0x190] sm:$0xff]  }
 0xcf1   : > { %v3746_v59 = vpop.xlane.xlu0 %3745 }
 0xcf2   : > { %v3755_v60 = vmul.f32 1.442695, %v3749_v58  ;;  %v3750_v61 = vsub.f32 %v3734_v46, %v3746_v59  ;;  %v5969_v46 = vld [vmem:[#allocation13 + $0x1a0] sm:$0xff]   ;;  %v5978_v58 = vld [vmem:[#allocation13 + $0x1c8] sm:$0xff]  }
 0xcf3   : > { %v5979_v59 = vld [vmem:[#allocation13 + $0x188] sm:$0xff]  }
 0xcf4   : > { %6028 = vpow2.f32 %v3755_v60  ;;  %v3757_v53 = vmul.f32 1.442695, %v3750_v61  ;;  %v5980_v60 = vld [vmem:[#allocation13 + $0x1c0] sm:$0xff]  }
 0xcf5   : > { %v5981_v61 = vld [vmem:[#allocation13 + $0x180] sm:$0xff]  }
 0xcf6   : > { %6030 = vpow2.f32 %v3757_v53 }
 0xcf9   : > { %v6025_v63 = vpop.eup %6024 }
 0xcfa   : > { %v3759_v0 = vsel %vm1777_vm3, %v6025_v63, 0.0 }
 0xcfb   : > { %v6027_v44 = vpop.eup %6026  ;;  %3760 = vadd.xlane.f32.xlu1 %v3759_v0 }
 0xcfc   : > { %v3762_v1 = vsel %vm1777_vm3, %v6027_v44, 0.0 }
 0xcfd   : > { %3763 = vadd.xlane.f32.xlu0 %v3762_v1 }
 0xd01   : > { %v6029_v5 = vpop.eup %6028 }
 0xd02   : > { %v3765_v6 = vsel %vm1777_vm3, %v6029_v5, 0.0 }
 0xd03   : > { %v6031_v9 = vpop.eup %6030  ;;  %3766 = vadd.xlane.f32.xlu1 %v3765_v6 }
 0xd04   : > { %v3768_v15 = vsel %vm1777_vm3, %v6031_v9, 0.0 }
 0xd05   : > { %3769 = vadd.xlane.f32.xlu0 %v3768_v15 }
 0xd84   : > { %v3761_v17 = vpop.xlane.xlu1 %3760 }
 0xd85   : > { %6032 = vrcp.f32 %v3761_v17 }
 0xd86   : > { %v3764_v19 = vpop.xlane.xlu0 %3763 }
 0xd87   : > { %6034 = vrcp.f32 %v3764_v19 }
 0xd8c   : > { %v3767_v20 = vpop.xlane.xlu1 %3766 }
 0xd8d   : > { %6036 = vrcp.f32 %v3767_v20 }
 0xd8e   : > { %v3770_v22 = vpop.xlane.xlu0 %3769 }
 0xd8f   : > { %6038 = vrcp.f32 %v3770_v22 }
 0xd92   : > { %v6033_v7 = vpop.eup %6032 }
 0xd93   : > { %v3775_v23 = vmul.f32 %v6033_v7, %v6025_v63 }
 0xd94   : > { %v6035_v11 = vpop.eup %6034 }
 0xd95   : > { %v3779_v34 = vpack.c.bf16 %v3775_v23, %v3775_v23  ;;  %v3776_v24 = vmul.f32 %v6035_v11, %v6027_v44 }
 0xd97   : > { %5422 = vmatmul.mubr.msk.bf16.vlgmr.msra.gmra.mxu0 %vm1777_vm3, %v3779_v34  ;;  %v3780_v27 = vpack.c.bf16 %v3776_v24, %v3776_v24 }
 0xd98   : > { %5432 = vmatpush3.bf16.msra.mxu0 %v3879_v26  ;;  %5433 = vmatprep.mubr.msk.bf16.mxu0 %vm6390_vm1, %v6388_v13 }
 0xd99   : > { %5428 = vmatmul.mubr.msk.bf16.vlgmr.msra.gmra.mxu1 %vm1777_vm3, %v3780_v27  ;;  %5245 = vmatprep.subr.bf16.mxu0 %v5950_v25 }
 0xd9a   : > { %v6037_v62 = vpop.eup %6036  ;;  %5438 = vmatpush3.bf16.msra.mxu1 %v3925_v12  ;;  %5439 = vmatprep.mubr.msk.bf16.mxu1 %vm6390_vm1, %v6388_v13 }
 0xd9b   : > { %v3777_v21 = vmul.f32 %v6037_v62, %v6029_v5  ;;  %5267 = vmatprep.subr.bf16.mxu1 %v5955_v28  ;;  %v5086_v62 = vld [vmem:[%s7054_s7 + $0x1] ss:$0 sm:$0xff] }
 0xd9c   : > { %v6039_v30 = vpop.eup %6038 }
 0xd9d   : > { %v3781_v32 = vpack.c.bf16 %v3777_v21, %v3777_v21  ;;  %v3778_v10 = vmul.f32 %v6039_v30, %v6031_v9 }
 0xd9f   : > { %5434 = vmatmul.mubr.msk.bf16.vlgmr.msra.gmra.mxu0 %vm1777_vm3, %v3781_v32  ;;  %v3782_v35 = vpack.c.bf16 %v3778_v10, %v3778_v10 }
 0xda0   : > { %5246 = vmatpush3.bf16.msra.mxu0 %v5951_v31 }
 0xda1   : > { %5440 = vmatmul.mubr.msk.bf16.vlgmr.msra.gmra.mxu1 %vm1777_vm3, %v3782_v35  ;;  %5247 = vmatprep.subr.bf16.mxu0 %v5952_v57 }
 0xda2   : > { %5268 = vmatpush3.bf16.msra.mxu1 %v5957_v33 }
 0xda3   : > { %5269 = vmatprep.subr.bf16.mxu1 %v5959_v36  ;;  %v5982_v36 = vld [vmem:[#allocation14 + $0x78] sm:$0xff]  }
 0xda4   : > { %5248 = vmatpush3.bf16.msra.mxu0 %v5953_v37  ;;  %v5983_v37 = vld [vmem:[#allocation14 + $0x70] sm:$0xff]  }
 0xda5   : > { %5249 = vmatprep.subr.bf16.mxu0 %v5954_v38 }
 0xda6   : > { %5270 = vmatpush3.bf16.msra.mxu1 %v5961_v39 }
 0xda7   : > { %5271 = vmatprep.subr.bf16.mxu1 %v5963_v40 }
 0xda8   : > { %5250 = vmatpush3.bf16.msra.mxu0 %v5956_v41 }
 0xda9   : > { %5251 = vmatprep.subr.bf16.mxu0 %v5958_v42 }
 0xdaa   : > { %5272 = vmatpush3.bf16.msra.mxu1 %v5965_v43  ;;  %v5984_v43 = vld [vmem:[#allocation14 + $0x68] sm:$0xff]  }
 0xdab   : > { %5273 = vmatprep.subr.bf16.mxu1 %v5967_v45  ;;  %v5985_v45 = vld [vmem:[#allocation14 + $0x60] sm:$0xff]  }
 0xdac   : > { %5252 = vmatpush3.bf16.msra.mxu0 %v5960_v56  ;;  %v5987_v56 = vld [vmem:[#allocation14 + $0x50] sm:$0xff]  }
 0xdad   : > { %5253 = vmatprep.subr.bf16.mxu0 %v5962_v4  ;;  %v5988_v4 = vld [vmem:[#allocation14 + $0x48] sm:$0xff]  }
 0xdae   : > { %5274 = vmatpush3.bf16.msra.mxu1 %v5969_v46  ;;  %v5989_v46 = vld [vmem:[#allocation14 + $0x40] sm:$0xff]  }
 0xdaf   : > { %5275 = vmatprep.subr.bf16.mxu1 %v5971_v47 }
 0xdb0   : > { %5254 = vmatpush3.bf16.msra.mxu0 %v5964_v48 }
 0xdb1   : > { %5255 = vmatprep.subr.bf16.mxu0 %v5966_v49 }
 0xdb2   : > { %5276 = vmatpush3.bf16.msra.mxu1 %v5973_v50 }
 0xdb3   : > { %5277 = vmatprep.subr.bf16.mxu1 %v5975_v55 }
 0xdb4   : > { %5256 = vmatpush3.bf16.msra.mxu0 %v5968_v8  ;;  %v5121_v8 = vld [vmem:[%s7055_s8 + $0x1] ss:$0 sm:$0xff] }
 0xdb5   : > { %5257 = vmatprep.subr.bf16.mxu0 %v5970_v51 }
 0xdb6   : > { %5278 = vmatpush3.bf16.msra.mxu1 %v5977_v16  ;;  %v5990_v16 = vld [vmem:[#allocation16 + $0x78] sm:$0xff]  }
 0xdb7   : > { %5279 = vmatprep.subr.bf16.mxu1 %v5978_v58  ;;  %v5991_v58 = vld [vmem:[#allocation16 + $0x70] sm:$0xff]  }
 0xdb8   : > { %5258 = vmatpush3.bf16.msra.mxu0 %v5972_v52  ;;  %v5122_v52 = vld [vmem:[%s7056_s9 + $0x1] ss:$0 sm:$0xff] }
 0xdb9   : > { %5259 = vmatprep.subr.bf16.mxu0 %v5974_v54 }
 0xdba   : > { %5280 = vmatpush3.bf16.msra.mxu1 %v5979_v59  ;;  %v5992_v59 = vld [vmem:[#allocation16 + $0x68] sm:$0xff]  }
 0xdbb   : > { %5281 = vmatprep.subr.bf16.mxu1 %v5980_v60  ;;  %v5993_v60 = vld [vmem:[#allocation16 + $0x60] sm:$0xff]  }
 0xdbc   : > { %5260 = vmatpush3.bf16.msra.mxu0 %v5976_v3 }
 0xdbd   : > { %5443 = vmatprep.subr.bf16.mxu0 %v6388_v13 }
 0xdbe   : > { %5282 = vmatpush3.bf16.msra.mxu1 %v5981_v61  ;;  %v5994_v61 = vld [vmem:[#allocation16 + $0x58] sm:$0xff]  }
 0xdbf   : > { %5463 = vmatprep.subr.bf16.mxu1 %v6388_v13 }
 0xe57   : > { %v3823_v53 = vpop.f32.mrf.mxu0 }
 0xe58   : > { %v3967_v1 = vpack.c.bf16 %v3823_v53, %v3823_v53  ;;  %v5995_v53 = vld [vmem:[#allocation16 + $0x50] sm:$0xff]  }
 0xe59   : > { %v5423_v63 = vpop.f32.mrf.mxu0  ;;  %v3869_v0 = vpop.f32.mrf.mxu1 }
 0xe5a   : > { %v3968_v44 = vpack.c.bf16 %v3869_v0, %v3869_v0  ;;  %v5996_v63 = vld [vmem:[#allocation16 + $0x48] sm:$0xff]   ;;  %v5997_v0 = vld [vmem:[#allocation16 + $0x40] sm:$0xff]  }
 0xe5b   : > { %v3826_v5 = vpop.f32.mrf.mxu0  ;;  %v5429_v6 = vpop.f32.mrf.mxu1 }
 0xe5c   : > { %4268 = vmatprep.mubr.bf16.mxu0 %v3968_v44  ;;  %v5124_v44 = vld [vmem:[%s7058_s11 + $0x1] ss:$0 sm:$0xff] }
 0xe5d   : > { %v5424_v9 = vpop.f32.mrf.mxu0  ;;  %v3872_v15 = vpop.f32.mrf.mxu1  ;;  %4269 = vmatmul.mubr.bf16.vlgmr.msra.gmra.mxu0 %v3967_v1 }
 0xe5e   : > { %5459 = vmatprep.mubr.msk.bf16.mxu0 %vm6390_vm1, %v6388_v13  ;;  %5444 = vmatpush3.bf16.msra.mxu0 %v5982_v36  ;;  %v5134_v36 = vld [vmem:[%s7060_s13 + $0x1] ss:$0 sm:$0xff] }
 0xe5f   : > { %v5430_v17 = vpop.f32.mrf.mxu1  ;;  %v3915_v19 = vpop.f32.mrf.mxu0  ;;  %5445 = vmatprep.subr.bf16.mxu0 %v6388_v13 }
 0xe60   : > { %v3969_v29 = vpack.c.bf16 %v3915_v19, %v3915_v19 }
 0xe61   : > { %v5435_v20 = vpop.f32.mrf.mxu0  ;;  %v3961_v22 = vpop.f32.mrf.mxu1 }
 0xe62   : > { %v3970_v7 = vpack.c.bf16 %v3961_v22, %v3961_v22  ;;  %5446 = vmatpush3.bf16.msra.mxu0 %v5983_v37 }
 0xe63   : > { %v3918_v23 = vpop.f32.mrf.mxu0  ;;  %v5441_v11 = vpop.f32.mrf.mxu1  ;;  %5447 = vmatprep.subr.bf16.mxu0 %v6388_v13 }
 0xe64   : > { %4308 = vmatprep.mubr.bf16.mxu1 %v3970_v7 }
 0xe65   : > { %v5436_v18 = vpop.f32.mrf.mxu0  ;;  %v3964_v34 = vpop.f32.mrf.mxu1  ;;  %4309 = vmatmul.mubr.bf16.vlgmr.msra.gmra.mxu1 %v3969_v29 }
 0xe66   : > { %5479 = vmatprep.mubr.msk.bf16.mxu1 %vm6390_vm1, %v6388_v13  ;;  %5448 = vmatpush3.bf16.msra.mxu0 %v5984_v43 }
 0xe67   : > { %v5442_v24 = vpop.f32.mrf.mxu1  ;;  %5449 = vmatprep.subr.bf16.mxu0 %v6388_v13  ;;  %5464 = vmatpush3.bf16.msra.mxu1 %v5990_v16 }
 0xe68   : > { %5465 = vmatprep.subr.bf16.mxu1 %v6388_v13 }
 0xe6a   : > { %5450 = vmatpush3.bf16.msra.mxu0 %v5985_v45 }
 0xe6b   : > { %5451 = vmatprep.subr.bf16.mxu0 %v6388_v13  ;;  %5466 = vmatpush3.bf16.msra.mxu1 %v5991_v58 }
 0xe6c   : > { %5467 = vmatprep.subr.bf16.mxu1 %v6388_v13 }
 0xe6f   : > { %5468 = vmatpush3.bf16.msra.mxu1 %v5992_v59 }
 0xe70   : > { %5469 = vmatprep.subr.bf16.mxu1 %v6388_v13 }
 0xe73   : > { %5470 = vmatpush3.bf16.msra.mxu1 %v5993_v60 }
 0xe74   : > { %5471 = vmatprep.subr.bf16.mxu1 %v6388_v13 }
 0xe77   : > { %5472 = vmatpush3.bf16.msra.mxu1 %v5994_v61 }
 0xe78   : > { %5473 = vmatprep.subr.bf16.mxu1 %v6388_v13 }
 0xe7b   : > { %5474 = vmatpush3.bf16.msra.mxu1 %v5995_v53 }
 0xe7c   : > { %5475 = vmatprep.subr.bf16.mxu1 %v6388_v13 }
 0xe7f   : > { %5476 = vmatpush3.bf16.msra.mxu1 %v5996_v63 }
 0xe80   : > { %5477 = vmatprep.subr.bf16.mxu1 %v6388_v13 }
 0xe83   : > { %5478 = vmatpush3.bf16.msra.mxu1 %v5997_v0 }
 0xf1d   : > { %v5261_v25 = vpop.f32.mrf.mxu0 }
 0xf1f   : > { %v5262_v26 = vpop.f32.mrf.mxu0 }
 0xf20   : > { %v5263_v12 = vadd.f32 %v5262_v26, %v5261_v25 }
 0xf21   : > { %v5264_v27 = vpop.f32.mrf.mxu0 }
 0xf22   : > { %v4271_v31 = vadd.f32 %v5263_v12, %v5086_v62 }
 0xf23   : > { %v5265_v28 = vpop.f32.mrf.mxu0 }
 0xf25   : > { %v5283_v21 = vpop.f32.mrf.mxu1 }
 0xf27   : > { %v5284_v30 = vpop.f32.mrf.mxu1 }
 0xf28   : > { %v5285_v32 = vadd.f32 %v5284_v30, %v5283_v21 }
 0xf29   : > { %v5286_v10 = vpop.f32.mrf.mxu1 }
 0xf2a   : > { %v4311_v57 = vadd.f32 %v5285_v32, %v4271_v31 }
 0xf2b   : > { %v5287_v33 = vpop.f32.mrf.mxu1 }
 0xf2c   : > { %v4316_v35 = vadd.f32 %v4311_v57, %v6879_v2  ;;  %v5986_v2 = vld [vmem:[#allocation14 + $0x58] sm:$0xff]  }
 0xf2d   : > { %5452 = vmatpush3.bf16.msra.mxu0 %v5986_v2 }
 0xf2e   : > { %4321 = vadd.xlane.f32.xlu0 %v4316_v35  ;;  %5453 = vmatprep.subr.bf16.mxu0 %v6388_v13 }
 0xf31   : > { %5454 = vmatpush3.bf16.msra.mxu0 %v5987_v56 }
 0xf32   : > { %5455 = vmatprep.subr.bf16.mxu0 %v6388_v13 }
 0xf35   : > { %5456 = vmatpush3.bf16.msra.mxu0 %v5988_v4 }
 0xf36   : > { %5457 = vmatprep.subr.bf16.mxu0 %v6388_v13 }
 0xf39   : > { %5458 = vmatpush3.bf16.msra.mxu0 %v5989_v46 }
 0xfb7   : > { %v4322_v38 = vpop.xlane.xlu0 %4321 }
 0xfb8   : > { %v4323_v39 = vmul.f32 0.03125, %v4322_v38 }
 0xfba   : > { %v4324_v40 = vsub.f32 %v4316_v35, %v4323_v39 }
 0xfbc   : > { %v4325_v41 = vmul.f32 %v6718_v14, %v4324_v40 }
 0xfbe   : > { %v4326_v42 = vmul.f32 %v4325_v41, %v4325_v41 }
 0xfc0   : > { %4327 = vadd.xlane.f32.xlu1 %v4326_v42 }
0x1049   : > { %v4328_v47 = vpop.xlane.xlu1 %4327 }
0x104a   : > { %v4329_v48 = vmul.f32 0.03125, %v4328_v47 }
0x104c   : > { %v4330_v49 = vadd.f32 1e-12, %v4329_v48 }
0x104e   : > { %6040 = vrsqrt.f32 %v4330_v49 }
0x105b   : > { %v6041_v50 = vpop.eup %6040 }
0x105c   : > { %v4332_v51 = vmul.f32 %v6041_v50, %v4324_v40  ;;  %v5145_v50 = vld [vmem:[%s7061_s14 + $0x1] ss:$0 sm:$0xff] }
0x105e   : > { %v4339_v54 = vmul.f32 %v5121_v8, %v4332_v51  ;;  %v5146_v51 = vld [vmem:[%s7118_s18 + $0x1] ss:$0 sm:$0xff] }
0x1060   : > { %v6985_v55 = vadd.f32 %v5122_v52, %v4339_v54 }
0x1062   : > { %v4347_v3 = vpack.c.bf16 %v6985_v55, %v6985_v55 }
0x1064   : > { %5460 = vmatmul.mubr.bf16.vlgmr.msra.gmra.mxu0 %v4347_v3 }
0x1124   : > { %v4455_v1 = vpop.f32.mrf.mxu0 }
0x1125   : > { %v4456_v5 = vadd.f32 %v5124_v44, %v4455_v1 }
0x1126   : > { %v5461_v6 = vpop.f32.mrf.mxu0 }
0x1127   : > { %v4462_v9 = vmul.f32 0.70710677, %v4456_v5  ;;  %v4461_v10 = vmul.f32 0.5, %v4456_v5 }
0x1128   : > { %v4458_v15 = vpop.f32.mrf.mxu0 }
0x1129   : > { %v4463_v17 = vand.u32 2147483647, %v4462_v9  ;;  %vm4482_vm5 = vcmp.ge.f32.partialorder %v4462_v9, 0.0 }
0x112a   : > { %v5462_v19 = vpop.f32.mrf.mxu0 }
0x112b   : > { %v4464_v20 = vmul.f32 0.3275911, %v4463_v17  ;;  %v4476_v7 = vsub.f32 0.0, %v4463_v17 }
0x112d   : > { %v4465_v22 = vadd.f32 1.0, %v4464_v20  ;;  %v4477_v29 = vmul.f32 %v4476_v7, %v4463_v17 }
0x112f   : > { %6042 = vrcp.f32 %v4465_v22  ;;  %v4478_v11 = vmul.f32 1.442695, %v4477_v29 }
0x1131   : > { %6044 = vpow2.f32 %v4478_v11 }
0x113c   : > { %v6043_v23 = vpop.eup %6042 }
0x113d   : > { %v4467_v13 = vmul.f32 1.0614054, %v6043_v23 }
0x113e   : > { %v6045_v62 = vpop.eup %6044 }
0x113f   : > { %v4468_v18 = vadd.f32 -1.4531521, %v4467_v13 }
0x1141   : > { %v4469_v34 = vmul.f32 %v6043_v23, %v4468_v18 }
0x1143   : > { %v4470_v24 = vadd.f32 1.4214138, %v4469_v34 }
0x1145   : > { %v4471_v25 = vmul.f32 %v6043_v23, %v4470_v24 }
0x1147   : > { %v4472_v26 = vadd.f32 -0.28449672, %v4471_v25 }
0x1149   : > { %v4473_v27 = vmul.f32 %v6043_v23, %v4472_v26 }
0x114b   : > { %v4474_v28 = vadd.f32 0.2548296, %v4473_v27 }
0x114d   : > { %v4475_v12 = vmul.f32 %v6043_v23, %v4474_v28 }
0x114f   : > { %v4480_v21 = vmul.f32 %v6045_v62, %v4475_v12 }
0x1151   : > { %v4481_v30 = vsub.f32 1.0, %v4480_v21 }
0x1153   : > { %v4483_v31 = vsub.f32 0.0, %v4481_v30 }
0x1155   : > { %v4484_v32 = vsel %vm4482_vm5, %v4481_v30, %v4483_v31 }
0x1156   : > { %v4485_v57 = vadd.f32 1.0, %v4484_v32 }
0x1158   : > { %v4486_v33 = vmul.f32 %v4485_v57, %v4461_v10 }
0x115a   : > { %v4487_v35 = vpack.c.bf16 %v4486_v33, %v4486_v33 }
0x115c   : > { %5480 = vmatmul.mubr.bf16.vlgmr.msra.gmra.mxu1 %v4487_v35 }
0x121c   : > { %v4595_v37 = vpop.f32.mrf.mxu1 }
0x121d   : > { %v4596_v38 = vadd.f32 %v5134_v36, %v4595_v37 }
0x121e   : > { %v5481_v39 = vpop.f32.mrf.mxu1 }
0x121f   : > { %v4601_v40 = vadd.f32 %v4596_v38, %v6985_v55 }
0x1220   : > { %v4598_v41 = vpop.f32.mrf.mxu1 }
0x1221   : > { %4606 = vadd.xlane.f32.xlu0 %v4601_v40 }
0x1222   : > { %v5482_v42 = vpop.f32.mrf.mxu1 }
0x12aa   : > { %v4607_v43 = vpop.xlane.xlu0 %4606 }
0x12ab   : > { %v4608_v45 = vmul.f32 0.03125, %v4607_v43 }
0x12ad   : > { %v4609_v2 = vsub.f32 %v4601_v40, %v4608_v45 }
0x12af   : > { %v4610_v56 = vmul.f32 %v6718_v14, %v4609_v2 }
0x12b1   : > { %v4611_v4 = vmul.f32 %v4610_v56, %v4610_v56 }
0x12b3   : > { %4612 = vadd.xlane.f32.xlu1 %v4611_v4 }
0x133c   : > { %v4613_v46 = vpop.xlane.xlu1 %4612 }
0x133d   : > { %v4614_v47 = vmul.f32 0.03125, %v4613_v46 }
0x133f   : > { %v4615_v48 = vadd.f32 1e-12, %v4614_v47 }
0x1341   : > { %6046 = vrsqrt.f32 %v4615_v48 }
0x134e   : > { %v6047_v49 = vpop.eup %6046 }
0x134f   : > { %v4617_v8 = vmul.f32 %v6047_v49, %v4609_v2 }
0x1351   : > { %v4624_v14 = vmul.f32 %v5145_v50, %v4617_v8 }
0x1353   : > { %v4631_v52 = vadd.f32 %v5146_v51, %v4624_v14 }
0x1355   : > { %4632 = vst [vmem:[%s667_s3] sm:$0xff] %v4631_v52 }
0x1356   : > { %6300 = shalt.err (!%p6297_p10)
}
0x1357   : > { %s6301_s4 = scalar_lea.hbm %s4645_s10, 128  ;;  %s6305_s15 = scalar_lea.hbm %s7119_s25, 256 }
0x1358   : > { %p6302_p11 = scmp.ne.s32.totalorder %s4645_s10, %s6301_s4  ;;  %p6306_p0 = scmp.lt.s32.totalorder %s4645_s10, %s7119_s25 }
0x1359   : > { %p6307_p3 = scmp.lt.s32.totalorder %s6305_s15, %s6301_s4 }
0x135a   : > { %p6303_p12 = pnand %p6302_p11, %p7120_p9 }
0x135b   : > { %p6308_p4 = por %p6307_p3, %p6306_p0 }
0x135c   : > { %p6304_p13 = pneg %p6303_p12 }
0x135e   : > { %p6309_p8 = pnand %p6308_p4, %p6304_p13 }
0x1360   : > { %6312 = shalt.err (!%p6309_p8)
}
0x1361   : > { %5515 = dma.vmem_to_hbm [thread:$0]  (%p7120_p9), %s4648_s30, 128, %s4645_s10, %s4634_s17  }
0x1362 PF: > { %s4659_s29 = sand.u32 1, %s6359_s21   ;;  %p7121_p1 = scmp.ne.s32.totalorder %s7103_s2, 0 }
0x1363   : > { %p7122_p6 = scmp.ge.s32.totalorder %s6371_s24, 2  ;;  %s4660_s6 = scalar_lea.sflag [#allocation4], %s4659_s29 }
0x1365   : > { %p5547_p2 = pnand %p7122_p6, %p7121_p1 }
0x1367   : > { %p5548_p7 = pneg %p5547_p2 }
0x1369   : > { %6354 = dma.done.wait (%p5548_p7), %s4660_s6, 128  }
0x136a   : > { %6356 = vsyncadd (%p5548_p7), %s4660_s6, 4294967168  ;;  %s7123_s5 = sld [smem:[#allocation25_spill]]  ;;  %p35_p5 = scmp.ge.s32.totalorder %s6589_s19, 4  }
0x136b   : > { %s7124_s23 = sld [smem:[#allocation26_spill]]  ;;  %s7125_s21 = smov %s6363_s22 }
0x136c   : > { %s7127_s24 = smov %s6589_s19  ;;  %37 = sbr.rel (!%p35_p5) target bundleno = 21 (0x15), region = 182 }
0x1370   : > { %s7126_s22 = smov %s7123_s5 }
0x1371   :  { %4665 = vsyncpa [#allocation3], 1 }
0x1372   :  { %4667 = vsyncpa [#allocation3 + $0x1], 1 }
0x1373   :  { %4668 = vsyncpa [#allocation6], 1 }
0x1374   :  { %4670 = vsyncpa [#allocation6 + $0x1], 1 }
0x1375   :  { %4671 = vsyncpa [#allocation9], 1 }
0x1376   :  { %4672 = vsyncpa [#allocation12], 1 }
0x1377   :  { %4673 = vsyncpa [#allocation15], 1 }
0x1378   :  { %4674 = vsyncpa [#allocation4], 1 }
0x1379   :  { %4676 = vsyncpa [#allocation4 + $0x1], 1 }

</bundles_post_ra>
